<compile_context>
chip_gen: v7x
topology: tpu7x:2x2x1
jax: 0.10.0
libtpu: 0.0.40
codegen_flags: <defaults>
</compile_context>

<pallas_src>
import math
import jax
import jax.numpy as jnp
from jax.experimental import pallas as pl
from jax.experimental.pallas import tpu as pltpu

# ----------------------------- hyper-parameters -----------------------------
B = 2              # batch
N = 128            # points per cloud
G = 8              # patches (groups)
S = N // G         # points per patch
CPAD = 8           # xyz coords padded 3 -> 8 (lane friendliness)
D_PN = 64          # pointnet hidden width
C = 32             # encoder_channel == decoder.embed_size
D_FF = 64          # transformer MLP hidden
L_ENC = 2          # encoder transformer layers
L_DEC = 1          # decoder transformer layers
L_TOT = L_ENC + L_DEC
AVG_TARGETS = 1    # cfg.average_targets
MASK_RATIO = 0.0   # cfg.mask_ratio (default) -> identity mask
NUM_BLOCKS = 1     # grid steps; 1 = whole batch per step (best on v5e/v6e).
                   # On v7x with large B, set to 2 so both TensorCores split it.
# TODO(synk): random masking / index gather for mask_ratio > 0 not implemented
#             (default config uses mask_ratio=0.0 -> all tokens kept).
# TODO(synk): soft_update(encoder, target_encoder, tau) and
#             hard_update(patch_encoder/pos_embed) are in-place parameter EMA
#             side effects; they do not affect the returned loss and are
#             omitted (target weights are tied to the encoder here).

_BF = jnp.bfloat16
_F32 = jnp.float32


# ------------------------------- kernel helpers ------------------------------
def _ln(x, g, b, eps=1e-5):
    mu = jnp.mean(x, axis=-1, keepdims=True)
    var = jnp.mean(jnp.square(x - mu), axis=-1, keepdims=True)
    return (x - mu) * jax.lax.rsqrt(var + eps) * g + b


def _ln_noaffine(x, eps=1e-5):
    mu = jnp.mean(x, axis=-1, keepdims=True)
    var = jnp.mean(jnp.square(x - mu), axis=-1, keepdims=True)
    return (x - mu) * jax.lax.rsqrt(var + eps)


# ------------------------------ fused forward kernel --------------------------
def _fused_kernel(x_ref,
                  pnw1_ref, pnw2_ref, wp_ref, misc_ref,
                  wqkv_ref, wo_ref, w1_ref, w2_ref, vecs_ref,
                  out_ref):
    bb = x_ref.shape[0]          # samples in this block
    M = bb * G                   # tokens in this block

    # packed global vectors (each in its own sublane row, lanes [0:width])
    pn_b1 = misc_ref[0:1, 0:D_PN]
    pn_b2 = misc_ref[1:2, 0:C]
    bp    = misc_ref[2:3, 0:C]
    ln_g  = misc_ref[3:4, 0:C]
    ln_b  = misc_ref[4:5, 0:C]

    # ---- patchify: consecutive grouping; centers = patch means ---------------
    pts = x_ref[...]                                     # (bb, N, CPAD) f32
    pts_g = pts.reshape(M, S, CPAD)
    centers = jnp.mean(pts_g, axis=1)                    # (M, CPAD)
    patches = (pts_g - centers[:, None, :]).reshape(M * S, CPAD)

    # ---- shared patch encoder (mini PointNet): whole batch in one matmul -----
    # TODO(synk): a lane-transposed PointNet (points on lanes) would be denser;
    #             kept row-major for simplicity at these tiny sizes.
    h = jnp.maximum(
        jnp.dot(patches.astype(_BF), pnw1_ref[...],
                preferred_element_type=_F32) + pn_b1, 0.0)        # (M*S, D_PN)
    f = (jnp.dot(h.astype(_BF), pnw2_ref[...],
                 preferred_element_type=_F32) + pn_b2)            # (M*S, C)
    tok = jnp.max(f.reshape(M, S, C), axis=1)                     # (M, C)

    # ---- positional embedding of centers --------------------------------------
    pe = (jnp.dot(centers.astype(_BF), wp_ref[...],
                  preferred_element_type=_F32) + bp)              # (M, C)
    z0 = tok + pe

    inv_sqrt_c = 1.0 / math.sqrt(C)

    def block(x, l):
        """Pre-LN single-head transformer block; x: (M, C); layer l (static)."""
        g1  = vecs_ref[l, 0:1, 0:C]
        b1n = vecs_ref[l, 1:2, 0:C]
        g2  = vecs_ref[l, 2:3, 0:C]
        b2n = vecs_ref[l, 3:4, 0:C]
        bm1 = vecs_ref[l, 4:5, 0:D_FF]
        bm2 = vecs_ref[l, 5:6, 0:C]

        h1 = _ln(x, g1, b1n)
        # fused QKV projection: one (M, C) x (C, 3C) matmul
        qkv = jnp.dot(h1.astype(_BF), wqkv_ref[l],
                      preferred_element_type=_F32)                # (M, 3C)
        qkv3 = qkv.reshape(bb, G, 3 * C)
        q = qkv3[..., 0:C]
        k = qkv3[..., C:2 * C]
        v = qkv3[..., 2 * C:3 * C]

        s = jnp.einsum("bqd,bkd->bqk", q.astype(_BF), k.astype(_BF),
                       preferred_element_type=_F32) * inv_sqrt_c  # (bb, G, G)
        s = s - jnp.max(s, axis=-1, keepdims=True)
        p = jnp.exp(s)
        p = p * pl.reciprocal(jnp.sum(p, axis=-1, keepdims=True), approx=True)
        a = jnp.einsum("bqk,bkd->bqd", p.astype(_BF), v.astype(_BF),
                       preferred_element_type=_F32)               # (bb, G, C)
        a2 = a.reshape(M, C)
        x = x + jnp.dot(a2.astype(_BF), wo_ref[l],
                        preferred_element_type=_F32)

        h2 = _ln(x, g2, b2n)
        m1 = jnp.maximum(
            jnp.dot(h2.astype(_BF), w1_ref[l],
                    preferred_element_type=_F32) + bm1, 0.0)      # (M, D_FF)
        return x + (jnp.dot(m1.astype(_BF), w2_ref[l],
                            preferred_element_type=_F32) + bm2)

    # ---- shared encoder pass (target weights tied to encoder -> reuse) --------
    hidden = []
    z = z0
    for l in range(L_ENC):
        z = block(z, l)
        hidden.append(z)
    z_enc = z                                            # (M, C)

    # ---- target aggregation: LN -> mean over last AVG_TARGETS -> LN -----------
    # (both LayerNorms kept even for AVG_TARGETS==1 to match the reference)
    acc = None
    for hdn in hidden[-AVG_TARGETS:]:
        hn = _ln_noaffine(hdn)
        acc = hn if acc is None else acc + hn
    z_full = _ln_noaffine(acc * (1.0 / AVG_TARGETS))     # (M, C)

    # ---- student path: mask(ratio=0) is identity; final LN; decoder ----------
    zp = _ln(z_enc, ln_g, ln_b)
    zd = zp + pe                                         # decoder pred_embed=True
    for l in range(L_DEC):
        zd = block(zd, L_ENC + l)
    z_pred = zd                                          # (M, C)

    # ---- SmoothL1 (beta=1) elements; reduction happens in the wrapper ---------
    d = z_pred - z_full
    ad = jnp.abs(d)
    sl1 = jnp.where(ad < 1.0, 0.5 * d * d, ad - 0.5)     # (M, C)

    # ---- lane-dense packed store: (bb, G, 4*C = 128) --------------------------
    out_ref[...] = jnp.concatenate(
        [z_full.reshape(bb, G, C),
         z_pred.reshape(bb, G, C),
         sl1.reshape(bb, G, C),
         jnp.zeros((bb, G, C), _F32)], axis=-1)


def _fused_forward(x_pad, p):
    """x_pad: (B, N, CPAD) -> packed (B, G, 4*C) slab [z_full|z_pred|sl1|pad]."""
    B_ = x_pad.shape[0]
    nb = NUM_BLOCKS
    assert B_ % nb == 0
    bb = B_ // nb

    const2 = lambda shp: pl.BlockSpec(shp, lambda i: (0, 0))
    const3 = lambda shp: pl.BlockSpec(shp, lambda i: (0, 0, 0))

    return pl.pallas_call(
        _fused_kernel,
        out_shape=jax.ShapeDtypeStruct((B_, G, 4 * C), jnp.float32),
        grid=(nb,),
        in_specs=[
            pl.BlockSpec((bb, N, CPAD), lambda i: (i, 0, 0)),   # point clouds
            const2((CPAD, D_PN)),                               # pointnet w1
            const2((D_PN, C)),                                  # pointnet w2
            const2((CPAD, C)),                                  # pos-embed w
            const2((8, 128)),                                   # packed global vecs
            const3((L_TOT, C, 3 * C)),                          # fused Wqkv
            const3((L_TOT, C, C)),                              # Wo
            const3((L_TOT, C, D_FF)),                           # mlp w1
            const3((L_TOT, D_FF, C)),                           # mlp w2
            const3((L_TOT, 8, 128)),                            # packed per-layer vecs
        ],
        out_specs=pl.BlockSpec((bb, G, 4 * C), lambda i: (i, 0, 0)),
        compiler_params=pltpu.CompilerParams(dimension_semantics=("parallel",)),
    )(x_pad,
      p["pn_w1"], p["pn_w2"], p["wp"], p["misc"],
      p["blk_wqkv"], p["blk_wo"], p["blk_w1"], p["blk_w2"], p["blk_vecs"])


# ------------------------------ parameter init ---------------------------------
def init_params(seed=42):
    key = jax.random.PRNGKey(seed)
    ks = jax.random.split(key, 8)
    n = lambda k, shp: (0.02 * jax.random.normal(k, shp)).astype(_BF)

    # packed global vectors (8, 128) f32:
    #   row 0: pointnet bias1 (D_PN)   row 1: pointnet bias2 (C)
    #   row 2: pos-embed bias (C)      row 3: final-LN gamma (C)
    #   row 4: final-LN beta (C)       rows 5-7: unused
    misc = jnp.zeros((8, 128), _F32)
    misc = misc.at[3, 0:C].set(1.0)

    # packed per-layer vectors (L_TOT, 8, 128) f32:
    #   row 0: ln1 gamma  row 1: ln1 beta  row 2: ln2 gamma  row 3: ln2 beta
    #   row 4: mlp bias1 (D_FF)  row 5: mlp bias2 (C)  rows 6-7: unused
    blk_vecs = jnp.zeros((L_TOT, 8, 128), _F32)
    blk_vecs = blk_vecs.at[:, 0, 0:C].set(1.0)
    blk_vecs = blk_vecs.at[:, 2, 0:C].set(1.0)

    # transformer blocks stacked: layers [0, L_ENC) = encoder, [L_ENC, L_TOT) = decoder
    return {
        "pn_w1": n(ks[0], (CPAD, D_PN)),
        "pn_w2": n(ks[1], (D_PN, C)),
        "wp":    n(ks[2], (CPAD, C)),
        "misc":  misc,
        "blk_wqkv": n(ks[3], (L_TOT, C, 3 * C)),   # fused [Wq | Wk | Wv]
        "blk_wo":   n(ks[4], (L_TOT, C, C)),
        "blk_w1":   n(ks[5], (L_TOT, C, D_FF)),
        "blk_w2":   n(ks[6], (L_TOT, D_FF, C)),
        "blk_vecs": blk_vecs,
    }


# --------------------------------- forward -------------------------------------
def p2v_forward(x, params):
    """x: (B, N, 3) float32 point cloud at t=0. Returns (loss, aux)."""
    B_ = x.shape[0]
    # pad xyz 3 -> CPAD once; everything else happens inside the fused kernel.
    x_pad = jnp.pad(x, ((0, 0), (0, 0), (0, CPAD - 3)))
    out = _fused_forward(x_pad, params)                  # (B, G, 4*C)

    z_full = jax.lax.stop_gradient(out[..., 0:C])        # (B, G, C)
    z_pred = out[..., C:2 * C]                           # (B, G, C)
    sl1 = out[..., 2 * C:3 * C]                          # SmoothL1 elements

    # masked mean with mask_ratio=0.0 -> all-ones mask: denominator is the
    # compile-time constant B*G*C (hoisted out of the kernel).
    loss = jnp.sum(sl1) / float(B_ * G * C)

    aux = {
        "z_full": z_full,
        "z_pred": z_pred,
        "loss": {"p2v": loss},
    }
    return loss, aux


# ----------------------------------- main ---------------------------------------
if __name__ == "__main__":
    params = init_params(seed=42)
    x = jax.random.normal(jax.random.PRNGKey(0), (B, N, 3), dtype=jnp.float32)
    fwd = jax.jit(p2v_forward)
    loss, aux = fwd(x, params)
    loss = jax.block_until_ready(loss)
    jax.block_until_ready(aux["z_pred"])
    assert loss.shape == () and bool(jnp.isfinite(loss))
    print("KERNEL_OK")
</pallas_src>

<mosaic_0001>
module attributes {stable_mosaic.version = 11 : i64} {
  func.func @_fused_kernel(%arg0: i32, %arg1: memref<2x128x8xf32, #tpu.memory_space<vmem>>, %arg2: memref<8x64xbf16, #tpu.memory_space<vmem>>, %arg3: memref<64x32xbf16, #tpu.memory_space<vmem>>, %arg4: memref<8x32xbf16, #tpu.memory_space<vmem>>, %arg5: memref<8x128xf32, #tpu.memory_space<vmem>>, %arg6: memref<3x32x96xbf16, #tpu.memory_space<vmem>>, %arg7: memref<3x32x32xbf16, #tpu.memory_space<vmem>>, %arg8: memref<3x32x64xbf16, #tpu.memory_space<vmem>>, %arg9: memref<3x64x32xbf16, #tpu.memory_space<vmem>>, %arg10: memref<3x8x128xf32, #tpu.memory_space<vmem>>, %arg11: memref<2x8x128xf32, #tpu.memory_space<vmem>>) attributes {dimension_semantics = [#tpu.dimension_semantics<parallel>], iteration_bounds = array<i64: 1>, scalar_prefetch = 0 : i64, scratch_operands = 0 : i64, tpu.core_type = #tpu.core_type<tc>, window_params = [{transform_indices = @transform_0, window_bounds = array<i64: 2, 128, 8>}, {pipeline_mode = #tpu.pipeline_mode<synchronous>, transform_indices = @transform_1, window_bounds = array<i64: 8, 64>}, {pipeline_mode = #tpu.pipeline_mode<synchronous>, transform_indices = @transform_2, window_bounds = array<i64: 64, 32>}, {pipeline_mode = #tpu.pipeline_mode<synchronous>, transform_indices = @transform_3, window_bounds = array<i64: 8, 32>}, {pipeline_mode = #tpu.pipeline_mode<synchronous>, transform_indices = @transform_4, window_bounds = array<i64: 8, 128>}, {pipeline_mode = #tpu.pipeline_mode<synchronous>, transform_indices = @transform_5, window_bounds = array<i64: 3, 32, 96>}, {pipeline_mode = #tpu.pipeline_mode<synchronous>, transform_indices = @transform_6, window_bounds = array<i64: 3, 32, 32>}, {pipeline_mode = #tpu.pipeline_mode<synchronous>, transform_indices = @transform_7, window_bounds = array<i64: 3, 32, 64>}, {pipeline_mode = #tpu.pipeline_mode<synchronous>, transform_indices = @transform_8, window_bounds = array<i64: 3, 64, 32>}, {pipeline_mode = #tpu.pipeline_mode<synchronous>, transform_indices = @transform_9, window_bounds = array<i64: 3, 8, 128>}, {transform_indices = @transform_10, window_bounds = array<i64: 2, 8, 128>}]} {
    %c0 = arith.constant 0 : index
    %c0_0 = arith.constant 0 : index
    %0 = vector.load %arg5[%c0, %c0_0] : memref<8x128xf32, #tpu.memory_space<vmem>>, vector<1x64xf32>
    %c1 = arith.constant 1 : index
    %c0_1 = arith.constant 0 : index
    %1 = vector.load %arg5[%c1, %c0_1] : memref<8x128xf32, #tpu.memory_space<vmem>>, vector<1x32xf32>
    %c2 = arith.constant 2 : index
    %c0_2 = arith.constant 0 : index
    %2 = vector.load %arg5[%c2, %c0_2] : memref<8x128xf32, #tpu.memory_space<vmem>>, vector<1x32xf32>
    %c3 = arith.constant 3 : index
    %c0_3 = arith.constant 0 : index
    %3 = vector.load %arg5[%c3, %c0_3] : memref<8x128xf32, #tpu.memory_space<vmem>>, vector<1x32xf32>
    %c4 = arith.constant 4 : index
    %c0_4 = arith.constant 0 : index
    %4 = vector.load %arg5[%c4, %c0_4] : memref<8x128xf32, #tpu.memory_space<vmem>>, vector<1x32xf32>
    %c0_5 = arith.constant 0 : index
    %c0_6 = arith.constant 0 : index
    %c0_7 = arith.constant 0 : index
    %5 = vector.load %arg1[%c0_5, %c0_6, %c0_7] : memref<2x128x8xf32, #tpu.memory_space<vmem>>, vector<2x128x8xf32>
    %6 = vector.shape_cast %5 : vector<2x128x8xf32> to vector<16x16x8xf32>
    %cst = arith.constant dense<0.000000e+00> : vector<16x8xf32>
    %7 = vector.multi_reduction <add>, %6, %cst [1] : vector<16x16x8xf32> to vector<16x8xf32>
    %cst_8 = arith.constant 1.600000e+01 : f32
    %8 = vector.broadcast %cst_8 : f32 to vector<16x8xf32>
    %9 = arith.divf %7, %8 : vector<16x8xf32>
    %10 = vector.shape_cast %9 : vector<16x8xf32> to vector<16x1x8xf32>
    %11 = vector.broadcast %10 : vector<16x1x8xf32> to vector<16x16x8xf32>
    %12 = arith.subf %6, %11 : vector<16x16x8xf32>
    %13 = vector.shape_cast %12 : vector<16x16x8xf32> to vector<256x8xf32>
    %14 = arith.truncf %13 : vector<256x8xf32> to vector<256x8xbf16>
    %c0_9 = arith.constant 0 : index
    %c0_10 = arith.constant 0 : index
    %15 = vector.load %arg2[%c0_9, %c0_10] : memref<8x64xbf16, #tpu.memory_space<vmem>>, vector<8x64xbf16>
    %cst_11 = arith.constant dense<0.000000e+00> : vector<256x64xf32>
    %16 = tpu.matmul %14, %15, %cst_11 {dimension_numbers = #tpu.dot_dimension_numbers<[1], [0], [0], [1], [0, 0, 1, 1], [], []>} : vector<256x8xbf16>, vector<8x64xbf16>, vector<256x64xf32> -> vector<256x64xf32>
    %17 = vector.broadcast %0 : vector<1x64xf32> to vector<256x64xf32>
    %18 = arith.addf %16, %17 : vector<256x64xf32>
    %cst_12 = arith.constant 0.000000e+00 : f32
    %19 = vector.broadcast %cst_12 : f32 to vector<256x64xf32>
    %20 = arith.maximumf %18, %19 : vector<256x64xf32>
    %21 = arith.truncf %20 : vector<256x64xf32> to vector<256x64xbf16>
    %c0_13 = arith.constant 0 : index
    %c0_14 = arith.constant 0 : index
    %22 = vector.load %arg3[%c0_13, %c0_14] : memref<64x32xbf16, #tpu.memory_space<vmem>>, vector<64x32xbf16>
    %cst_15 = arith.constant dense<0.000000e+00> : vector<256x32xf32>
    %23 = tpu.matmul %21, %22, %cst_15 {dimension_numbers = #tpu.dot_dimension_numbers<[1], [0], [0], [1], [0, 0, 1, 1], [], []>} : vector<256x64xbf16>, vector<64x32xbf16>, vector<256x32xf32> -> vector<256x32xf32>
    %24 = vector.broadcast %1 : vector<1x32xf32> to vector<256x32xf32>
    %25 = arith.addf %23, %24 : vector<256x32xf32>
    %26 = vector.shape_cast %25 : vector<256x32xf32> to vector<16x16x32xf32>
    %cst_16 = arith.constant dense<0xFF800000> : vector<16x32xf32>
    %27 = vector.multi_reduction <maximumf>, %26, %cst_16 [1] : vector<16x16x32xf32> to vector<16x32xf32>
    %28 = arith.truncf %9 : vector<16x8xf32> to vector<16x8xbf16>
    %c0_17 = arith.constant 0 : index
    %c0_18 = arith.constant 0 : index
    %29 = vector.load %arg4[%c0_17, %c0_18] : memref<8x32xbf16, #tpu.memory_space<vmem>>, vector<8x32xbf16>
    %cst_19 = arith.constant dense<0.000000e+00> : vector<16x32xf32>
    %30 = tpu.matmul %28, %29, %cst_19 {dimension_numbers = #tpu.dot_dimension_numbers<[1], [0], [0], [1], [0, 0, 1, 1], [], []>} : vector<16x8xbf16>, vector<8x32xbf16>, vector<16x32xf32> -> vector<16x32xf32>
    %31 = vector.broadcast %2 : vector<1x32xf32> to vector<16x32xf32>
    %32 = arith.addf %30, %31 : vector<16x32xf32>
    %33 = arith.addf %27, %32 : vector<16x32xf32>
    %c0_20 = arith.constant 0 : index
    %c0_21 = arith.constant 0 : index
    %c0_22 = arith.constant 0 : index
    %34 = vector.load %arg10[%c0_20, %c0_21, %c0_22] : memref<3x8x128xf32, #tpu.memory_space<vmem>>, vector<1x1x32xf32>
    %35 = vector.shape_cast %34 : vector<1x1x32xf32> to vector<1x32xf32>
    %c0_23 = arith.constant 0 : index
    %c1_24 = arith.constant 1 : index
    %c0_25 = arith.constant 0 : index
    %36 = vector.load %arg10[%c0_23, %c1_24, %c0_25] : memref<3x8x128xf32, #tpu.memory_space<vmem>>, vector<1x1x32xf32>
    %37 = vector.shape_cast %36 : vector<1x1x32xf32> to vector<1x32xf32>
    %c0_26 = arith.constant 0 : index
    %c2_27 = arith.constant 2 : index
    %c0_28 = arith.constant 0 : index
    %38 = vector.load %arg10[%c0_26, %c2_27, %c0_28] : memref<3x8x128xf32, #tpu.memory_space<vmem>>, vector<1x1x32xf32>
    %39 = vector.shape_cast %38 : vector<1x1x32xf32> to vector<1x32xf32>
    %c0_29 = arith.constant 0 : index
    %c3_30 = arith.constant 3 : index
    %c0_31 = arith.constant 0 : index
    %40 = vector.load %arg10[%c0_29, %c3_30, %c0_31] : memref<3x8x128xf32, #tpu.memory_space<vmem>>, vector<1x1x32xf32>
    %41 = vector.shape_cast %40 : vector<1x1x32xf32> to vector<1x32xf32>
    %c0_32 = arith.constant 0 : index
    %c4_33 = arith.constant 4 : index
    %c0_34 = arith.constant 0 : index
    %42 = vector.load %arg10[%c0_32, %c4_33, %c0_34] : memref<3x8x128xf32, #tpu.memory_space<vmem>>, vector<1x1x64xf32>
    %43 = vector.shape_cast %42 : vector<1x1x64xf32> to vector<1x64xf32>
    %c0_35 = arith.constant 0 : index
    %c5 = arith.constant 5 : index
    %c0_36 = arith.constant 0 : index
    %44 = vector.load %arg10[%c0_35, %c5, %c0_36] : memref<3x8x128xf32, #tpu.memory_space<vmem>>, vector<1x1x32xf32>
    %45 = vector.shape_cast %44 : vector<1x1x32xf32> to vector<1x32xf32>
    %cst_37 = arith.constant dense<0.000000e+00> : vector<16xf32>
    %46 = vector.multi_reduction <add>, %33, %cst_37 [1] : vector<16x32xf32> to vector<16xf32>
    %47 = vector.shape_cast %46 : vector<16xf32> to vector<16x1xf32>
    %cst_38 = arith.constant 3.200000e+01 : f32
    %48 = vector.broadcast %cst_38 : f32 to vector<16x1xf32>
    %49 = arith.divf %47, %48 : vector<16x1xf32>
    %50 = vector.broadcast %49 : vector<16x1xf32> to vector<16x32xf32>
    %51 = arith.subf %33, %50 : vector<16x32xf32>
    %52 = arith.mulf %51, %51 : vector<16x32xf32>
    %cst_39 = arith.constant dense<0.000000e+00> : vector<16xf32>
    %53 = vector.multi_reduction <add>, %52, %cst_39 [1] : vector<16x32xf32> to vector<16xf32>
    %54 = vector.shape_cast %53 : vector<16xf32> to vector<16x1xf32>
    %cst_40 = arith.constant 3.200000e+01 : f32
    %55 = vector.broadcast %cst_40 : f32 to vector<16x1xf32>
    %56 = arith.divf %54, %55 : vector<16x1xf32>
    %57 = vector.broadcast %49 : vector<16x1xf32> to vector<16x32xf32>
    %58 = arith.subf %33, %57 : vector<16x32xf32>
    %cst_41 = arith.constant 9.99999974E-6 : f32
    %59 = vector.broadcast %cst_41 : f32 to vector<16x1xf32>
    %60 = arith.addf %56, %59 : vector<16x1xf32>
    %61 = math.rsqrt %60 : vector<16x1xf32>
    %62 = vector.broadcast %61 : vector<16x1xf32> to vector<16x32xf32>
    %63 = arith.mulf %58, %62 : vector<16x32xf32>
    %64 = vector.broadcast %35 : vector<1x32xf32> to vector<16x32xf32>
    %65 = arith.mulf %63, %64 : vector<16x32xf32>
    %66 = vector.broadcast %37 : vector<1x32xf32> to vector<16x32xf32>
    %67 = arith.addf %65, %66 : vector<16x32xf32>
    %68 = arith.truncf %67 : vector<16x32xf32> to vector<16x32xbf16>
    %c0_42 = arith.constant 0 : index
    %c0_43 = arith.constant 0 : index
    %c0_44 = arith.constant 0 : index
    %69 = vector.load %arg6[%c0_42, %c0_43, %c0_44] : memref<3x32x96xbf16, #tpu.memory_space<vmem>>, vector<1x32x96xbf16>
    %70 = vector.shape_cast %69 : vector<1x32x96xbf16> to vector<32x96xbf16>
    %cst_45 = arith.constant dense<0.000000e+00> : vector<16x96xf32>
    %71 = tpu.matmul %68, %70, %cst_45 {dimension_numbers = #tpu.dot_dimension_numbers<[1], [0], [0], [1], [0, 0, 1, 1], [], []>} : vector<16x32xbf16>, vector<32x96xbf16>, vector<16x96xf32> -> vector<16x96xf32>
    %72 = vector.shape_cast %71 : vector<16x96xf32> to vector<2x8x96xf32>
    %73 = vector.extract_strided_slice %72 {offsets = [0, 0, 0], sizes = [2, 8, 32], strides = [1, 1, 1]} : vector<2x8x96xf32> to vector<2x8x32xf32>
    %74 = vector.extract_strided_slice %72 {offsets = [0, 0, 32], sizes = [2, 8, 32], strides = [1, 1, 1]} : vector<2x8x96xf32> to vector<2x8x32xf32>
    %75 = vector.extract_strided_slice %72 {offsets = [0, 0, 64], sizes = [2, 8, 32], strides = [1, 1, 1]} : vector<2x8x96xf32> to vector<2x8x32xf32>
    %76 = arith.truncf %73 : vector<2x8x32xf32> to vector<2x8x32xbf16>
    %77 = arith.truncf %74 : vector<2x8x32xf32> to vector<2x8x32xbf16>
    "tpu.trace_start"() <{level = 10 : i32, message = "bqd,bkd->bqk"}> : () -> ()
    %cst_46 = arith.constant dense<0.000000e+00> : vector<2x8x8xf32>
    %78 = tpu.matmul %76, %77, %cst_46 {dimension_numbers = #tpu.dot_dimension_numbers<[2], [2], [1], [1], [0, 0, 0, 1, 1, 1], [0], [0]>} : vector<2x8x32xbf16>, vector<2x8x32xbf16>, vector<2x8x8xf32> -> vector<2x8x8xf32>
    "tpu.trace_stop"() : () -> ()
    %cst_47 = arith.constant 0.176776692 : f32
    %79 = vector.broadcast %cst_47 : f32 to vector<2x8x8xf32>
    %80 = arith.mulf %78, %79 : vector<2x8x8xf32>
    %cst_48 = arith.constant dense<0xFF800000> : vector<2x8xf32>
    %81 = vector.multi_reduction <maximumf>, %80, %cst_48 [2] : vector<2x8x8xf32> to vector<2x8xf32>
    %82 = vector.shape_cast %81 : vector<2x8xf32> to vector<2x8x1xf32>
    %83 = vector.broadcast %82 : vector<2x8x1xf32> to vector<2x8x8xf32>
    %84 = arith.subf %80, %83 : vector<2x8x8xf32>
    %85 = math.exp %84 : vector<2x8x8xf32>
    %cst_49 = arith.constant dense<0.000000e+00> : vector<2x8xf32>
    %86 = vector.multi_reduction <add>, %85, %cst_49 [2] : vector<2x8x8xf32> to vector<2x8xf32>
    %87 = vector.shape_cast %86 : vector<2x8xf32> to vector<2x8x1xf32>
    %88 = tpu.reciprocal %87 {approx = true} : vector<2x8x1xf32> -> vector<2x8x1xf32>
    %89 = vector.broadcast %88 : vector<2x8x1xf32> to vector<2x8x8xf32>
    %90 = arith.mulf %85, %89 : vector<2x8x8xf32>
    %91 = arith.truncf %90 : vector<2x8x8xf32> to vector<2x8x8xbf16>
    %92 = arith.truncf %75 : vector<2x8x32xf32> to vector<2x8x32xbf16>
    "tpu.trace_start"() <{level = 10 : i32, message = "bqk,bkd->bqd"}> : () -> ()
    %cst_50 = arith.constant dense<0.000000e+00> : vector<2x8x32xf32>
    %93 = tpu.matmul %91, %92, %cst_50 {dimension_numbers = #tpu.dot_dimension_numbers<[2], [1], [1], [2], [0, 0, 0, 1, 1, 2], [0], [0]>} : vector<2x8x8xbf16>, vector<2x8x32xbf16>, vector<2x8x32xf32> -> vector<2x8x32xf32>
    "tpu.trace_stop"() : () -> ()
    %94 = vector.shape_cast %93 : vector<2x8x32xf32> to vector<16x32xf32>
    %95 = arith.truncf %94 : vector<16x32xf32> to vector<16x32xbf16>
    %c0_51 = arith.constant 0 : index
    %c0_52 = arith.constant 0 : index
    %c0_53 = arith.constant 0 : index
    %96 = vector.load %arg7[%c0_51, %c0_52, %c0_53] : memref<3x32x32xbf16, #tpu.memory_space<vmem>>, vector<1x32x32xbf16>
    %97 = vector.shape_cast %96 : vector<1x32x32xbf16> to vector<32x32xbf16>
    %cst_54 = arith.constant dense<0.000000e+00> : vector<16x32xf32>
    %98 = tpu.matmul %95, %97, %cst_54 {dimension_numbers = #tpu.dot_dimension_numbers<[1], [0], [0], [1], [0, 0, 1, 1], [], []>} : vector<16x32xbf16>, vector<32x32xbf16>, vector<16x32xf32> -> vector<16x32xf32>
    %99 = arith.addf %33, %98 : vector<16x32xf32>
    %cst_55 = arith.constant dense<0.000000e+00> : vector<16xf32>
    %100 = vector.multi_reduction <add>, %99, %cst_55 [1] : vector<16x32xf32> to vector<16xf32>
    %101 = vector.shape_cast %100 : vector<16xf32> to vector<16x1xf32>
    %cst_56 = arith.constant 3.200000e+01 : f32
    %102 = vector.broadcast %cst_56 : f32 to vector<16x1xf32>
    %103 = arith.divf %101, %102 : vector<16x1xf32>
    %104 = vector.broadcast %103 : vector<16x1xf32> to vector<16x32xf32>
    %105 = arith.subf %99, %104 : vector<16x32xf32>
    %106 = arith.mulf %105, %105 : vector<16x32xf32>
    %cst_57 = arith.constant dense<0.000000e+00> : vector<16xf32>
    %107 = vector.multi_reduction <add>, %106, %cst_57 [1] : vector<16x32xf32> to vector<16xf32>
    %108 = vector.shape_cast %107 : vector<16xf32> to vector<16x1xf32>
    %cst_58 = arith.constant 3.200000e+01 : f32
    %109 = vector.broadcast %cst_58 : f32 to vector<16x1xf32>
    %110 = arith.divf %108, %109 : vector<16x1xf32>
    %111 = vector.broadcast %103 : vector<16x1xf32> to vector<16x32xf32>
    %112 = arith.subf %99, %111 : vector<16x32xf32>
    %cst_59 = arith.constant 9.99999974E-6 : f32
    %113 = vector.broadcast %cst_59 : f32 to vector<16x1xf32>
    %114 = arith.addf %110, %113 : vector<16x1xf32>
    %115 = math.rsqrt %114 : vector<16x1xf32>
    %116 = vector.broadcast %115 : vector<16x1xf32> to vector<16x32xf32>
    %117 = arith.mulf %112, %116 : vector<16x32xf32>
    %118 = vector.broadcast %39 : vector<1x32xf32> to vector<16x32xf32>
    %119 = arith.mulf %117, %118 : vector<16x32xf32>
    %120 = vector.broadcast %41 : vector<1x32xf32> to vector<16x32xf32>
    %121 = arith.addf %119, %120 : vector<16x32xf32>
    %122 = arith.truncf %121 : vector<16x32xf32> to vector<16x32xbf16>
    %c0_60 = arith.constant 0 : index
    %c0_61 = arith.constant 0 : index
    %c0_62 = arith.constant 0 : index
    %123 = vector.load %arg8[%c0_60, %c0_61, %c0_62] : memref<3x32x64xbf16, #tpu.memory_space<vmem>>, vector<1x32x64xbf16>
    %124 = vector.shape_cast %123 : vector<1x32x64xbf16> to vector<32x64xbf16>
    %cst_63 = arith.constant dense<0.000000e+00> : vector<16x64xf32>
    %125 = tpu.matmul %122, %124, %cst_63 {dimension_numbers = #tpu.dot_dimension_numbers<[1], [0], [0], [1], [0, 0, 1, 1], [], []>} : vector<16x32xbf16>, vector<32x64xbf16>, vector<16x64xf32> -> vector<16x64xf32>
    %126 = vector.broadcast %43 : vector<1x64xf32> to vector<16x64xf32>
    %127 = arith.addf %125, %126 : vector<16x64xf32>
    %cst_64 = arith.constant 0.000000e+00 : f32
    %128 = vector.broadcast %cst_64 : f32 to vector<16x64xf32>
    %129 = arith.maximumf %127, %128 : vector<16x64xf32>
    %130 = arith.truncf %129 : vector<16x64xf32> to vector<16x64xbf16>
    %c0_65 = arith.constant 0 : index
    %c0_66 = arith.constant 0 : index
    %c0_67 = arith.constant 0 : index
    %131 = vector.load %arg9[%c0_65, %c0_66, %c0_67] : memref<3x64x32xbf16, #tpu.memory_space<vmem>>, vector<1x64x32xbf16>
    %132 = vector.shape_cast %131 : vector<1x64x32xbf16> to vector<64x32xbf16>
    %cst_68 = arith.constant dense<0.000000e+00> : vector<16x32xf32>
    %133 = tpu.matmul %130, %132, %cst_68 {dimension_numbers = #tpu.dot_dimension_numbers<[1], [0], [0], [1], [0, 0, 1, 1], [], []>} : vector<16x64xbf16>, vector<64x32xbf16>, vector<16x32xf32> -> vector<16x32xf32>
    %134 = vector.broadcast %45 : vector<1x32xf32> to vector<16x32xf32>
    %135 = arith.addf %133, %134 : vector<16x32xf32>
    %136 = arith.addf %99, %135 : vector<16x32xf32>
    %c1_69 = arith.constant 1 : index
    %c0_70 = arith.constant 0 : index
    %c0_71 = arith.constant 0 : index
    %137 = vector.load %arg10[%c1_69, %c0_70, %c0_71] : memref<3x8x128xf32, #tpu.memory_space<vmem>>, vector<1x1x32xf32>
    %138 = vector.shape_cast %137 : vector<1x1x32xf32> to vector<1x32xf32>
    %c1_72 = arith.constant 1 : index
    %c1_73 = arith.constant 1 : index
    %c0_74 = arith.constant 0 : index
    %139 = vector.load %arg10[%c1_72, %c1_73, %c0_74] : memref<3x8x128xf32, #tpu.memory_space<vmem>>, vector<1x1x32xf32>
    %140 = vector.shape_cast %139 : vector<1x1x32xf32> to vector<1x32xf32>
    %c1_75 = arith.constant 1 : index
    %c2_76 = arith.constant 2 : index
    %c0_77 = arith.constant 0 : index
    %141 = vector.load %arg10[%c1_75, %c2_76, %c0_77] : memref<3x8x128xf32, #tpu.memory_space<vmem>>, vector<1x1x32xf32>
    %142 = vector.shape_cast %141 : vector<1x1x32xf32> to vector<1x32xf32>
    %c1_78 = arith.constant 1 : index
    %c3_79 = arith.constant 3 : index
    %c0_80 = arith.constant 0 : index
    %143 = vector.load %arg10[%c1_78, %c3_79, %c0_80] : memref<3x8x128xf32, #tpu.memory_space<vmem>>, vector<1x1x32xf32>
    %144 = vector.shape_cast %143 : vector<1x1x32xf32> to vector<1x32xf32>
    %c1_81 = arith.constant 1 : index
    %c4_82 = arith.constant 4 : index
    %c0_83 = arith.constant 0 : index
    %145 = vector.load %arg10[%c1_81, %c4_82, %c0_83] : memref<3x8x128xf32, #tpu.memory_space<vmem>>, vector<1x1x64xf32>
    %146 = vector.shape_cast %145 : vector<1x1x64xf32> to vector<1x64xf32>
    %c1_84 = arith.constant 1 : index
    %c5_85 = arith.constant 5 : index
    %c0_86 = arith.constant 0 : index
    %147 = vector.load %arg10[%c1_84, %c5_85, %c0_86] : memref<3x8x128xf32, #tpu.memory_space<vmem>>, vector<1x1x32xf32>
    %148 = vector.shape_cast %147 : vector<1x1x32xf32> to vector<1x32xf32>
    %cst_87 = arith.constant dense<0.000000e+00> : vector<16xf32>
    %149 = vector.multi_reduction <add>, %136, %cst_87 [1] : vector<16x32xf32> to vector<16xf32>
    %150 = vector.shape_cast %149 : vector<16xf32> to vector<16x1xf32>
    %cst_88 = arith.constant 3.200000e+01 : f32
    %151 = vector.broadcast %cst_88 : f32 to vector<16x1xf32>
    %152 = arith.divf %150, %151 : vector<16x1xf32>
    %153 = vector.broadcast %152 : vector<16x1xf32> to vector<16x32xf32>
    %154 = arith.subf %136, %153 : vector<16x32xf32>
    %155 = arith.mulf %154, %154 : vector<16x32xf32>
    %cst_89 = arith.constant dense<0.000000e+00> : vector<16xf32>
    %156 = vector.multi_reduction <add>, %155, %cst_89 [1] : vector<16x32xf32> to vector<16xf32>
    %157 = vector.shape_cast %156 : vector<16xf32> to vector<16x1xf32>
    %cst_90 = arith.constant 3.200000e+01 : f32
    %158 = vector.broadcast %cst_90 : f32 to vector<16x1xf32>
    %159 = arith.divf %157, %158 : vector<16x1xf32>
    %160 = vector.broadcast %152 : vector<16x1xf32> to vector<16x32xf32>
    %161 = arith.subf %136, %160 : vector<16x32xf32>
    %cst_91 = arith.constant 9.99999974E-6 : f32
    %162 = vector.broadcast %cst_91 : f32 to vector<16x1xf32>
    %163 = arith.addf %159, %162 : vector<16x1xf32>
    %164 = math.rsqrt %163 : vector<16x1xf32>
    %165 = vector.broadcast %164 : vector<16x1xf32> to vector<16x32xf32>
    %166 = arith.mulf %161, %165 : vector<16x32xf32>
    %167 = vector.broadcast %138 : vector<1x32xf32> to vector<16x32xf32>
    %168 = arith.mulf %166, %167 : vector<16x32xf32>
    %169 = vector.broadcast %140 : vector<1x32xf32> to vector<16x32xf32>
    %170 = arith.addf %168, %169 : vector<16x32xf32>
    %171 = arith.truncf %170 : vector<16x32xf32> to vector<16x32xbf16>
    %c1_92 = arith.constant 1 : index
    %c0_93 = arith.constant 0 : index
    %c0_94 = arith.constant 0 : index
    %172 = vector.load %arg6[%c1_92, %c0_93, %c0_94] : memref<3x32x96xbf16, #tpu.memory_space<vmem>>, vector<1x32x96xbf16>
    %173 = vector.shape_cast %172 : vector<1x32x96xbf16> to vector<32x96xbf16>
    %cst_95 = arith.constant dense<0.000000e+00> : vector<16x96xf32>
    %174 = tpu.matmul %171, %173, %cst_95 {dimension_numbers = #tpu.dot_dimension_numbers<[1], [0], [0], [1], [0, 0, 1, 1], [], []>} : vector<16x32xbf16>, vector<32x96xbf16>, vector<16x96xf32> -> vector<16x96xf32>
    %175 = vector.shape_cast %174 : vector<16x96xf32> to vector<2x8x96xf32>
    %176 = vector.extract_strided_slice %175 {offsets = [0, 0, 0], sizes = [2, 8, 32], strides = [1, 1, 1]} : vector<2x8x96xf32> to vector<2x8x32xf32>
    %177 = vector.extract_strided_slice %175 {offsets = [0, 0, 32], sizes = [2, 8, 32], strides = [1, 1, 1]} : vector<2x8x96xf32> to vector<2x8x32xf32>
    %178 = vector.extract_strided_slice %175 {offsets = [0, 0, 64], sizes = [2, 8, 32], strides = [1, 1, 1]} : vector<2x8x96xf32> to vector<2x8x32xf32>
    %179 = arith.truncf %176 : vector<2x8x32xf32> to vector<2x8x32xbf16>
    %180 = arith.truncf %177 : vector<2x8x32xf32> to vector<2x8x32xbf16>
    "tpu.trace_start"() <{level = 10 : i32, message = "bqd,bkd->bqk"}> : () -> ()
    %cst_96 = arith.constant dense<0.000000e+00> : vector<2x8x8xf32>
    %181 = tpu.matmul %179, %180, %cst_96 {dimension_numbers = #tpu.dot_dimension_numbers<[2], [2], [1], [1], [0, 0, 0, 1, 1, 1], [0], [0]>} : vector<2x8x32xbf16>, vector<2x8x32xbf16>, vector<2x8x8xf32> -> vector<2x8x8xf32>
    "tpu.trace_stop"() : () -> ()
    %cst_97 = arith.constant 0.176776692 : f32
    %182 = vector.broadcast %cst_97 : f32 to vector<2x8x8xf32>
    %183 = arith.mulf %181, %182 : vector<2x8x8xf32>
    %cst_98 = arith.constant dense<0xFF800000> : vector<2x8xf32>
    %184 = vector.multi_reduction <maximumf>, %183, %cst_98 [2] : vector<2x8x8xf32> to vector<2x8xf32>
    %185 = vector.shape_cast %184 : vector<2x8xf32> to vector<2x8x1xf32>
    %186 = vector.broadcast %185 : vector<2x8x1xf32> to vector<2x8x8xf32>
    %187 = arith.subf %183, %186 : vector<2x8x8xf32>
    %188 = math.exp %187 : vector<2x8x8xf32>
    %cst_99 = arith.constant dense<0.000000e+00> : vector<2x8xf32>
    %189 = vector.multi_reduction <add>, %188, %cst_99 [2] : vector<2x8x8xf32> to vector<2x8xf32>
    %190 = vector.shape_cast %189 : vector<2x8xf32> to vector<2x8x1xf32>
    %191 = tpu.reciprocal %190 {approx = true} : vector<2x8x1xf32> -> vector<2x8x1xf32>
    %192 = vector.broadcast %191 : vector<2x8x1xf32> to vector<2x8x8xf32>
    %193 = arith.mulf %188, %192 : vector<2x8x8xf32>
    %194 = arith.truncf %193 : vector<2x8x8xf32> to vector<2x8x8xbf16>
    %195 = arith.truncf %178 : vector<2x8x32xf32> to vector<2x8x32xbf16>
    "tpu.trace_start"() <{level = 10 : i32, message = "bqk,bkd->bqd"}> : () -> ()
    %cst_100 = arith.constant dense<0.000000e+00> : vector<2x8x32xf32>
    %196 = tpu.matmul %194, %195, %cst_100 {dimension_numbers = #tpu.dot_dimension_numbers<[2], [1], [1], [2], [0, 0, 0, 1, 1, 2], [0], [0]>} : vector<2x8x8xbf16>, vector<2x8x32xbf16>, vector<2x8x32xf32> -> vector<2x8x32xf32>
    "tpu.trace_stop"() : () -> ()
    %197 = vector.shape_cast %196 : vector<2x8x32xf32> to vector<16x32xf32>
    %198 = arith.truncf %197 : vector<16x32xf32> to vector<16x32xbf16>
    %c1_101 = arith.constant 1 : index
    %c0_102 = arith.constant 0 : index
    %c0_103 = arith.constant 0 : index
    %199 = vector.load %arg7[%c1_101, %c0_102, %c0_103] : memref<3x32x32xbf16, #tpu.memory_space<vmem>>, vector<1x32x32xbf16>
    %200 = vector.shape_cast %199 : vector<1x32x32xbf16> to vector<32x32xbf16>
    %cst_104 = arith.constant dense<0.000000e+00> : vector<16x32xf32>
    %201 = tpu.matmul %198, %200, %cst_104 {dimension_numbers = #tpu.dot_dimension_numbers<[1], [0], [0], [1], [0, 0, 1, 1], [], []>} : vector<16x32xbf16>, vector<32x32xbf16>, vector<16x32xf32> -> vector<16x32xf32>
    %202 = arith.addf %136, %201 : vector<16x32xf32>
    %cst_105 = arith.constant dense<0.000000e+00> : vector<16xf32>
    %203 = vector.multi_reduction <add>, %202, %cst_105 [1] : vector<16x32xf32> to vector<16xf32>
    %204 = vector.shape_cast %203 : vector<16xf32> to vector<16x1xf32>
    %cst_106 = arith.constant 3.200000e+01 : f32
    %205 = vector.broadcast %cst_106 : f32 to vector<16x1xf32>
    %206 = arith.divf %204, %205 : vector<16x1xf32>
    %207 = vector.broadcast %206 : vector<16x1xf32> to vector<16x32xf32>
    %208 = arith.subf %202, %207 : vector<16x32xf32>
    %209 = arith.mulf %208, %208 : vector<16x32xf32>
    %cst_107 = arith.constant dense<0.000000e+00> : vector<16xf32>
    %210 = vector.multi_reduction <add>, %209, %cst_107 [1] : vector<16x32xf32> to vector<16xf32>
    %211 = vector.shape_cast %210 : vector<16xf32> to vector<16x1xf32>
    %cst_108 = arith.constant 3.200000e+01 : f32
    %212 = vector.broadcast %cst_108 : f32 to vector<16x1xf32>
    %213 = arith.divf %211, %212 : vector<16x1xf32>
    %214 = vector.broadcast %206 : vector<16x1xf32> to vector<16x32xf32>
    %215 = arith.subf %202, %214 : vector<16x32xf32>
    %cst_109 = arith.constant 9.99999974E-6 : f32
    %216 = vector.broadcast %cst_109 : f32 to vector<16x1xf32>
    %217 = arith.addf %213, %216 : vector<16x1xf32>
    %218 = math.rsqrt %217 : vector<16x1xf32>
    %219 = vector.broadcast %218 : vector<16x1xf32> to vector<16x32xf32>
    %220 = arith.mulf %215, %219 : vector<16x32xf32>
    %221 = vector.broadcast %142 : vector<1x32xf32> to vector<16x32xf32>
    %222 = arith.mulf %220, %221 : vector<16x32xf32>
    %223 = vector.broadcast %144 : vector<1x32xf32> to vector<16x32xf32>
    %224 = arith.addf %222, %223 : vector<16x32xf32>
    %225 = arith.truncf %224 : vector<16x32xf32> to vector<16x32xbf16>
    %c1_110 = arith.constant 1 : index
    %c0_111 = arith.constant 0 : index
    %c0_112 = arith.constant 0 : index
    %226 = vector.load %arg8[%c1_110, %c0_111, %c0_112] : memref<3x32x64xbf16, #tpu.memory_space<vmem>>, vector<1x32x64xbf16>
    %227 = vector.shape_cast %226 : vector<1x32x64xbf16> to vector<32x64xbf16>
    %cst_113 = arith.constant dense<0.000000e+00> : vector<16x64xf32>
    %228 = tpu.matmul %225, %227, %cst_113 {dimension_numbers = #tpu.dot_dimension_numbers<[1], [0], [0], [1], [0, 0, 1, 1], [], []>} : vector<16x32xbf16>, vector<32x64xbf16>, vector<16x64xf32> -> vector<16x64xf32>
    %229 = vector.broadcast %146 : vector<1x64xf32> to vector<16x64xf32>
    %230 = arith.addf %228, %229 : vector<16x64xf32>
    %cst_114 = arith.constant 0.000000e+00 : f32
    %231 = vector.broadcast %cst_114 : f32 to vector<16x64xf32>
    %232 = arith.maximumf %230, %231 : vector<16x64xf32>
    %233 = arith.truncf %232 : vector<16x64xf32> to vector<16x64xbf16>
    %c1_115 = arith.constant 1 : index
    %c0_116 = arith.constant 0 : index
    %c0_117 = arith.constant 0 : index
    %234 = vector.load %arg9[%c1_115, %c0_116, %c0_117] : memref<3x64x32xbf16, #tpu.memory_space<vmem>>, vector<1x64x32xbf16>
    %235 = vector.shape_cast %234 : vector<1x64x32xbf16> to vector<64x32xbf16>
    %cst_118 = arith.constant dense<0.000000e+00> : vector<16x32xf32>
    %236 = tpu.matmul %233, %235, %cst_118 {dimension_numbers = #tpu.dot_dimension_numbers<[1], [0], [0], [1], [0, 0, 1, 1], [], []>} : vector<16x64xbf16>, vector<64x32xbf16>, vector<16x32xf32> -> vector<16x32xf32>
    %237 = vector.broadcast %148 : vector<1x32xf32> to vector<16x32xf32>
    %238 = arith.addf %236, %237 : vector<16x32xf32>
    %239 = arith.addf %202, %238 : vector<16x32xf32>
    %cst_119 = arith.constant dense<0.000000e+00> : vector<16xf32>
    %240 = vector.multi_reduction <add>, %239, %cst_119 [1] : vector<16x32xf32> to vector<16xf32>
    %241 = vector.shape_cast %240 : vector<16xf32> to vector<16x1xf32>
    %cst_120 = arith.constant 3.200000e+01 : f32
    %242 = vector.broadcast %cst_120 : f32 to vector<16x1xf32>
    %243 = arith.divf %241, %242 : vector<16x1xf32>
    %244 = vector.broadcast %243 : vector<16x1xf32> to vector<16x32xf32>
    %245 = arith.subf %239, %244 : vector<16x32xf32>
    %246 = arith.mulf %245, %245 : vector<16x32xf32>
    %cst_121 = arith.constant dense<0.000000e+00> : vector<16xf32>
    %247 = vector.multi_reduction <add>, %246, %cst_121 [1] : vector<16x32xf32> to vector<16xf32>
    %248 = vector.shape_cast %247 : vector<16xf32> to vector<16x1xf32>
    %cst_122 = arith.constant 3.200000e+01 : f32
    %249 = vector.broadcast %cst_122 : f32 to vector<16x1xf32>
    %250 = arith.divf %248, %249 : vector<16x1xf32>
    %251 = vector.broadcast %243 : vector<16x1xf32> to vector<16x32xf32>
    %252 = arith.subf %239, %251 : vector<16x32xf32>
    %cst_123 = arith.constant 9.99999974E-6 : f32
    %253 = vector.broadcast %cst_123 : f32 to vector<16x1xf32>
    %254 = arith.addf %250, %253 : vector<16x1xf32>
    %255 = math.rsqrt %254 : vector<16x1xf32>
    %256 = vector.broadcast %255 : vector<16x1xf32> to vector<16x32xf32>
    %257 = arith.mulf %252, %256 : vector<16x32xf32>
    %cst_124 = arith.constant 1.000000e+00 : f32
    %258 = vector.broadcast %cst_124 : f32 to vector<16x32xf32>
    %259 = arith.mulf %257, %258 : vector<16x32xf32>
    %cst_125 = arith.constant dense<0.000000e+00> : vector<16xf32>
    %260 = vector.multi_reduction <add>, %259, %cst_125 [1] : vector<16x32xf32> to vector<16xf32>
    %261 = vector.shape_cast %260 : vector<16xf32> to vector<16x1xf32>
    %cst_126 = arith.constant 3.200000e+01 : f32
    %262 = vector.broadcast %cst_126 : f32 to vector<16x1xf32>
    %263 = arith.divf %261, %262 : vector<16x1xf32>
    %264 = vector.broadcast %263 : vector<16x1xf32> to vector<16x32xf32>
    %265 = arith.subf %259, %264 : vector<16x32xf32>
    %266 = arith.mulf %265, %265 : vector<16x32xf32>
    %cst_127 = arith.constant dense<0.000000e+00> : vector<16xf32>
    %267 = vector.multi_reduction <add>, %266, %cst_127 [1] : vector<16x32xf32> to vector<16xf32>
    %268 = vector.shape_cast %267 : vector<16xf32> to vector<16x1xf32>
    %cst_128 = arith.constant 3.200000e+01 : f32
    %269 = vector.broadcast %cst_128 : f32 to vector<16x1xf32>
    %270 = arith.divf %268, %269 : vector<16x1xf32>
    %271 = vector.broadcast %263 : vector<16x1xf32> to vector<16x32xf32>
    %272 = arith.subf %259, %271 : vector<16x32xf32>
    %cst_129 = arith.constant 9.99999974E-6 : f32
    %273 = vector.broadcast %cst_129 : f32 to vector<16x1xf32>
    %274 = arith.addf %270, %273 : vector<16x1xf32>
    %275 = math.rsqrt %274 : vector<16x1xf32>
    %276 = vector.broadcast %275 : vector<16x1xf32> to vector<16x32xf32>
    %277 = arith.mulf %272, %276 : vector<16x32xf32>
    %cst_130 = arith.constant dense<0.000000e+00> : vector<16xf32>
    %278 = vector.multi_reduction <add>, %239, %cst_130 [1] : vector<16x32xf32> to vector<16xf32>
    %279 = vector.shape_cast %278 : vector<16xf32> to vector<16x1xf32>
    %cst_131 = arith.constant 3.200000e+01 : f32
    %280 = vector.broadcast %cst_131 : f32 to vector<16x1xf32>
    %281 = arith.divf %279, %280 : vector<16x1xf32>
    %282 = vector.broadcast %281 : vector<16x1xf32> to vector<16x32xf32>
    %283 = arith.subf %239, %282 : vector<16x32xf32>
    %284 = arith.mulf %283, %283 : vector<16x32xf32>
    %cst_132 = arith.constant dense<0.000000e+00> : vector<16xf32>
    %285 = vector.multi_reduction <add>, %284, %cst_132 [1] : vector<16x32xf32> to vector<16xf32>
    %286 = vector.shape_cast %285 : vector<16xf32> to vector<16x1xf32>
    %cst_133 = arith.constant 3.200000e+01 : f32
    %287 = vector.broadcast %cst_133 : f32 to vector<16x1xf32>
    %288 = arith.divf %286, %287 : vector<16x1xf32>
    %289 = vector.broadcast %281 : vector<16x1xf32> to vector<16x32xf32>
    %290 = arith.subf %239, %289 : vector<16x32xf32>
    %cst_134 = arith.constant 9.99999974E-6 : f32
    %291 = vector.broadcast %cst_134 : f32 to vector<16x1xf32>
    %292 = arith.addf %288, %291 : vector<16x1xf32>
    %293 = math.rsqrt %292 : vector<16x1xf32>
    %294 = vector.broadcast %293 : vector<16x1xf32> to vector<16x32xf32>
    %295 = arith.mulf %290, %294 : vector<16x32xf32>
    %296 = vector.broadcast %3 : vector<1x32xf32> to vector<16x32xf32>
    %297 = arith.mulf %295, %296 : vector<16x32xf32>
    %298 = vector.broadcast %4 : vector<1x32xf32> to vector<16x32xf32>
    %299 = arith.addf %297, %298 : vector<16x32xf32>
    %300 = arith.addf %299, %32 : vector<16x32xf32>
    %c2_135 = arith.constant 2 : index
    %c0_136 = arith.constant 0 : index
    %c0_137 = arith.constant 0 : index
    %301 = vector.load %arg10[%c2_135, %c0_136, %c0_137] : memref<3x8x128xf32, #tpu.memory_space<vmem>>, vector<1x1x32xf32>
    %302 = vector.shape_cast %301 : vector<1x1x32xf32> to vector<1x32xf32>
    %c2_138 = arith.constant 2 : index
    %c1_139 = arith.constant 1 : index
    %c0_140 = arith.constant 0 : index
    %303 = vector.load %arg10[%c2_138, %c1_139, %c0_140] : memref<3x8x128xf32, #tpu.memory_space<vmem>>, vector<1x1x32xf32>
    %304 = vector.shape_cast %303 : vector<1x1x32xf32> to vector<1x32xf32>
    %c2_141 = arith.constant 2 : index
    %c2_142 = arith.constant 2 : index
    %c0_143 = arith.constant 0 : index
    %305 = vector.load %arg10[%c2_141, %c2_142, %c0_143] : memref<3x8x128xf32, #tpu.memory_space<vmem>>, vector<1x1x32xf32>
    %306 = vector.shape_cast %305 : vector<1x1x32xf32> to vector<1x32xf32>
    %c2_144 = arith.constant 2 : index
    %c3_145 = arith.constant 3 : index
    %c0_146 = arith.constant 0 : index
    %307 = vector.load %arg10[%c2_144, %c3_145, %c0_146] : memref<3x8x128xf32, #tpu.memory_space<vmem>>, vector<1x1x32xf32>
    %308 = vector.shape_cast %307 : vector<1x1x32xf32> to vector<1x32xf32>
    %c2_147 = arith.constant 2 : index
    %c4_148 = arith.constant 4 : index
    %c0_149 = arith.constant 0 : index
    %309 = vector.load %arg10[%c2_147, %c4_148, %c0_149] : memref<3x8x128xf32, #tpu.memory_space<vmem>>, vector<1x1x64xf32>
    %310 = vector.shape_cast %309 : vector<1x1x64xf32> to vector<1x64xf32>
    %c2_150 = arith.constant 2 : index
    %c5_151 = arith.constant 5 : index
    %c0_152 = arith.constant 0 : index
    %311 = vector.load %arg10[%c2_150, %c5_151, %c0_152] : memref<3x8x128xf32, #tpu.memory_space<vmem>>, vector<1x1x32xf32>
    %312 = vector.shape_cast %311 : vector<1x1x32xf32> to vector<1x32xf32>
    %cst_153 = arith.constant dense<0.000000e+00> : vector<16xf32>
    %313 = vector.multi_reduction <add>, %300, %cst_153 [1] : vector<16x32xf32> to vector<16xf32>
    %314 = vector.shape_cast %313 : vector<16xf32> to vector<16x1xf32>
    %cst_154 = arith.constant 3.200000e+01 : f32
    %315 = vector.broadcast %cst_154 : f32 to vector<16x1xf32>
    %316 = arith.divf %314, %315 : vector<16x1xf32>
    %317 = vector.broadcast %316 : vector<16x1xf32> to vector<16x32xf32>
    %318 = arith.subf %300, %317 : vector<16x32xf32>
    %319 = arith.mulf %318, %318 : vector<16x32xf32>
    %cst_155 = arith.constant dense<0.000000e+00> : vector<16xf32>
    %320 = vector.multi_reduction <add>, %319, %cst_155 [1] : vector<16x32xf32> to vector<16xf32>
    %321 = vector.shape_cast %320 : vector<16xf32> to vector<16x1xf32>
    %cst_156 = arith.constant 3.200000e+01 : f32
    %322 = vector.broadcast %cst_156 : f32 to vector<16x1xf32>
    %323 = arith.divf %321, %322 : vector<16x1xf32>
    %324 = vector.broadcast %316 : vector<16x1xf32> to vector<16x32xf32>
    %325 = arith.subf %300, %324 : vector<16x32xf32>
    %cst_157 = arith.constant 9.99999974E-6 : f32
    %326 = vector.broadcast %cst_157 : f32 to vector<16x1xf32>
    %327 = arith.addf %323, %326 : vector<16x1xf32>
    %328 = math.rsqrt %327 : vector<16x1xf32>
    %329 = vector.broadcast %328 : vector<16x1xf32> to vector<16x32xf32>
    %330 = arith.mulf %325, %329 : vector<16x32xf32>
    %331 = vector.broadcast %302 : vector<1x32xf32> to vector<16x32xf32>
    %332 = arith.mulf %330, %331 : vector<16x32xf32>
    %333 = vector.broadcast %304 : vector<1x32xf32> to vector<16x32xf32>
    %334 = arith.addf %332, %333 : vector<16x32xf32>
    %335 = arith.truncf %334 : vector<16x32xf32> to vector<16x32xbf16>
    %c2_158 = arith.constant 2 : index
    %c0_159 = arith.constant 0 : index
    %c0_160 = arith.constant 0 : index
    %336 = vector.load %arg6[%c2_158, %c0_159, %c0_160] : memref<3x32x96xbf16, #tpu.memory_space<vmem>>, vector<1x32x96xbf16>
    %337 = vector.shape_cast %336 : vector<1x32x96xbf16> to vector<32x96xbf16>
    %cst_161 = arith.constant dense<0.000000e+00> : vector<16x96xf32>
    %338 = tpu.matmul %335, %337, %cst_161 {dimension_numbers = #tpu.dot_dimension_numbers<[1], [0], [0], [1], [0, 0, 1, 1], [], []>} : vector<16x32xbf16>, vector<32x96xbf16>, vector<16x96xf32> -> vector<16x96xf32>
    %339 = vector.shape_cast %338 : vector<16x96xf32> to vector<2x8x96xf32>
    %340 = vector.extract_strided_slice %339 {offsets = [0, 0, 0], sizes = [2, 8, 32], strides = [1, 1, 1]} : vector<2x8x96xf32> to vector<2x8x32xf32>
    %341 = vector.extract_strided_slice %339 {offsets = [0, 0, 32], sizes = [2, 8, 32], strides = [1, 1, 1]} : vector<2x8x96xf32> to vector<2x8x32xf32>
    %342 = vector.extract_strided_slice %339 {offsets = [0, 0, 64], sizes = [2, 8, 32], strides = [1, 1, 1]} : vector<2x8x96xf32> to vector<2x8x32xf32>
    %343 = arith.truncf %340 : vector<2x8x32xf32> to vector<2x8x32xbf16>
    %344 = arith.truncf %341 : vector<2x8x32xf32> to vector<2x8x32xbf16>
    "tpu.trace_start"() <{level = 10 : i32, message = "bqd,bkd->bqk"}> : () -> ()
    %cst_162 = arith.constant dense<0.000000e+00> : vector<2x8x8xf32>
    %345 = tpu.matmul %343, %344, %cst_162 {dimension_numbers = #tpu.dot_dimension_numbers<[2], [2], [1], [1], [0, 0, 0, 1, 1, 1], [0], [0]>} : vector<2x8x32xbf16>, vector<2x8x32xbf16>, vector<2x8x8xf32> -> vector<2x8x8xf32>
    "tpu.trace_stop"() : () -> ()
    %cst_163 = arith.constant 0.176776692 : f32
    %346 = vector.broadcast %cst_163 : f32 to vector<2x8x8xf32>
    %347 = arith.mulf %345, %346 : vector<2x8x8xf32>
    %cst_164 = arith.constant dense<0xFF800000> : vector<2x8xf32>
    %348 = vector.multi_reduction <maximumf>, %347, %cst_164 [2] : vector<2x8x8xf32> to vector<2x8xf32>
    %349 = vector.shape_cast %348 : vector<2x8xf32> to vector<2x8x1xf32>
    %350 = vector.broadcast %349 : vector<2x8x1xf32> to vector<2x8x8xf32>
    %351 = arith.subf %347, %350 : vector<2x8x8xf32>
    %352 = math.exp %351 : vector<2x8x8xf32>
    %cst_165 = arith.constant dense<0.000000e+00> : vector<2x8xf32>
    %353 = vector.multi_reduction <add>, %352, %cst_165 [2] : vector<2x8x8xf32> to vector<2x8xf32>
    %354 = vector.shape_cast %353 : vector<2x8xf32> to vector<2x8x1xf32>
    %355 = tpu.reciprocal %354 {approx = true} : vector<2x8x1xf32> -> vector<2x8x1xf32>
    %356 = vector.broadcast %355 : vector<2x8x1xf32> to vector<2x8x8xf32>
    %357 = arith.mulf %352, %356 : vector<2x8x8xf32>
    %358 = arith.truncf %357 : vector<2x8x8xf32> to vector<2x8x8xbf16>
    %359 = arith.truncf %342 : vector<2x8x32xf32> to vector<2x8x32xbf16>
    "tpu.trace_start"() <{level = 10 : i32, message = "bqk,bkd->bqd"}> : () -> ()
    %cst_166 = arith.constant dense<0.000000e+00> : vector<2x8x32xf32>
    %360 = tpu.matmul %358, %359, %cst_166 {dimension_numbers = #tpu.dot_dimension_numbers<[2], [1], [1], [2], [0, 0, 0, 1, 1, 2], [0], [0]>} : vector<2x8x8xbf16>, vector<2x8x32xbf16>, vector<2x8x32xf32> -> vector<2x8x32xf32>
    "tpu.trace_stop"() : () -> ()
    %361 = vector.shape_cast %360 : vector<2x8x32xf32> to vector<16x32xf32>
    %362 = arith.truncf %361 : vector<16x32xf32> to vector<16x32xbf16>
    %c2_167 = arith.constant 2 : index
    %c0_168 = arith.constant 0 : index
    %c0_169 = arith.constant 0 : index
    %363 = vector.load %arg7[%c2_167, %c0_168, %c0_169] : memref<3x32x32xbf16, #tpu.memory_space<vmem>>, vector<1x32x32xbf16>
    %364 = vector.shape_cast %363 : vector<1x32x32xbf16> to vector<32x32xbf16>
    %cst_170 = arith.constant dense<0.000000e+00> : vector<16x32xf32>
    %365 = tpu.matmul %362, %364, %cst_170 {dimension_numbers = #tpu.dot_dimension_numbers<[1], [0], [0], [1], [0, 0, 1, 1], [], []>} : vector<16x32xbf16>, vector<32x32xbf16>, vector<16x32xf32> -> vector<16x32xf32>
    %366 = arith.addf %300, %365 : vector<16x32xf32>
    %cst_171 = arith.constant dense<0.000000e+00> : vector<16xf32>
    %367 = vector.multi_reduction <add>, %366, %cst_171 [1] : vector<16x32xf32> to vector<16xf32>
    %368 = vector.shape_cast %367 : vector<16xf32> to vector<16x1xf32>
    %cst_172 = arith.constant 3.200000e+01 : f32
    %369 = vector.broadcast %cst_172 : f32 to vector<16x1xf32>
    %370 = arith.divf %368, %369 : vector<16x1xf32>
    %371 = vector.broadcast %370 : vector<16x1xf32> to vector<16x32xf32>
    %372 = arith.subf %366, %371 : vector<16x32xf32>
    %373 = arith.mulf %372, %372 : vector<16x32xf32>
    %cst_173 = arith.constant dense<0.000000e+00> : vector<16xf32>
    %374 = vector.multi_reduction <add>, %373, %cst_173 [1] : vector<16x32xf32> to vector<16xf32>
    %375 = vector.shape_cast %374 : vector<16xf32> to vector<16x1xf32>
    %cst_174 = arith.constant 3.200000e+01 : f32
    %376 = vector.broadcast %cst_174 : f32 to vector<16x1xf32>
    %377 = arith.divf %375, %376 : vector<16x1xf32>
    %378 = vector.broadcast %370 : vector<16x1xf32> to vector<16x32xf32>
    %379 = arith.subf %366, %378 : vector<16x32xf32>
    %cst_175 = arith.constant 9.99999974E-6 : f32
    %380 = vector.broadcast %cst_175 : f32 to vector<16x1xf32>
    %381 = arith.addf %377, %380 : vector<16x1xf32>
    %382 = math.rsqrt %381 : vector<16x1xf32>
    %383 = vector.broadcast %382 : vector<16x1xf32> to vector<16x32xf32>
    %384 = arith.mulf %379, %383 : vector<16x32xf32>
    %385 = vector.broadcast %306 : vector<1x32xf32> to vector<16x32xf32>
    %386 = arith.mulf %384, %385 : vector<16x32xf32>
    %387 = vector.broadcast %308 : vector<1x32xf32> to vector<16x32xf32>
    %388 = arith.addf %386, %387 : vector<16x32xf32>
    %389 = arith.truncf %388 : vector<16x32xf32> to vector<16x32xbf16>
    %c2_176 = arith.constant 2 : index
    %c0_177 = arith.constant 0 : index
    %c0_178 = arith.constant 0 : index
    %390 = vector.load %arg8[%c2_176, %c0_177, %c0_178] : memref<3x32x64xbf16, #tpu.memory_space<vmem>>, vector<1x32x64xbf16>
    %391 = vector.shape_cast %390 : vector<1x32x64xbf16> to vector<32x64xbf16>
    %cst_179 = arith.constant dense<0.000000e+00> : vector<16x64xf32>
    %392 = tpu.matmul %389, %391, %cst_179 {dimension_numbers = #tpu.dot_dimension_numbers<[1], [0], [0], [1], [0, 0, 1, 1], [], []>} : vector<16x32xbf16>, vector<32x64xbf16>, vector<16x64xf32> -> vector<16x64xf32>
    %393 = vector.broadcast %310 : vector<1x64xf32> to vector<16x64xf32>
    %394 = arith.addf %392, %393 : vector<16x64xf32>
    %cst_180 = arith.constant 0.000000e+00 : f32
    %395 = vector.broadcast %cst_180 : f32 to vector<16x64xf32>
    %396 = arith.maximumf %394, %395 : vector<16x64xf32>
    %397 = arith.truncf %396 : vector<16x64xf32> to vector<16x64xbf16>
    %c2_181 = arith.constant 2 : index
    %c0_182 = arith.constant 0 : index
    %c0_183 = arith.constant 0 : index
    %398 = vector.load %arg9[%c2_181, %c0_182, %c0_183] : memref<3x64x32xbf16, #tpu.memory_space<vmem>>, vector<1x64x32xbf16>
    %399 = vector.shape_cast %398 : vector<1x64x32xbf16> to vector<64x32xbf16>
    %cst_184 = arith.constant dense<0.000000e+00> : vector<16x32xf32>
    %400 = tpu.matmul %397, %399, %cst_184 {dimension_numbers = #tpu.dot_dimension_numbers<[1], [0], [0], [1], [0, 0, 1, 1], [], []>} : vector<16x64xbf16>, vector<64x32xbf16>, vector<16x32xf32> -> vector<16x32xf32>
    %401 = vector.broadcast %312 : vector<1x32xf32> to vector<16x32xf32>
    %402 = arith.addf %400, %401 : vector<16x32xf32>
    %403 = arith.addf %366, %402 : vector<16x32xf32>
    %404 = arith.subf %403, %277 : vector<16x32xf32>
    %405 = math.absf %404 : vector<16x32xf32>
    %cst_185 = arith.constant 1.000000e+00 : f32
    %406 = vector.broadcast %cst_185 : f32 to vector<16x32xf32>
    %407 = arith.cmpf olt, %405, %406 : vector<16x32xf32>
    %cst_186 = arith.constant 5.000000e-01 : f32
    %408 = vector.broadcast %cst_186 : f32 to vector<16x32xf32>
    %409 = arith.mulf %408, %404 : vector<16x32xf32>
    %410 = arith.mulf %409, %404 : vector<16x32xf32>
    %cst_187 = arith.constant 5.000000e-01 : f32
    %411 = vector.broadcast %cst_187 : f32 to vector<16x32xf32>
    %412 = arith.subf %405, %411 : vector<16x32xf32>
    %413 = arith.select %407, %410, %412 : vector<16x32xi1>, vector<16x32xf32>
    %414 = vector.shape_cast %277 : vector<16x32xf32> to vector<2x8x32xf32>
    %415 = vector.shape_cast %403 : vector<16x32xf32> to vector<2x8x32xf32>
    %416 = vector.shape_cast %413 : vector<16x32xf32> to vector<2x8x32xf32>
    %cst_188 = arith.constant 0.000000e+00 : f32
    %417 = vector.broadcast %cst_188 : f32 to vector<2x8x32xf32>
    %418 = tpu.concatenate %414, %415, %416, %417 in 2 : vector<2x8x32xf32>, vector<2x8x32xf32>, vector<2x8x32xf32>, vector<2x8x32xf32> -> vector<2x8x128xf32>
    %c0_189 = arith.constant 0 : index
    %c0_190 = arith.constant 0 : index
    %c0_191 = arith.constant 0 : index
    %419 = vector.load %arg11[%c0_189, %c0_190, %c0_191] : memref<2x8x128xf32, #tpu.memory_space<vmem>>, vector<2x8x128xf32>
    tpu.vector_store %arg11[%c0_189, %c0_190, %c0_191], %418 {strides = array<i32>} : memref<2x8x128xf32, #tpu.memory_space<vmem>>, vector<2x8x128xf32>,
    return
  }
  func.func @transform_0(%arg0: i32) -> (i32, i32, i32) {
    %c0_i32 = arith.constant 0 : i32
    %c0_i32_0 = arith.constant 0 : i32
    %c0_i32_1 = arith.constant 0 : i32
    return %arg0, %c0_i32, %c0_i32_0 : i32, i32, i32
  }
  func.func @transform_1(%arg0: i32) -> (i32, i32) {
    %c0_i32 = arith.constant 0 : i32
    %c0_i32_0 = arith.constant 0 : i32
    %c0_i32_1 = arith.constant 0 : i32
    return %c0_i32, %c0_i32_0 : i32, i32
  }
  func.func @transform_2(%arg0: i32) -> (i32, i32) {
    %c0_i32 = arith.constant 0 : i32
    %c0_i32_0 = arith.constant 0 : i32
    %c0_i32_1 = arith.constant 0 : i32
    return %c0_i32, %c0_i32_0 : i32, i32
  }
  func.func @transform_3(%arg0: i32) -> (i32, i32) {
    %c0_i32 = arith.constant 0 : i32
    %c0_i32_0 = arith.constant 0 : i32
    %c0_i32_1 = arith.constant 0 : i32
    return %c0_i32, %c0_i32_0 : i32, i32
  }
  func.func @transform_4(%arg0: i32) -> (i32, i32) {
    %c0_i32 = arith.constant 0 : i32
    %c0_i32_0 = arith.constant 0 : i32
    %c0_i32_1 = arith.constant 0 : i32
    return %c0_i32, %c0_i32_0 : i32, i32
  }
  func.func @transform_5(%arg0: i32) -> (i32, i32, i32) {
    %c0_i32 = arith.constant 0 : i32
    %c0_i32_0 = arith.constant 0 : i32
    %c0_i32_1 = arith.constant 0 : i32
    %c0_i32_2 = arith.constant 0 : i32
    return %c0_i32, %c0_i32_0, %c0_i32_1 : i32, i32, i32
  }
  func.func @transform_6(%arg0: i32) -> (i32, i32, i32) {
    %c0_i32 = arith.constant 0 : i32
    %c0_i32_0 = arith.constant 0 : i32
    %c0_i32_1 = arith.constant 0 : i32
    %c0_i32_2 = arith.constant 0 : i32
    return %c0_i32, %c0_i32_0, %c0_i32_1 : i32, i32, i32
  }
  func.func @transform_7(%arg0: i32) -> (i32, i32, i32) {
    %c0_i32 = arith.constant 0 : i32
    %c0_i32_0 = arith.constant 0 : i32
    %c0_i32_1 = arith.constant 0 : i32
    %c0_i32_2 = arith.constant 0 : i32
    return %c0_i32, %c0_i32_0, %c0_i32_1 : i32, i32, i32
  }
  func.func @transform_8(%arg0: i32) -> (i32, i32, i32) {
    %c0_i32 = arith.constant 0 : i32
    %c0_i32_0 = arith.constant 0 : i32
    %c0_i32_1 = arith.constant 0 : i32
    %c0_i32_2 = arith.constant 0 : i32
    return %c0_i32, %c0_i32_0, %c0_i32_1 : i32, i32, i32
  }
  func.func @transform_9(%arg0: i32) -> (i32, i32, i32) {
    %c0_i32 = arith.constant 0 : i32
    %c0_i32_0 = arith.constant 0 : i32
    %c0_i32_1 = arith.constant 0 : i32
    %c0_i32_2 = arith.constant 0 : i32
    return %c0_i32, %c0_i32_0, %c0_i32_1 : i32, i32, i32
  }
  func.func @transform_10(%arg0: i32) -> (i32, i32, i32) {
    %c0_i32 = arith.constant 0 : i32
    %c0_i32_0 = arith.constant 0 : i32
    %c0_i32_1 = arith.constant 0 : i32
    return %arg0, %c0_i32, %c0_i32_0 : i32, i32, i32
  }
}

</mosaic_0001>

<bundles_post_ra>
// kernel: p2v_forward.1
= control target key start
LH: loop header
LB: loop body
LE: loop exit
PB: predicated region body
PF: predicated region fallthrough
CT: control target
= control target key end

     0   :  { %vm336_vm0 = vcmask 1043456   ;;  %vm73_vm1 = vcmask 64512   ;;  %vm993_vm2 = vcmask 1041409   ;;  %vm995_vm3 = vcmask 1042434   ;;  %s6363_s16 = smov 96   ;;  %s6364_s17 = smov 64   ;;  %s9243_s1 = inlined_call_operand.vmem [shape: bf16[8,64], index: 1, kind: input, shape index: {}]   ;;  %s9244_s0 = inlined_call_operand.vmem [shape: f32[2,128,8], index: 0, kind: input, shape index: {}]   ;;  %s9245_s2 = inlined_call_operand.vmem [shape: bf16[64,32], index: 2, kind: input, shape index: {}]   ;;  %s9246_s3 = inlined_call_operand.vmem [shape: bf16[8,32], index: 3, kind: input, shape index: {}]   ;;  %s9247_s4 = inlined_call_operand.vmem [shape: f32[8,128], index: 4, kind: input, shape index: {}]   ;;  %s9248_s5 = inlined_call_operand.vmem [shape: bf16[3,32,96], index: 5, kind: input, shape index: {}]   ;;  %s9249_s9 = inlined_call_operand.vmem [shape: f32[3,8,128], index: 9, kind: input, shape index: {}]   ;;  %s9250_s6 = inlined_call_operand.vmem [shape: bf16[3,32,32], index: 6, kind: input, shape index: {}]   ;;  %s9251_s7 = inlined_call_operand.vmem [shape: bf16[3,32,64], index: 7, kind: input, shape index: {}]   ;;  %s9252_s8 = inlined_call_operand.vmem [shape: bf16[3,64,32], index: 8, kind: input, shape index: {}]   ;;  %s9253_s10 = inlined_call_operand.vmem [shape: f32[2,8,128], index: 10, kind: output, shape index: {}]  }
   0x1   :  { %v283_v0 = vld [vmem:[%s9243_s1] sm:$0xf]  ;;  %v6432_v2 = vld [vmem:[%s9244_s0 + $0x8] sm:$0xff]  ;;  %v6443_v6 = vld [vmem:[%s9244_s0 + $0x10] sm:$0xff]  ;;  %vm997_vm4 = vcmask 1043459   ;;  %vm999_vm5 = vcmask 1044484  }
   0x2   :  { %v6427_v1 = vld [vmem:[%s9244_s0] sm:$0xff]  ;;  %6265 = vmatprep.subr.msk.bf16.mxu0 %vm336_vm0, %v283_v0  ;;  %v338_v3 = vsel %vm336_vm0, %v283_v0, 0  ;;  %v75_v5 = vsel %vm73_vm1, %v6432_v2, 0.0  ;;  %v6448_v7 = vld [vmem:[%s9244_s0 + $0x18] sm:$0xff]  ;;  %v83_v10 = vsel %vm73_vm1, %v6443_v6, 0.0  ;;  %v6462_v12 = vld [vmem:[%s9244_s0 + $0x28] sm:$0xff] }
   0x3   :  { %v74_v4 = vsel %vm73_vm1, %v6427_v1, 0.0  ;;  %v6453_v8 = vld [vmem:[%s9244_s0 + $0x20] sm:$0xff]  ;;  %6006 = vmatpush3.bf16.msra.mxu0 %v338_v3  ;;  %v84_v11 = vsel %vm73_vm1, %v6448_v7, 0.0  ;;  %v6469_v14 = vld [vmem:[%s9244_s0 + $0x30] sm:$0xff]  ;;  %v6474_v15 = vld [vmem:[%s9244_s0 + $0x38] sm:$0xff]  ;;  %v93_v17 = vsel %vm73_vm1, %v6462_v12, 0.0 }
   0x4   :  { %v76_v9 = vadd.f32 %v75_v5, %v74_v4  ;;  %v92_v13 = vsel %vm73_vm1, %v6453_v8, 0.0  ;;  %v85_v16 = vadd.f32 %v84_v11, %v83_v10  ;;  %v101_v18 = vsel %vm73_vm1, %v6469_v14, 0.0  ;;  %v6485_v20 = vld [vmem:[%s9244_s0 + $0x40] sm:$0xff]  ;;  %v6490_v21 = vld [vmem:[%s9244_s0 + $0x48] sm:$0xff]  ;;  %v6495_v22 = vld [vmem:[%s9244_s0 + $0x50] sm:$0xff] }
   0x5   :  { %v102_v19 = vsel %vm73_vm1, %v6474_v15, 0.0  ;;  %v94_v24 = vadd.f32 %v93_v17, %v92_v13  ;;  %v110_v26 = vsel %vm73_vm1, %v6485_v20, 0.0  ;;  %v6502_v27 = vld [vmem:[%s9244_s0 + $0x58] sm:$0xff]  ;;  %v6507_v28 = vld [vmem:[%s9244_s0 + $0x60] sm:$0xff]  ;;  %v6512_v29 = vld [vmem:[%s9244_s0 + $0x68] sm:$0xff]  ;;  %v111_v31 = vsel %vm73_vm1, %v6490_v21, 0.0 }
   0x6   :  { %v77_v23 = vrot.slane %v76_v9, 4  ;;  %v103_v25 = vadd.f32 %v102_v19, %v101_v18  ;;  %v86_v30 = vrot.slane %v85_v16, 4  ;;  %v119_v32 = vsel %vm73_vm1, %v6495_v22, 0.0  ;;  %v6523_v38 = vld [vmem:[%s9244_s0 + $0x70] sm:$0xff]  ;;  %v6532_v47 = vld [vmem:[%s9244_s0 + $0x78] sm:$0xff]  ;;  %v6271_v60 = vld [vmem:[%s9245_s2] sm:$0xff]  }
   0x7   :  { %v120_v33 = vsel %vm73_vm1, %v6502_v27, 0.0  ;;  %v95_v35 = vrot.slane %v94_v24, 4  ;;  %v112_v37 = vadd.f32 %v111_v31, %v110_v26  ;;  %v128_v41 = vsel %vm73_vm1, %v6507_v28, 0.0  ;;  %6039 = vmatprep.subr.bf16.mxu1 %v6271_v60  ;;  %v6272_v10 = vld [vmem:[%s9245_s2 + $0x8] sm:$0xff]  }
   0x8   :  { %v78_v34 = vadd.f32 %v77_v23, %v76_v9  ;;  %v104_v36 = vrot.slane %v103_v25, 4  ;;  %v87_v39 = vadd.f32 %v86_v30, %v85_v16  ;;  %v121_v40 = vadd.f32 %v120_v33, %v119_v32  ;;  %6040 = vmatpush3.bf16.msra.mxu1 %v6271_v60 }
   0x9   :  { %v129_v42 = vsel %vm73_vm1, %v6512_v29, 0.0  ;;  %v96_v44 = vadd.f32 %v95_v35, %v94_v24  ;;  %v113_v46 = vrot.slane %v112_v37, 4  ;;  %v137_v51 = vsel %vm73_vm1, %v6523_v38, 0.0  ;;  %6041 = vmatprep.subr.bf16.mxu1 %v6272_v10 }
   0xa   :  { %v79_v43 = vrot.slane %v78_v34, 2  ;;  %v105_v45 = vadd.f32 %v104_v36, %v103_v25  ;;  %v88_v48 = vrot.slane %v87_v39, 2  ;;  %v122_v49 = vrot.slane %v121_v40, 4 }
   0xb   :  { %v130_v50 = vadd.f32 %v129_v42, %v128_v41  ;;  %v97_v53 = vrot.slane %v96_v44, 2  ;;  %v114_v55 = vadd.f32 %v113_v46, %v112_v37  ;;  %v138_v59 = vsel %vm73_vm1, %v6532_v47, 0.0 }
   0xc   :  { %v80_v52 = vadd.f32 %v79_v43, %v78_v34  ;;  %v106_v54 = vrot.slane %v105_v45, 2  ;;  %v89_v56 = vadd.f32 %v88_v48, %v87_v39  ;;  %v123_v57 = vadd.f32 %v122_v49, %v121_v40  ;;  %6042 = vmatpush3.bf16.msra.mxu1 %v6272_v10 }
   0xd   :  { %v131_v58 = vrot.slane %v130_v50, 4  ;;  %v98_v62 = vadd.f32 %v97_v53, %v96_v44  ;;  %v115_v0 = vrot.slane %v114_v55, 2  ;;  %v139_v9 = vadd.f32 %v138_v59, %v137_v51 }
   0xe   :  { %v81_v61 = vrot.slane %v80_v52, 1  ;;  %v107_v63 = vadd.f32 %v106_v54, %v105_v45  ;;  %v90_v3 = vrot.slane %v89_v56, 1  ;;  %v124_v4 = vrot.slane %v123_v57, 2 }
   0xf   :  { %v132_v5 = vadd.f32 %v131_v58, %v130_v50  ;;  %v99_v13 = vrot.slane %v98_v62, 1  ;;  %v116_v17 = vadd.f32 %v115_v0, %v114_v55  ;;  %v140_v24 = vrot.slane %v139_v9, 4  ;;  %v6559_v58 = vld [vmem:[%s9244_s0 + $0x80] sm:$0xff] }
  0x10   :  { %v82_v11 = vadd.f32 %v81_v61, %v80_v52  ;;  %v108_v16 = vrot.slane %v107_v63, 1  ;;  %v91_v18 = vadd.f32 %v90_v3, %v89_v56  ;;  %v125_v19 = vadd.f32 %v124_v4, %v123_v57 }
  0x11   :  { %v133_v23 = vrot.slane %v132_v5, 2  ;;  %v100_v26 = vadd.f32 %v99_v13, %v98_v62  ;;  %v117_v31 = vrot.slane %v116_v17, 1  ;;  %v141_v35 = vadd.f32 %v140_v24, %v139_v9  ;;  %v6567_v62 = vld [vmem:[%s9244_s0 + $0x88] sm:$0xff] }
  0x12   :  { %v219_v25 = vmul.f32 0.0625, %v82_v11  ;;  %v109_v30 = vadd.f32 %v108_v16, %v107_v63  ;;  %v220_v32 = vmul.f32 0.0625, %v91_v18  ;;  %v126_v33 = vrot.slane %v125_v19, 1  ;;  %v6600_v18 = vld [vmem:[%s9244_s0 + $0xa8] sm:$0xff] }
  0x13   :  { %v134_v34 = vadd.f32 %v133_v23, %v132_v5  ;;  %v221_v40 = vmul.f32 0.0625, %v100_v26  ;;  %v146_v11 = vsel %vm73_vm1, %v6559_v58, 0.0  ;;  %v6608_v26 = vld [vmem:[%s9244_s0 + $0xb0] sm:$0xff]  ;;  %vm1001_vm6 = vcmask 1045509  }
  0x14   :  { %v235_v36 = vsub.f32 %v6427_v1, %v219_v25  ;;  %v236_v37 = vsub.f32 %v6432_v2, %v219_v25  ;;  %v940_v39 = vpack.c.bf16 %v219_v25, %v219_v25  ;;  %v237_v41 = vsub.f32 %v6443_v6, %v220_v32 }
  0x15   :  { %v238_v42 = vsub.f32 %v6448_v7, %v220_v32  ;;  %v941_v43 = vpack.c.bf16 %v220_v32, %v220_v32  ;;  %v222_v44 = vmul.f32 0.0625, %v109_v30  ;;  %v239_v48 = vsub.f32 %v6453_v8, %v221_v40  ;;  %v6613_v30 = vld [vmem:[%s9244_s0 + $0xb8] sm:$0xff] }
  0x16   :  { %v267_v45 = vpack.c.bf16 %v236_v37, %v235_v36  ;;  %v977_v46 = vunpack.c.l.b16 %v940_v39  ;;  %v240_v49 = vsub.f32 %v6462_v12, %v221_v40  ;;  %v942_v1 = vpack.c.bf16 %v221_v40, %v221_v40 }
  0x17   :  { %v268_v50 = vpack.c.bf16 %v238_v42, %v237_v41  ;;  %v978_v51 = vunpack.c.l.b16 %v941_v43  ;;  %v241_v2 = vsub.f32 %v6469_v14, %v222_v44  ;;  %v242_v6 = vsub.f32 %v6474_v15, %v222_v44  ;;  %v6640_v41 = vld [vmem:[%s9244_s0 + $0xd0] sm:$0xff]  ;;  %v6645_v42 = vld [vmem:[%s9244_s0 + $0xd8] sm:$0xff] }
  0x18   :  { %6007 = vmatprep.mubr.msk.bf16.mxu0 %vm73_vm1, %v267_v45  ;;  %v269_v52 = vpack.c.bf16 %v240_v49, %v239_v48  ;;  %v943_v53 = vpack.c.bf16 %v222_v44, %v222_v44  ;;  %v118_v7 = vadd.f32 %v117_v31, %v116_v17  ;;  %v979_v55 = vunpack.c.l.b16 %v942_v1  ;;  %v6618_v31 = vld [vmem:[%s9244_s0 + $0xc0] sm:$0xff] }
  0x19   :  { %6008 = vmatmul.mubr.msk.bf16.vlgmr.msra.gmra.mrb[0].mxu0 %vm73_vm1, %v268_v50  ;;  %v994_v54 = vsel %vm993_vm2, %v978_v51, %v977_v46  ;;  %v127_v8 = vadd.f32 %v126_v33, %v125_v19  ;;  %v135_v56 = vrot.slane %v134_v34, 1  ;;  %v142_v14 = vrot.slane %v141_v35, 2 }
  0x1a   :  { %6011 = vmatprep.mubr.msk.bf16.mxu0 %vm73_vm1, %v269_v52  ;;  %v980_v12 = vunpack.c.l.b16 %v943_v53  ;;  %v223_v57 = vmul.f32 0.0625, %v118_v7  ;;  %v996_v15 = vsel %vm995_vm3, %v979_v55, %v994_v54  ;;  %v270_v59 = vpack.c.bf16 %v242_v6, %v241_v2 }
  0x1b   :  { %v6562_v60 = vmul.f32 0.0625, %v127_v8  ;;  %v136_v61 = vadd.f32 %v135_v56, %v134_v34  ;;  %v143_v17 = vadd.f32 %v142_v14, %v141_v35  ;;  %v173_v43 = vsel %vm73_vm1, %v6608_v26, 0.0  ;;  %v6666_v56 = vld [vmem:[%s9244_s0 + $0xe0] sm:$0xff] }
  0x1c   :  { %v998_v63 = vsel %vm997_vm4, %v980_v12, %v996_v15  ;;  %v243_v0 = vsub.f32 %v6485_v20, %v223_v57  ;;  %v244_v3 = vsub.f32 %v6490_v21, %v223_v57  ;;  %v944_v4 = vpack.c.bf16 %v223_v57, %v223_v57  ;;  %v6585_v21 = vld [vmem:[%s9244_s0 + $0x90] sm:$0xff]  ;;  %v6671_v12 = vld [vmem:[%s9244_s0 + $0xe8] sm:$0xff] }
  0x1d   :  { %v245_v5 = vsub.f32 %v6495_v22, %v6562_v60  ;;  %v246_v9 = vsub.f32 %v6502_v27, %v6562_v60  ;;  %v6576_v10 = vmul.f32 0.0625, %v136_v61  ;;  %v147_v20 = vsel %vm73_vm1, %v6567_v62, 0.0  ;;  %v6590_v22 = vld [vmem:[%s9244_s0 + $0x98] sm:$0xff]  ;;  %v6595_v27 = vld [vmem:[%s9244_s0 + $0xa0] sm:$0xff] }
  0x1e   :  { %v271_v13 = vpack.c.bf16 %v244_v3, %v243_v0  ;;  %v981_v16 = vunpack.c.l.b16 %v944_v4  ;;  %v144_v24 = vrot.slane %v143_v17, 1  ;;  %v148_v25 = vadd.f32 %v147_v20, %v146_v11 }
  0x1f   :  { %v272_v23 = vpack.c.bf16 %v246_v9, %v245_v5  ;;  %v247_v32 = vsub.f32 %v6507_v28, %v6576_v10  ;;  %v155_v33 = vsel %vm73_vm1, %v6585_v21, 0.0  ;;  %v156_v34 = vsel %vm73_vm1, %v6590_v22, 0.0  ;;  %v6635_v28 = vld [vmem:[%s9244_s0 + $0xc8] sm:$0xff] }
  0x20   :  { %v6603_v19 = vsel %vm999_vm5, %v981_v16, %v998_v63  ;;  %v164_v35 = vsel %vm73_vm1, %v6595_v27, 0.0  ;;  %v248_v36 = vsub.f32 %v6512_v29, %v6576_v10  ;;  %v145_v37 = vadd.f32 %v144_v24, %v143_v17 }
  0x21   :  { %6012 = vmatmul.mubr.msk.bf16.gmra.mrb[4].mxu0 %vm73_vm1, %v270_v59  ;;  %v149_v39 = vrot.slane %v148_v25, 4  ;;  %v157_v40 = vadd.f32 %v156_v34, %v155_v33  ;;  %v165_v29 = vsel %vm73_vm1, %v6600_v18, 0.0  ;;  %v174_v44 = vsel %vm73_vm1, %v6613_v30, 0.0 }
  0x22   :  { %6015 = vmatprep.mubr.msk.bf16.mxu0 %vm73_vm1, %v271_v13  ;;  %v182_v45 = vsel %vm73_vm1, %v6618_v31, 0.0  ;;  %v6655_v46 = vmul.f32 0.0625, %v145_v37  ;;  %v166_v50 = vadd.f32 %v165_v29, %v164_v35  ;;  %v175_v51 = vadd.f32 %v174_v44, %v173_v43 }
  0x23   :  { %v150_v48 = vadd.f32 %v149_v39, %v148_v25  ;;  %v158_v49 = vrot.slane %v157_v40, 4  ;;  %v183_v1 = vsel %vm73_vm1, %v6635_v28, 0.0  ;;  %v191_v2 = vsel %vm73_vm1, %v6640_v41, 0.0 }
  0x24   :  { %v192_v52 = vsel %vm73_vm1, %v6645_v42, 0.0  ;;  %v273_v6 = vpack.c.bf16 %v248_v36, %v247_v32  ;;  %v167_v54 = vrot.slane %v166_v50, 4  ;;  %v176_v55 = vrot.slane %v175_v51, 4 }
  0x25   :  { %v151_v53 = vrot.slane %v150_v48, 2  ;;  %v159_v7 = vadd.f32 %v158_v49, %v157_v40  ;;  %v184_v8 = vadd.f32 %v183_v1, %v182_v45  ;;  %v249_v57 = vsub.f32 %v6523_v38, %v6655_v46 }
  0x26   :  { %v250_v14 = vsub.f32 %v6532_v47, %v6655_v46  ;;  %v193_v59 = vadd.f32 %v192_v52, %v191_v2  ;;  %v168_v63 = vadd.f32 %v167_v54, %v166_v50  ;;  %v177_v0 = vadd.f32 %v176_v55, %v175_v51 }
  0x27   :  { %v152_v15 = vadd.f32 %v151_v53, %v150_v48  ;;  %v160_v61 = vrot.slane %v159_v7, 2  ;;  %v185_v3 = vrot.slane %v184_v8, 4  ;;  %v200_v9 = vsel %vm73_vm1, %v6666_v56, 0.0 }
  0x28   :  { %v194_v5 = vrot.slane %v193_v59, 4  ;;  %v201_v38 = vsel %vm73_vm1, %v6671_v12, 0.0  ;;  %v169_v47 = vrot.slane %v168_v63, 2  ;;  %v178_v13 = vrot.slane %v177_v0, 2 }
  0x29   :  { %6016 = vmatmul.mubr.msk.bf16.gmra.mrb[8].mxu0 %vm73_vm1, %v272_v23  ;;  %v153_v4 = vrot.slane %v152_v15, 1  ;;  %v161_v11 = vadd.f32 %v160_v61, %v159_v7  ;;  %v186_v16 = vadd.f32 %v185_v3, %v184_v8  ;;  %v274_v17 = vpack.c.bf16 %v250_v14, %v249_v57 }
  0x2a   :  { %6019 = vmatprep.mubr.msk.bf16.mxu0 %vm73_vm1, %v273_v6  ;;  %v195_v23 = vadd.f32 %v194_v5, %v193_v59  ;;  %v202_v24 = vadd.f32 %v201_v38, %v200_v9  ;;  %v170_v32 = vadd.f32 %v169_v47, %v168_v63  ;;  %v179_v33 = vadd.f32 %v178_v13, %v177_v0 }
  0x2b   :  { %v154_v20 = vadd.f32 %v153_v4, %v152_v15  ;;  %v162_v25 = vrot.slane %v161_v11, 1  ;;  %v187_v34 = vrot.slane %v186_v16, 2  ;;  %vm1003_vm7 = vcmask 1046534  }
  0x2c   :  { %v196_v36 = vrot.slane %v195_v23, 2  ;;  %v203_v37 = vrot.slane %v202_v24, 4  ;;  %v171_v40 = vrot.slane %v170_v32, 1  ;;  %v180_v29 = vrot.slane %v179_v33, 1 }
  0x2d   :  { %v227_v35 = vmul.f32 0.0625, %v154_v20  ;;  %v163_v39 = vadd.f32 %v162_v25, %v161_v11  ;;  %v188_v43 = vadd.f32 %v187_v34, %v186_v16  ;;  %vm1005_vm8 = vcmask 1047559  }
  0x2e   :  { %v197_v49 = vadd.f32 %v196_v36, %v195_v23  ;;  %v172_v51 = vadd.f32 %v171_v40, %v170_v32  ;;  %v181_v1 = vadd.f32 %v180_v29, %v179_v33  ;;  %v204_v53 = vadd.f32 %v203_v37, %v202_v24 }
  0x2f   :  { %v251_v44 = vsub.f32 %v6559_v58, %v227_v35  ;;  %v252_v45 = vsub.f32 %v6567_v62, %v227_v35  ;;  %v948_v48 = vpack.c.bf16 %v227_v35, %v227_v35  ;;  %v228_v50 = vmul.f32 0.0625, %v163_v39 }
  0x30   :  { %v189_v2 = vrot.slane %v188_v43, 1  ;;  %v229_v8 = vmul.f32 0.0625, %v172_v51  ;;  %v230_v58 = vmul.f32 0.0625, %v181_v1  ;;  %v198_v57 = vrot.slane %v197_v49, 1 }
  0x31   :  { %6020 = vmatmul.mubr.msk.bf16.gmra.mrb[12].mxu0 %vm73_vm1, %v274_v17  ;;  %v275_v52 = vpack.c.bf16 %v252_v45, %v251_v44  ;;  %v985_v6 = vunpack.c.l.b16 %v948_v48  ;;  %v253_v7 = vsub.f32 %v6585_v21, %v228_v50  ;;  %v254_v54 = vsub.f32 %v6590_v22, %v228_v50  ;;  %v71_v21 = vld [vmem:[%s9244_s0 + $0xf0] sm:$0xff]  ;;  %v72_v22 = vld [vmem:[%s9244_s0 + $0xf8] sm:$0xff] }
  0x32   :  { %v949_v55 = vpack.c.bf16 %v228_v50, %v228_v50  ;;  %v190_v62 = vadd.f32 %v189_v2, %v188_v43  ;;  %v205_v14 = vrot.slane %v204_v53, 2  ;;  %v255_v61 = vsub.f32 %v6595_v27, %v229_v8 }
  0x33   :  { %6023 = vmatprep.mubr.msk.bf16.mxu0 %vm73_vm1, %v275_v52  ;;  %v276_v15 = vpack.c.bf16 %v254_v54, %v253_v7  ;;  %v256_v63 = vsub.f32 %v6600_v18, %v229_v8  ;;  %v950_v0 = vpack.c.bf16 %v229_v8, %v229_v8  ;;  %v209_v11 = vsel %vm73_vm1, %v71_v21, 0.0 }
  0x34   :  { %v986_v59 = vunpack.c.l.b16 %v949_v55  ;;  %v231_v5 = vmul.f32 0.0625, %v190_v62  ;;  %v206_v38 = vadd.f32 %v205_v14, %v204_v53  ;;  %v210_v27 = vsel %vm73_vm1, %v72_v22, 0.0 }
  0x35   :  { %v277_v4 = vpack.c.bf16 %v256_v63, %v255_v61  ;;  %v987_v9 = vunpack.c.l.b16 %v950_v0  ;;  %v257_v18 = vsub.f32 %v6608_v26, %v230_v58  ;;  %v258_v47 = vsub.f32 %v6613_v30, %v230_v58 }
  0x36   :  { %v1007_v3 = vsel %vm993_vm2, %v986_v59, %v985_v6  ;;  %v199_v13 = vadd.f32 %v198_v57, %v197_v49  ;;  %v259_v17 = vsub.f32 %v6618_v31, %v231_v5  ;;  %v260_v20 = vsub.f32 %v6635_v28, %v231_v5 }
  0x37   :  { %v1008_v16 = vsel %vm995_vm3, %v987_v9, %v1007_v3  ;;  %v207_v23 = vrot.slane %v206_v38, 1  ;;  %v211_v24 = vadd.f32 %v210_v27, %v209_v11  ;;  %v278_v32 = vpack.c.bf16 %v258_v47, %v257_v18 }
  0x38   :  { %v232_v33 = vmul.f32 0.0625, %v199_v13  ;;  %v279_v35 = vpack.c.bf16 %v260_v20, %v259_v17  ;;  %v951_v50 = vpack.c.bf16 %v230_v58, %v230_v58  ;;  %v952_v51 = vpack.c.bf16 %v231_v5, %v231_v5  ;;  %v6752_v5 = vld [vmem:[%s9247_s4] ss:$0 sm:$0xff] }
  0x39   :  { %6024 = vmatmul.mubr.msk.bf16.gmra.mrb[16].mxu0 %vm73_vm1, %v276_v15  ;;  %v208_v25 = vadd.f32 %v207_v23, %v206_v38  ;;  %v212_v34 = vrot.slane %v211_v24, 4  ;;  %v945_v2 = vpack.c.bf16 %v6562_v60, %v6562_v60  ;;  %v946_v6 = vpack.c.bf16 %v6576_v10, %v6576_v10  ;;  %v956_v10 = vld [vmem:[%s9246_s3] sm:$0xf] }
  0x3a   :  { %6027 = vmatprep.mubr.msk.bf16.mxu0 %vm73_vm1, %v277_v4  ;;  %v261_v30 = vsub.f32 %v6640_v41, %v232_v33  ;;  %v262_v37 = vsub.f32 %v6645_v42, %v232_v33  ;;  %v988_v1 = vunpack.c.l.b16 %v951_v50  ;;  %v953_v52 = vpack.c.bf16 %v232_v33, %v232_v33 }
  0x3b   :  { %v233_v36 = vmul.f32 0.0625, %v208_v25  ;;  %v213_v26 = vadd.f32 %v212_v34, %v211_v24  ;;  %v989_v53 = vunpack.c.l.b16 %v952_v51  ;;  %v947_v54 = vpack.c.bf16 %v6655_v46, %v6655_v46 }
  0x3c   :  { %v280_v29 = vpack.c.bf16 %v262_v37, %v261_v30  ;;  %v1009_v55 = vsel %vm997_vm4, %v988_v1, %v1008_v16  ;;  %v982_v58 = vunpack.c.l.b16 %v945_v2  ;;  %v990_v62 = vunpack.c.l.b16 %v953_v52 }
  0x3d   :  { %v214_v39 = vrot.slane %v213_v26, 2  ;;  %v263_v31 = vsub.f32 %v6666_v56, %v233_v36  ;;  %v264_v28 = vsub.f32 %v6671_v12, %v233_v36  ;;  %v6273_v56 = vld [vmem:[%s9245_s2 + $0x10] sm:$0xff]   ;;  %v6274_v12 = vld [vmem:[%s9245_s2 + $0x18] sm:$0xff]   ;;  %v954_v7 = vpack.c.bf16 %v233_v36, %v233_v36 }
  0x3e   :  { %6043 = vmatprep.subr.bf16.mxu1 %v6273_v56  ;;  %v983_v57 = vunpack.c.l.b16 %v946_v6  ;;  %v1010_v14 = vsel %vm999_vm5, %v989_v53, %v1009_v55  ;;  %v984_v59 = vunpack.c.l.b16 %v947_v54  ;;  %v1002_v61 = vsel %vm1001_vm6, %v982_v58, %v6603_v19 }
  0x3f   :  { %v215_v40 = vadd.f32 %v214_v39, %v213_v26  ;;  %v281_v44 = vpack.c.bf16 %v264_v28, %v263_v31  ;;  %6044 = vmatpush3.bf16.msra.mxu1 %v6273_v56  ;;  %v991_v15 = vunpack.c.l.b16 %v954_v7  ;;  %v1011_v46 = vsel %vm1001_vm6, %v990_v62, %v1010_v14 }
  0x40   :  { %6045 = vmatprep.subr.bf16.mxu1 %v6274_v12  ;;  %v9262_v63 = vmov 0.0   ;;  %vm6362_vm9 = vmmov 0   ;;  %vm9287_vm10 = vcmask 523264   ;;  %vm795_vm11 = vcmask 261120  }
  0x41   :  { %6028 = vmatmul.mubr.msk.bf16.gmra.mrb[20].mxu0 %vm73_vm1, %v278_v32  ;;  %v216_v43 = vrot.slane %v215_v40, 1  ;;  %6079 = vmatprep.subr.bf16.mxu0 %v9262_v63  ;;  %v1012_v0 = vsel %vm1003_vm7, %v991_v15, %v1011_v46 }
  0x42   :  { %6031 = vmatprep.mubr.msk.bf16.mxu0 %vm73_vm1, %v279_v35 }
  0x43   :  { %v217_v45 = vadd.f32 %v216_v43, %v215_v40  ;;  %6046 = vmatpush3.bf16.msra.mxu1 %v6274_v12 }
  0x44   :  { %6105 = vmatprep.subr.bf16.mxu1 %v9262_v63 }
  0x45   :  { %v234_v48 = vmul.f32 0.0625, %v217_v45 }
  0x47   :  { %v265_v41 = vsub.f32 %v71_v21, %v234_v48  ;;  %v266_v49 = vsub.f32 %v72_v22, %v234_v48  ;;  %v955_v8 = vpack.c.bf16 %v234_v48, %v234_v48  ;;  %v1019_v21 = vsel %vm336_vm0, %v956_v10, 0 }
  0x48   :  { %v1004_v22 = vsel %vm1003_vm7, %v983_v57, %v1002_v61  ;;  %6080 = vmatpush3.bf16.msra.mxu0 %v1019_v21 }
  0x49   :  { %6032 = vmatmul.mubr.msk.bf16.gmra.mrb[24].mxu0 %vm73_vm1, %v280_v29  ;;  %v282_v42 = vpack.c.bf16 %v266_v49, %v265_v41  ;;  %v992_v60 = vunpack.c.l.b16 %v955_v8  ;;  %v1006_v3 = vsel %vm1005_vm8, %v984_v59, %v1004_v22  ;;  %6085 = vmatprep.subr.bf16.mxu0 %v9262_v63 }
  0x4a   :  { %6035 = vmatprep.mubr.msk.bf16.mxu0 %vm73_vm1, %v281_v44 }
  0x4b   :  { %v1013_v19 = vsel %vm1005_vm8, %v992_v60, %v1012_v0 }
  0x4c   :  { %v1014_v4 = vpack.c.b16 %v1013_v19, %v1006_v3 }
  0x51   :  { %6036 = vmatmul.mubr.msk.bf16.gmra.mrb[28].mxu0 %vm73_vm1, %v282_v42 }
  0x52   :  { %6081 = vmatprep.mubr.msk.bf16.mxu0 %vm6362_vm9, %v9262_v63 }
  0x59   :  { %6082 = vmatmul.mubr.msk.bf16.vlgmr.msra.gmra.mrb[32].mxu0 %vm73_vm1, %v1014_v4 }
  0x5a   :  { %6089 = vmatprep.mubr.msk.bf16.mxu0 %vm6362_vm9, %v9262_v63 }
  0xec   :  { %v6009_v9 = vpop.f32.mrb[0].mxu0 }
  0xed   :  { %v383_v38 = vadd.f32 %v6009_v9, %v6752_v5  ;;  %v374_v11 = vpop.f32.mrb[1].mxu0 }
  0xee   :  { %v375_v27 = vadd.f32 %v6752_v5, %v374_v11  ;;  %v6010_v18 = vpop.f32.mrb[2].mxu0 }
  0xef   :  { %v386_v47 = vadd.f32 %v6010_v18, %v6752_v5  ;;  %v377_v13 = vpop.f32.mrb[3].mxu0  ;;  %v503_v17 = vmax.f32 %v383_v38, 0.0 }
  0xf0   :  { %v378_v16 = vadd.f32 %v6752_v5, %v377_v13  ;;  %v501_v23 = vmax.f32 %v375_v27, 0.0 }
  0xf1   :  { %v504_v20 = vmax.f32 %v386_v47, 0.0 }
  0xf2   :  { %v502_v24 = vmax.f32 %v378_v16, 0.0 }
  0xf3   :  { %v534_v25 = vpack.c.bf16 %v504_v20, %v503_v17 }
  0xf4   :  { %v6013_v32 = vpop.f32.mrb[4].mxu0  ;;  %v533_v33 = vpack.c.bf16 %v502_v24, %v501_v23 }
  0xf5   :  { %v399_v34 = vadd.f32 %v6013_v32, %v6752_v5  ;;  %v390_v35 = vpop.f32.mrb[5].mxu0 }
  0xf6   :  { %v391_v36 = vadd.f32 %v6752_v5, %v390_v35  ;;  %v6014_v26 = vpop.f32.mrb[6].mxu0  ;;  %6047 = vmatprep.mubr.msk.bf16.mxu1 %vm9287_vm10, %v533_v33 }
  0xf7   :  { %v402_v30 = vadd.f32 %v6014_v26, %v6752_v5  ;;  %v393_v37 = vpop.f32.mrb[7].mxu0  ;;  %6048 = vmatmul.mubr.msk.bf16.vlgmr.msra.gmra.mrb[0].mxu1 %vm9287_vm10, %v534_v25  ;;  %v507_v31 = vmax.f32 %v399_v34, 0.0 }
  0xf8   :  { %v394_v39 = vadd.f32 %v6752_v5, %v393_v37  ;;  %v505_v40 = vmax.f32 %v391_v36, 0.0 }
  0xf9   :  { %v508_v28 = vmax.f32 %v402_v30, 0.0 }
  0xfa   :  { %v506_v29 = vmax.f32 %v394_v39, 0.0 }
  0xfb   :  { %v536_v43 = vpack.c.bf16 %v508_v28, %v507_v31 }
  0xfc   :  { %v535_v44 = vpack.c.bf16 %v506_v29, %v505_v40  ;;  %v6017_v45 = vpop.f32.mrb[8].mxu0 }
  0xfd   :  { %v415_v48 = vadd.f32 %v6017_v45, %v6752_v5  ;;  %v406_v41 = vpop.f32.mrb[9].mxu0 }
  0xfe   :  { %v407_v49 = vadd.f32 %v6752_v5, %v406_v41  ;;  %v6018_v42 = vpop.f32.mrb[10].mxu0  ;;  %6051 = vmatprep.mubr.msk.bf16.mxu1 %vm9287_vm10, %v535_v44 }
  0xff   :  { %v418_v56 = vadd.f32 %v6018_v42, %v6752_v5  ;;  %v409_v12 = vpop.f32.mrb[11].mxu0  ;;  %6052 = vmatmul.mubr.msk.bf16.gmra.mrb[4].mxu1 %vm9287_vm10, %v536_v43  ;;  %v511_v51 = vmax.f32 %v415_v48, 0.0 }
 0x100   :  { %v410_v50 = vadd.f32 %v6752_v5, %v409_v12  ;;  %v509_v2 = vmax.f32 %v407_v49, 0.0 }
 0x101   :  { %v512_v1 = vmax.f32 %v418_v56, 0.0 }
 0x102   :  { %v510_v52 = vmax.f32 %v410_v50, 0.0 }
 0x103   :  { %v538_v6 = vpack.c.bf16 %v512_v1, %v511_v51 }
 0x104   :  { %v537_v53 = vpack.c.bf16 %v510_v52, %v509_v2  ;;  %v6021_v7 = vpop.f32.mrb[12].mxu0 }
 0x105   :  { %v431_v54 = vadd.f32 %v6021_v7, %v6752_v5  ;;  %v422_v55 = vpop.f32.mrb[13].mxu0 }
 0x106   :  { %v423_v8 = vadd.f32 %v6752_v5, %v422_v55  ;;  %v6022_v58 = vpop.f32.mrb[14].mxu0  ;;  %6055 = vmatprep.mubr.msk.bf16.mxu1 %vm9287_vm10, %v537_v53 }
 0x107   :  { %v434_v62 = vadd.f32 %v6022_v58, %v6752_v5  ;;  %v425_v57 = vpop.f32.mrb[15].mxu0  ;;  %6056 = vmatmul.mubr.msk.bf16.gmra.mrb[8].mxu1 %vm9287_vm10, %v538_v6  ;;  %v515_v15 = vmax.f32 %v431_v54, 0.0 }
 0x108   :  { %v426_v14 = vadd.f32 %v6752_v5, %v425_v57  ;;  %v513_v60 = vmax.f32 %v423_v8, 0.0 }
 0x109   :  { %v516_v59 = vmax.f32 %v434_v62, 0.0 }
 0x10a   :  { %v514_v10 = vmax.f32 %v426_v14, 0.0 }
 0x10b   :  { %v540_v61 = vpack.c.bf16 %v516_v59, %v515_v15 }
 0x10c   :  { %v539_v46 = vpack.c.bf16 %v514_v10, %v513_v60  ;;  %v6025_v21 = vpop.f32.mrb[16].mxu0 }
 0x10d   :  { %v447_v22 = vadd.f32 %v6025_v21, %v6752_v5  ;;  %v438_v0 = vpop.f32.mrb[17].mxu0 }
 0x10e   :  { %v439_v3 = vadd.f32 %v6752_v5, %v438_v0  ;;  %v6026_v19 = vpop.f32.mrb[18].mxu0  ;;  %6059 = vmatprep.mubr.msk.bf16.mxu1 %vm9287_vm10, %v539_v46 }
 0x10f   :  { %v450_v4 = vadd.f32 %v6026_v19, %v6752_v5  ;;  %v441_v9 = vpop.f32.mrb[19].mxu0  ;;  %6060 = vmatmul.mubr.msk.bf16.gmra.mrb[12].mxu1 %vm9287_vm10, %v540_v61  ;;  %v519_v11 = vmax.f32 %v447_v22, 0.0 }
 0x110   :  { %v442_v38 = vadd.f32 %v6752_v5, %v441_v9  ;;  %v517_v18 = vmax.f32 %v439_v3, 0.0 }
 0x111   :  { %v520_v27 = vmax.f32 %v450_v4, 0.0 }
 0x112   :  { %v518_v47 = vmax.f32 %v442_v38, 0.0 }
 0x113   :  { %v542_v13 = vpack.c.bf16 %v520_v27, %v519_v11 }
 0x114   :  { %v541_v16 = vpack.c.bf16 %v518_v47, %v517_v18  ;;  %v6029_v17 = vpop.f32.mrb[20].mxu0 }
 0x115   :  { %v463_v20 = vadd.f32 %v6029_v17, %v6752_v5  ;;  %v454_v23 = vpop.f32.mrb[21].mxu0 }
 0x116   :  { %v455_v24 = vadd.f32 %v6752_v5, %v454_v23  ;;  %v6030_v25 = vpop.f32.mrb[22].mxu0  ;;  %6063 = vmatprep.mubr.msk.bf16.mxu1 %vm9287_vm10, %v541_v16 }
 0x117   :  { %v466_v32 = vadd.f32 %v6030_v25, %v6752_v5  ;;  %v457_v33 = vpop.f32.mrb[23].mxu0  ;;  %6064 = vmatmul.mubr.msk.bf16.gmra.mrb[16].mxu1 %vm9287_vm10, %v542_v13  ;;  %v523_v35 = vmax.f32 %v463_v20, 0.0 }
 0x118   :  { %v458_v34 = vadd.f32 %v6752_v5, %v457_v33  ;;  %v521_v26 = vmax.f32 %v455_v24, 0.0 }
 0x119   :  { %v524_v36 = vmax.f32 %v466_v32, 0.0 }
 0x11a   :  { %v522_v30 = vmax.f32 %v458_v34, 0.0 }
 0x11b   :  { %v544_v37 = vpack.c.bf16 %v524_v36, %v523_v35 }
 0x11c   :  { %v543_v39 = vpack.c.bf16 %v522_v30, %v521_v26  ;;  %v6033_v31 = vpop.f32.mrb[24].mxu0 }
 0x11d   :  { %v479_v28 = vadd.f32 %v6033_v31, %v6752_v5  ;;  %v470_v40 = vpop.f32.mrb[25].mxu0 }
 0x11e   :  { %v471_v29 = vadd.f32 %v6752_v5, %v470_v40  ;;  %v6034_v43 = vpop.f32.mrb[26].mxu0  ;;  %6067 = vmatprep.mubr.msk.bf16.mxu1 %vm9287_vm10, %v543_v39 }
 0x11f   :  { %v482_v44 = vadd.f32 %v6034_v43, %v6752_v5  ;;  %v473_v45 = vpop.f32.mrb[27].mxu0  ;;  %6068 = vmatmul.mubr.msk.bf16.gmra.mrb[20].mxu1 %vm9287_vm10, %v544_v37  ;;  %v527_v41 = vmax.f32 %v479_v28, 0.0 }
 0x120   :  { %v474_v48 = vadd.f32 %v6752_v5, %v473_v45  ;;  %v525_v42 = vmax.f32 %v471_v29, 0.0 }
 0x121   :  { %v528_v49 = vmax.f32 %v482_v44, 0.0 }
 0x122   :  { %v526_v56 = vmax.f32 %v474_v48, 0.0 }
 0x123   :  { %v546_v12 = vpack.c.bf16 %v528_v49, %v527_v41  ;;  %v6830_v41 = vld [vmem:[%s9247_s4 + $0x2] ss:$0 sm:$0xff] }
 0x124   :  { %v545_v50 = vpack.c.bf16 %v526_v56, %v525_v42  ;;  %v6037_v51 = vpop.f32.mrb[28].mxu0 }
 0x125   :  { %v495_v1 = vadd.f32 %v6037_v51, %v6752_v5  ;;  %v486_v2 = vpop.f32.mrb[29].mxu0 }
 0x126   :  { %v487_v52 = vadd.f32 %v6752_v5, %v486_v2  ;;  %v6038_v6 = vpop.f32.mrb[30].mxu0  ;;  %6071 = vmatprep.mubr.msk.bf16.mxu1 %vm9287_vm10, %v545_v50 }
 0x127   :  { %v498_v53 = vadd.f32 %v6038_v6, %v6752_v5  ;;  %v489_v7 = vpop.f32.mrb[31].mxu0  ;;  %6072 = vmatmul.mubr.msk.bf16.gmra.mrb[24].mxu1 %vm9287_vm10, %v546_v12  ;;  %v531_v55 = vmax.f32 %v495_v1, 0.0 }
 0x128   :  { %v490_v54 = vadd.f32 %v6752_v5, %v489_v7  ;;  %v529_v58 = vmax.f32 %v487_v52, 0.0  ;;  %v6809_v5 = vld [vmem:[%s9247_s4 + $0x1] ss:$0 sm:$0xff] }
 0x129   :  { %v532_v8 = vmax.f32 %v498_v53, 0.0 }
 0x12a   :  { %v530_v62 = vmax.f32 %v490_v54, 0.0 }
 0x12b   :  { %v548_v57 = vpack.c.bf16 %v532_v8, %v531_v55 }
 0x12c   :  { %v547_v14 = vpack.c.bf16 %v530_v62, %v529_v58  ;;  %v1055_v15 = vpop.f32.mrb[32].mxu0 }
 0x12d   :  { %v6083_v59 = vpop.f32.mrb[33].mxu0  ;;  %v6836_v53 = vadd.f32 %v6830_v41, %v1055_v15 }
 0x12e   :  { %6075 = vmatprep.mubr.msk.bf16.mxu1 %vm9287_vm10, %v547_v14  ;;  %v6804_v60 = vpop.f32.mrb[34].mxu0 }
 0x12f   :  { %6076 = vmatmul.mubr.msk.bf16.gmra.mrb[28].mxu1 %vm9287_vm10, %v548_v57  ;;  %v6084_v10 = vpop.f32.mrb[35].mxu0 }
 0x130   :  { %6107 = vmatprep.mubr.msk.bf16.mxu1 %vm6362_vm9, %v9262_v63 }
 0x1ca   :  { %v6049_v61 = vpop.f32.mrb[0].mxu1 }
 0x1cb   :  { %v677_v46 = vadd.f32 %v6049_v61, %v6809_v5  ;;  %v668_v21 = vpop.f32.mrb[1].mxu1 }
 0x1cc   :  { %v669_v22 = vadd.f32 %v6809_v5, %v668_v21  ;;  %v6050_v0 = vpop.f32.mrb[2].mxu1 }
 0x1cd   :  { %v680_v3 = vadd.f32 %v6050_v0, %v6809_v5  ;;  %v671_v19 = vpop.f32.mrb[3].mxu1  ;;  %v805_v9 = vsel %vm795_vm11, %v677_v46, -inf }
 0x1ce   :  { %v672_v4 = vadd.f32 %v6809_v5, %v671_v19  ;;  %v796_v11 = vsel %vm795_vm11, %v669_v22, -inf  ;;  %v1064_v22 = vrot.slane %v6836_v53, 1 }
 0x1cf   :  { %v806_v38 = vsel %vm795_vm11, %v680_v3, -inf }
 0x1d0   :  { %v807_v27 = vmax.f32 %v805_v9, %v806_v38  ;;  %v797_v18 = vsel %vm795_vm11, %v672_v4, -inf }
 0x1d1   :  { %v798_v47 = vmax.f32 %v796_v11, %v797_v18 }
 0x1d2   :  { %v808_v13 = vrot.slane %v807_v27, 4  ;;  %v6053_v16 = vpop.f32.mrb[4].mxu1 }
 0x1d3   :  { %v799_v17 = vrot.slane %v798_v47, 4  ;;  %v693_v20 = vadd.f32 %v6053_v16, %v6809_v5  ;;  %v684_v23 = vpop.f32.mrb[5].mxu1 }
 0x1d4   :  { %v809_v24 = vmax.f32 %v807_v27, %v808_v13  ;;  %v685_v25 = vadd.f32 %v6809_v5, %v684_v23  ;;  %v6054_v32 = vpop.f32.mrb[6].mxu1 }
 0x1d5   :  { %v696_v33 = vadd.f32 %v6054_v32, %v6809_v5  ;;  %v687_v34 = vpop.f32.mrb[7].mxu1  ;;  %v800_v35 = vmax.f32 %v798_v47, %v799_v17  ;;  %v823_v30 = vsel %vm795_vm11, %v693_v20, -inf  ;;  %v1065_v17 = vrot.slane %v6836_v53, 2 }
 0x1d6   :  { %v688_v36 = vadd.f32 %v6809_v5, %v687_v34  ;;  %v810_v26 = vrot.slane %v809_v24, 2  ;;  %v814_v39 = vsel %vm795_vm11, %v685_v25, -inf }
 0x1d7   :  { %v824_v37 = vsel %vm795_vm11, %v696_v33, -inf  ;;  %v801_v29 = vrot.slane %v800_v35, 2 }
 0x1d8   :  { %v825_v31 = vmax.f32 %v823_v30, %v824_v37  ;;  %v815_v28 = vsel %vm795_vm11, %v688_v36, -inf  ;;  %v811_v45 = vmax.f32 %v809_v24, %v810_v26 }
 0x1d9   :  { %v816_v40 = vmax.f32 %v814_v39, %v815_v28  ;;  %v802_v52 = vmax.f32 %v800_v35, %v801_v29 }
 0x1da   :  { %v826_v43 = vrot.slane %v825_v31, 4  ;;  %v6057_v44 = vpop.f32.mrb[8].mxu1  ;;  %v812_v54 = vrot.slane %v811_v45, 1 }
 0x1db   :  { %v817_v48 = vrot.slane %v816_v40, 4  ;;  %v709_v49 = vadd.f32 %v6057_v44, %v6809_v5  ;;  %v700_v42 = vpop.f32.mrb[9].mxu1  ;;  %v803_v46 = vrot.slane %v802_v52, 1 }
 0x1dc   :  { %v827_v56 = vmax.f32 %v825_v31, %v826_v43  ;;  %v701_v12 = vadd.f32 %v6809_v5, %v700_v42  ;;  %v6058_v50 = vpop.f32.mrb[10].mxu1  ;;  %v813_v0 = vmax.f32 %v811_v45, %v812_v54  ;;  %v1068_v43 = vrot.slane %v6836_v53, 5 }
 0x1dd   :  { %v818_v51 = vmax.f32 %v816_v40, %v817_v48  ;;  %v712_v1 = vadd.f32 %v6058_v50, %v6809_v5  ;;  %v703_v2 = vpop.f32.mrb[11].mxu1  ;;  %v841_v8 = vsel %vm795_vm11, %v709_v49, -inf  ;;  %v804_v20 = vmax.f32 %v802_v52, %v803_v46 }
 0x1de   :  { %v828_v6 = vrot.slane %v827_v56, 2  ;;  %v704_v7 = vadd.f32 %v6809_v5, %v703_v2  ;;  %v832_v62 = vsel %vm795_vm11, %v701_v12, -inf  ;;  %v6853_v35 = vadd.f32 %v1064_v22, %v813_v0 }
 0x1df   :  { %v819_v55 = vrot.slane %v818_v51, 2  ;;  %v842_v58 = vsel %vm795_vm11, %v712_v1, -inf  ;;  %v1066_v40 = vrot.slane %v6836_v53, 3  ;;  %v1067_v42 = vrot.slane %v6836_v53, 4 }
 0x1e0   :  { %v843_v57 = vmax.f32 %v841_v8, %v842_v58  ;;  %v833_v14 = vsel %vm795_vm11, %v704_v7, -inf  ;;  %v829_v59 = vmax.f32 %v827_v56, %v828_v6  ;;  %v6867_v52 = vadd.f32 %v6836_v53, %v804_v20 }
 0x1e1   :  { %v820_v10 = vmax.f32 %v818_v51, %v819_v55  ;;  %v834_v61 = vmax.f32 %v832_v62, %v833_v14  ;;  %v1132_v6 = vrot.slane %v6853_v35, 7 }
 0x1e2   :  { %v844_v21 = vrot.slane %v843_v57, 4  ;;  %v6061_v15 = vpop.f32.mrb[12].mxu1  ;;  %v830_v18 = vrot.slane %v829_v59, 1 }
 0x1e3   :  { %v821_v3 = vrot.slane %v820_v10, 1  ;;  %v835_v19 = vrot.slane %v834_v61, 4  ;;  %v725_v4 = vadd.f32 %v6061_v15, %v6809_v5  ;;  %v716_v9 = vpop.f32.mrb[13].mxu1 }
 0x1e4   :  { %v845_v38 = vmax.f32 %v843_v57, %v844_v21  ;;  %v717_v11 = vadd.f32 %v6809_v5, %v716_v9  ;;  %v6062_v27 = vpop.f32.mrb[14].mxu1  ;;  %v831_v39 = vmax.f32 %v829_v59, %v830_v18 }
 0x1e5   :  { %v836_v47 = vmax.f32 %v834_v61, %v835_v19  ;;  %v728_v13 = vadd.f32 %v6062_v27, %v6809_v5  ;;  %v719_v16 = vpop.f32.mrb[15].mxu1  ;;  %v822_v23 = vmax.f32 %v820_v10, %v821_v3  ;;  %v859_v33 = vsel %vm795_vm11, %v725_v4, -inf }
 0x1e6   :  { %v846_v24 = vrot.slane %v845_v38, 2  ;;  %v720_v25 = vadd.f32 %v6809_v5, %v719_v16  ;;  %v850_v26 = vsel %vm795_vm11, %v717_v11, -inf  ;;  %v6873_v58 = vadd.f32 %v1066_v40, %v831_v39 }
 0x1e7   :  { %v837_v32 = vrot.slane %v836_v47, 2  ;;  %v860_v34 = vsel %vm795_vm11, %v728_v13, -inf  ;;  %v6861_v48 = vadd.f32 %v1065_v17, %v822_v23  ;;  %v1069_v27 = vrot.slane %v6836_v53, 6 }
 0x1e8   :  { %v847_v36 = vmax.f32 %v845_v38, %v846_v24  ;;  %v861_v30 = vmax.f32 %v859_v33, %v860_v34  ;;  %v851_v37 = vsel %vm795_vm11, %v720_v25, -inf  ;;  %v9261_v38 = vrot.slane %v6836_v53, 7 }
 0x1e9   :  { %v838_v31 = vmax.f32 %v836_v47, %v837_v32  ;;  %v852_v28 = vmax.f32 %v850_v26, %v851_v37  ;;  %v1134_v59 = vrot.slane %v6861_v48, 6  ;;  %v1133_v13 = vsel %vm993_vm2, %v1132_v6, %v6867_v52 }
 0x1ea   :  { %v848_v29 = vrot.slane %v847_v36, 1  ;;  %v862_v44 = vrot.slane %v861_v30, 4  ;;  %v6065_v45 = vpop.f32.mrb[16].mxu1  ;;  %v1136_v26 = vrot.slane %v6873_v58, 5 }
 0x1eb   :  { %v839_v49 = vrot.slane %v838_v31, 1  ;;  %v853_v56 = vrot.slane %v852_v28, 4  ;;  %v741_v12 = vadd.f32 %v6065_v45, %v6809_v5  ;;  %v732_v50 = vpop.f32.mrb[17].mxu1  ;;  %v1135_v24 = vsel %vm995_vm3, %v1134_v59, %v1133_v13 }
 0x1ec   :  { %v863_v51 = vmax.f32 %v861_v30, %v862_v44  ;;  %v733_v1 = vadd.f32 %v6809_v5, %v732_v50  ;;  %v6066_v2 = vpop.f32.mrb[18].mxu1  ;;  %v849_v62 = vmax.f32 %v847_v36, %v848_v29  ;;  %v1137_v45 = vsel %vm997_vm4, %v1136_v26, %v1135_v24 }
 0x1ed   :  { %v840_v7 = vmax.f32 %v838_v31, %v839_v49  ;;  %v854_v54 = vmax.f32 %v852_v28, %v853_v56  ;;  %v744_v55 = vadd.f32 %v6066_v2, %v6809_v5  ;;  %v735_v8 = vpop.f32.mrb[19].mxu1  ;;  %v877_v46 = vsel %vm795_vm11, %v741_v12, -inf }
 0x1ee   :  { %v864_v57 = vrot.slane %v863_v51, 2  ;;  %v736_v14 = vadd.f32 %v6809_v5, %v735_v8  ;;  %v868_v0 = vsel %vm795_vm11, %v733_v1, -inf  ;;  %v6894_v32 = vadd.f32 %v1068_v43, %v849_v62 }
 0x1ef   :  { %v6879_v10 = vadd.f32 %v1067_v42, %v840_v7  ;;  %v855_v61 = vrot.slane %v854_v54, 2  ;;  %v878_v21 = vsel %vm795_vm11, %v744_v55, -inf }
 0x1f0   :  { %v865_v15 = vmax.f32 %v863_v51, %v864_v57  ;;  %v879_v3 = vmax.f32 %v877_v46, %v878_v21  ;;  %v869_v19 = vsel %vm795_vm11, %v736_v14, -inf  ;;  %v1140_v6 = vrot.slane %v6894_v32, 3 }
 0x1f1   :  { %v856_v4 = vmax.f32 %v854_v54, %v855_v61  ;;  %v870_v9 = vmax.f32 %v868_v0, %v869_v19  ;;  %v1138_v25 = vrot.slane %v6879_v10, 4 }
 0x1f2   :  { %v866_v11 = vrot.slane %v865_v15, 1  ;;  %v880_v18 = vrot.slane %v879_v3, 4  ;;  %v6069_v47 = vpop.f32.mrb[20].mxu1 }
 0x1f3   :  { %v857_v16 = vrot.slane %v856_v4, 1  ;;  %v757_v20 = vadd.f32 %v6069_v47, %v6809_v5  ;;  %v748_v23 = vpop.f32.mrb[21].mxu1  ;;  %v871_v37 = vrot.slane %v870_v9, 4  ;;  %v1139_v50 = vsel %vm999_vm5, %v1138_v25, %v1137_v45 }
 0x1f4   :  { %v867_v33 = vmax.f32 %v865_v15, %v866_v11  ;;  %v749_v34 = vadd.f32 %v6809_v5, %v748_v23  ;;  %v6070_v36 = vpop.f32.mrb[22].mxu1  ;;  %v881_v28 = vmax.f32 %v879_v3, %v880_v18  ;;  %v1141_v14 = vsel %vm1001_vm6, %v1140_v6, %v1139_v50 }
 0x1f5   :  { %v858_v30 = vmax.f32 %v856_v4, %v857_v16  ;;  %v760_v39 = vadd.f32 %v6070_v36, %v6809_v5  ;;  %v751_v31 = vpop.f32.mrb[23].mxu1  ;;  %v895_v56 = vsel %vm795_vm11, %v757_v20, -inf  ;;  %v872_v7 = vmax.f32 %v870_v9, %v871_v37 }
 0x1f6   :  { %v752_v29 = vadd.f32 %v6809_v5, %v751_v31  ;;  %v6902_v44 = vadd.f32 %v9261_v38, %v867_v33  ;;  %v886_v51 = vsel %vm795_vm11, %v749_v34, -inf  ;;  %v882_v8 = vrot.slane %v881_v28, 2 }
 0x1f7   :  { %v6907_v49 = vadd.f32 %v1069_v27, %v858_v30  ;;  %v896_v12 = vsel %vm795_vm11, %v760_v39, -inf  ;;  %v873_v9 = vrot.slane %v872_v7, 2  ;;  %v6929_v34 = vadd.f32 %v6830_v41, %v6804_v60 }
 0x1f8   :  { %v897_v1 = vmax.f32 %v895_v56, %v896_v12  ;;  %v887_v2 = vsel %vm795_vm11, %v752_v29, -inf  ;;  %v1144_v59 = vrot.slane %v6902_v44, 1  ;;  %v883_v13 = vmax.f32 %v881_v28, %v882_v8 }
 0x1f9   :  { %v888_v54 = vmax.f32 %v886_v51, %v887_v2  ;;  %v1142_v55 = vrot.slane %v6907_v49, 2  ;;  %v874_v37 = vmax.f32 %v872_v7, %v873_v9  ;;  %v9260_v6 = vrot.slane %v6929_v34, 1 }
 0x1fa   :  { %v898_v62 = vrot.slane %v897_v1, 4  ;;  %v6073_v57 = vpop.f32.mrb[24].mxu1  ;;  %v884_v28 = vrot.slane %v883_v13, 1 }
 0x1fb   :  { %v889_v61 = vrot.slane %v888_v54, 4  ;;  %v773_v46 = vadd.f32 %v6073_v57, %v6809_v5  ;;  %v764_v21 = vpop.f32.mrb[25].mxu1  ;;  %v1143_v15 = vsel %vm1003_vm7, %v1142_v55, %v1141_v14 }
 0x1fc   :  { %v899_v0 = vmax.f32 %v897_v1, %v898_v62  ;;  %v765_v3 = vadd.f32 %v6809_v5, %v764_v21  ;;  %v6074_v19 = vpop.f32.mrb[26].mxu1  ;;  %v1145_v4 = vsel %vm1005_vm8, %v1144_v59, %v1143_v15  ;;  %v9259_v62 = vrot.slane %v6929_v34, 2 }
 0x1fd   :  { %v890_v11 = vmax.f32 %v888_v54, %v889_v61  ;;  %v776_v18 = vadd.f32 %v6074_v19, %v6809_v5  ;;  %v767_v47 = vpop.f32.mrb[27].mxu1  ;;  %v1162_v23 = vsel %vm795_vm11, %v1145_v4, 0.0  ;;  %v913_v25 = vsel %vm795_vm11, %v773_v46, -inf }
 0x1fe   :  { %v900_v16 = vrot.slane %v899_v0, 2  ;;  %v768_v20 = vadd.f32 %v6809_v5, %v767_v47  ;;  %1163 = vadd.xlane.f32.xlu0 %v1162_v23  ;;  %v904_v36 = vsel %vm795_vm11, %v765_v3, -inf  ;;  %v875_v54 = vrot.slane %v874_v37, 1 }
 0x1ff   :  { %v891_v24 = vrot.slane %v890_v11, 2  ;;  %v914_v33 = vsel %vm795_vm11, %v776_v18, -inf  ;;  %v885_v57 = vmax.f32 %v883_v13, %v884_v28 }
 0x200   :  { %v915_v26 = vmax.f32 %v913_v25, %v914_v33  ;;  %v905_v30 = vsel %vm795_vm11, %v768_v20, -inf  ;;  %v901_v29 = vmax.f32 %v899_v0, %v900_v16  ;;  %v876_v47 = vmax.f32 %v874_v37, %v875_v54 }
 0x201   :  { %v892_v39 = vmax.f32 %v890_v11, %v891_v24  ;;  %v906_v31 = vmax.f32 %v904_v36, %v905_v30  ;;  %v6945_v16 = vadd.f32 %v9260_v6, %v885_v57  ;;  %v9257_v20 = vrot.slane %v6929_v34, 4 }
 0x202   :  { %v916_v45 = vrot.slane %v915_v26, 4  ;;  %v6077_v56 = vpop.f32.mrb[28].mxu1  ;;  %v902_v14 = vrot.slane %v901_v29, 1 }
 0x203   :  { %v893_v12 = vrot.slane %v892_v39, 1  ;;  %v907_v50 = vrot.slane %v906_v31, 4  ;;  %v789_v51 = vadd.f32 %v6077_v56, %v6809_v5  ;;  %v780_v1 = vpop.f32.mrb[29].mxu1  ;;  %v1146_v28 = vrot.slane %v6945_v16, 7 }
 0x204   :  { %v917_v2 = vmax.f32 %v915_v26, %v916_v45  ;;  %v781_v60 = vadd.f32 %v6809_v5, %v780_v1  ;;  %v6078_v41 = vpop.f32.mrb[30].mxu1  ;;  %v903_v25 = vmax.f32 %v901_v29, %v902_v14  ;;  %v9258_v26 = vrot.slane %v6929_v34, 3 }
 0x205   :  { %v908_v55 = vmax.f32 %v906_v31, %v907_v50  ;;  %v792_v7 = vadd.f32 %v6078_v41, %v6809_v5  ;;  %v783_v8 = vpop.f32.mrb[31].mxu1  ;;  %v894_v46 = vmax.f32 %v892_v39, %v893_v12  ;;  %v931_v15 = vsel %vm795_vm11, %v789_v51, -inf }
 0x206   :  { %v918_v59 = vrot.slane %v917_v2, 2  ;;  %v784_v61 = vadd.f32 %v6809_v5, %v783_v8  ;;  %v922_v19 = vsel %vm795_vm11, %v781_v60, -inf  ;;  %v6954_v31 = vadd.f32 %v6929_v34, %v876_v47 }
 0x207   :  { %v909_v21 = vrot.slane %v908_v55, 2  ;;  %v932_v0 = vsel %vm795_vm11, %v792_v7, -inf  ;;  %v6950_v24 = vadd.f32 %v9259_v62, %v894_v46  ;;  %v9256_v50 = vrot.slane %v6929_v34, 5 }
 0x208   :  { %v919_v3 = vmax.f32 %v917_v2, %v918_v59  ;;  %v933_v4 = vmax.f32 %v931_v15, %v932_v0  ;;  %v923_v9 = vsel %vm795_vm11, %v784_v61, -inf  ;;  %v6965_v1 = vadd.f32 %v9258_v26, %v903_v25 }
 0x209   :  { %v910_v11 = vmax.f32 %v908_v55, %v909_v21  ;;  %v924_v18 = vmax.f32 %v922_v19, %v923_v9  ;;  %v1148_v12 = vrot.slane %v6950_v24, 6  ;;  %v1147_v41 = vsel %vm993_vm2, %v1146_v28, %v6954_v31 }
 0x20a   :  { %v934_v13 = vrot.slane %v933_v4, 4  ;;  %v920_v33 = vrot.slane %v919_v3, 1  ;;  %v9254_v14 = vrot.slane %v6929_v34, 7  ;;  %v1150_v59 = vrot.slane %v6965_v1, 5 }
 0x20b   :  { %v911_v5 = vrot.slane %v910_v11, 1  ;;  %v925_v23 = vrot.slane %v924_v18, 4  ;;  %v1149_v55 = vsel %vm995_vm3, %v1148_v12, %v1147_v41  ;;  %v9255_v46 = vrot.slane %v6929_v34, 6 }
 0x20c   :  { %v935_v36 = vmax.f32 %v933_v4, %v934_v13  ;;  %v921_v29 = vmax.f32 %v919_v3, %v920_v33  ;;  %v1151_v15 = vsel %vm997_vm4, %v1150_v59, %v1149_v55 }
 0x20d   :  { %v912_v30 = vmax.f32 %v910_v11, %v911_v5  ;;  %v926_v37 = vmax.f32 %v924_v18, %v925_v23 }
 0x20e   :  { %v936_v39 = vrot.slane %v935_v36, 2  ;;  %v6973_v8 = vadd.f32 %v9256_v50, %v921_v29 }
 0x20f   :  { %v6959_v45 = vadd.f32 %v9257_v20, %v912_v30  ;;  %v927_v56 = vrot.slane %v926_v37, 2 }
 0x210   :  { %v937_v51 = vmax.f32 %v935_v36, %v936_v39  ;;  %v1154_v19 = vrot.slane %v6973_v8, 3 }
 0x211   :  { %v928_v2 = vmax.f32 %v926_v37, %v927_v56  ;;  %v1152_v7 = vrot.slane %v6959_v45, 4 }
 0x212   :  { %v938_v60 = vrot.slane %v937_v51, 1 }
 0x213   :  { %v929_v54 = vrot.slane %v928_v2, 1  ;;  %v1153_v3 = vsel %vm999_vm5, %v1152_v7, %v1151_v15 }
 0x214   :  { %v939_v57 = vmax.f32 %v937_v51, %v938_v60  ;;  %v1155_v9 = vsel %vm1001_vm6, %v1154_v19, %v1153_v3 }
 0x215   :  { %v930_v61 = vmax.f32 %v928_v2, %v929_v54 }
 0x216   :  { %v6980_v21 = vadd.f32 %v9254_v14, %v939_v57 }
 0x217   :  { %v6985_v0 = vadd.f32 %v9255_v46, %v930_v61 }
 0x218   :  { %v1158_v11 = vrot.slane %v6980_v21, 1 }
 0x219   :  { %v1156_v4 = vrot.slane %v6985_v0, 2 }
 0x21b   :  { %v1157_v18 = vsel %vm1003_vm7, %v1156_v4, %v1155_v9 }
 0x21c   :  { %v1159_v47 = vsel %vm1005_vm8, %v1158_v11, %v1157_v18 }
 0x21d   :  { %v1165_v13 = vsel %vm795_vm11, %v1159_v47, 0.0 }
 0x21e   :  { %1166 = vadd.xlane.f32.xlu0 %v1165_v13 }
 0x28b   :  { %v1164_v5 = vpop.xlane.xlu0 %1163 }
 0x28c   :  { %v1169_v23 = vmul.f32 0.03125, %v1164_v5 }
 0x28e   :  { %v1173_v25 = vrot.slane %v1169_v23, 1  ;;  %v1174_v33 = vrot.slane %v1169_v23, 2  ;;  %v1175_v36 = vrot.slane %v1169_v23, 3  ;;  %v1176_v30 = vrot.slane %v1169_v23, 4 }
 0x28f   :  { %v1177_v37 = vrot.slane %v1169_v23, 5  ;;  %v1178_v39 = vrot.slane %v1169_v23, 6  ;;  %v1179_v28 = vrot.slane %v1169_v23, 7  ;;  %v6996_v56 = vsub.f32 %v6867_v52, %v1169_v23 }
 0x290   :  { %v6999_v12 = vsub.f32 %v6853_v35, %v1173_v25  ;;  %v7002_v29 = vsub.f32 %v6861_v48, %v1174_v33  ;;  %v7005_v51 = vsub.f32 %v6873_v58, %v1175_v36  ;;  %v7008_v2 = vsub.f32 %v6879_v10, %v1176_v30 }
 0x291   :  { %v7011_v60 = vsub.f32 %v6894_v32, %v1177_v37  ;;  %v7014_v41 = vsub.f32 %v6907_v49, %v1178_v39  ;;  %v7017_v54 = vsub.f32 %v6902_v44, %v1179_v28  ;;  %v1219_v61 = vmul.f32 %v6996_v56, %v6996_v56 }
 0x292   :  { %v1220_v55 = vmul.f32 %v6999_v12, %v6999_v12  ;;  %v1221_v7 = vmul.f32 %v7002_v29, %v7002_v29  ;;  %v1222_v57 = vmul.f32 %v7005_v51, %v7005_v51  ;;  %v1223_v59 = vmul.f32 %v7008_v2, %v7008_v2 }
 0x293   :  { %v1224_v15 = vmul.f32 %v7011_v60, %v7011_v60  ;;  %v1225_v4 = vmul.f32 %v7014_v41, %v7014_v41  ;;  %v1226_v9 = vmul.f32 %v7017_v54, %v7017_v54 }
 0x294   :  { %v1251_v3 = vrot.slane %v1220_v55, 7  ;;  %v1253_v19 = vrot.slane %v1221_v7, 6  ;;  %v1255_v18 = vrot.slane %v1222_v57, 5  ;;  %v1257_v13 = vrot.slane %v1223_v59, 4 }
 0x295   :  { %v1259_v23 = vrot.slane %v1224_v15, 3  ;;  %v1261_v33 = vrot.slane %v1225_v4, 2  ;;  %v1263_v30 = vrot.slane %v1226_v9, 1 }
 0x296   :  { %v1252_v11 = vsel %vm993_vm2, %v1251_v3, %v1219_v61 }
 0x297   :  { %v1254_v47 = vsel %vm995_vm3, %v1253_v19, %v1252_v11 }
 0x298   :  { %v1256_v5 = vsel %vm997_vm4, %v1255_v18, %v1254_v47 }
 0x299   :  { %v1258_v25 = vsel %vm999_vm5, %v1257_v13, %v1256_v5 }
 0x29a   :  { %v1260_v36 = vsel %vm1001_vm6, %v1259_v23, %v1258_v25 }
 0x29b   :  { %v1262_v37 = vsel %vm1003_vm7, %v1261_v33, %v1260_v36 }
 0x29c   :  { %v1264_v39 = vsel %vm1005_vm8, %v1263_v30, %v1262_v37 }
 0x29d   :  { %v1281_v28 = vsel %vm795_vm11, %v1264_v39, 0.0 }
 0x29e   :  { %1282 = vadd.xlane.f32.xlu1 %v1281_v28 }
 0x2ab   :  { %v1167_v55 = vpop.xlane.xlu0 %1166 }
 0x2ac   :  { %v1170_v7 = vmul.f32 0.03125, %v1167_v55 }
 0x2ae   :  { %v1180_v57 = vrot.slane %v1170_v7, 1  ;;  %v1181_v59 = vrot.slane %v1170_v7, 2  ;;  %v1182_v61 = vrot.slane %v1170_v7, 3  ;;  %v1183_v3 = vrot.slane %v1170_v7, 4 }
 0x2af   :  { %v1184_v15 = vrot.slane %v1170_v7, 5  ;;  %v1185_v19 = vrot.slane %v1170_v7, 6  ;;  %v1186_v11 = vrot.slane %v1170_v7, 7  ;;  %v7044_v4 = vsub.f32 %v6954_v31, %v1170_v7 }
 0x2b0   :  { %v7047_v9 = vsub.f32 %v6945_v16, %v1180_v57  ;;  %v7050_v18 = vsub.f32 %v6950_v24, %v1181_v59  ;;  %v7053_v47 = vsub.f32 %v6965_v1, %v1182_v61  ;;  %v7056_v13 = vsub.f32 %v6959_v45, %v1183_v3 }
 0x2b1   :  { %v7059_v5 = vsub.f32 %v6973_v8, %v1184_v15  ;;  %v7062_v23 = vsub.f32 %v6985_v0, %v1185_v19  ;;  %v7065_v25 = vsub.f32 %v6980_v21, %v1186_v11  ;;  %v1227_v39 = vmul.f32 %v7044_v4, %v7044_v4 }
 0x2b2   :  { %v1228_v33 = vmul.f32 %v7047_v9, %v7047_v9  ;;  %v1229_v36 = vmul.f32 %v7050_v18, %v7050_v18  ;;  %v1230_v30 = vmul.f32 %v7053_v47, %v7053_v47  ;;  %v1231_v37 = vmul.f32 %v7056_v13, %v7056_v13 }
 0x2b3   :  { %v1232_v28 = vmul.f32 %v7059_v5, %v7059_v5  ;;  %v1233_v57 = vmul.f32 %v7062_v23, %v7062_v23  ;;  %v1234_v59 = vmul.f32 %v7065_v25, %v7065_v25 }
 0x2b4   :  { %v1265_v55 = vrot.slane %v1228_v33, 7  ;;  %v1267_v7 = vrot.slane %v1229_v36, 6  ;;  %v1269_v3 = vrot.slane %v1230_v30, 5  ;;  %v1271_v19 = vrot.slane %v1231_v37, 4  ;;  %v6275_v30 = vld [vmem:[%s9248_s5] sm:$0xff]   ;;  %v6276_v37 = vld [vmem:[%s9248_s5 + $0x8] sm:$0xff]  }
 0x2b5   :  { %v1273_v14 = vrot.slane %v1232_v28, 3  ;;  %v1275_v50 = vrot.slane %v1233_v57, 2  ;;  %v1277_v36 = vrot.slane %v1234_v59, 1  ;;  %6086 = vmatpush3.bf16.msra.mxu0 %v6275_v30  ;;  %v7103_v28 = vld [vmem:[%s9249_s9] ss:$0 sm:$0xff] }
 0x2b6   :  { %v1266_v61 = vsel %vm993_vm2, %v1265_v55, %v1227_v39  ;;  %6087 = vmatprep.subr.bf16.mxu0 %v9262_v63 }
 0x2b7   :  { %v1268_v15 = vsel %vm995_vm3, %v1267_v7, %v1266_v61  ;;  %v7111_v61 = vld [vmem:[%s9249_s9 + $0x1] ss:$0 sm:$0xff] }
 0x2b8   :  { %v1270_v11 = vsel %vm997_vm4, %v1269_v3, %v1268_v15 }
 0x2b9   :  { %v1272_v46 = vsel %vm999_vm5, %v1271_v19, %v1270_v11  ;;  %6088 = vmatpush3.bf16.msra.mxu0 %v6276_v37 }
 0x2ba   :  { %v1274_v33 = vsel %vm1001_vm6, %v1273_v14, %v1272_v46  ;;  %6093 = vmatprep.subr.bf16.mxu0 %v9262_v63 }
 0x2bb   :  { %v1276_v20 = vsel %vm1003_vm7, %v1275_v50, %v1274_v33 }
 0x2bc   :  { %v1278_v26 = vsel %vm1005_vm8, %v1277_v36, %v1276_v20 }
 0x2bd   :  { %v1284_v62 = vsel %vm795_vm11, %v1278_v26, 0.0 }
 0x2be   :  { %1285 = vadd.xlane.f32.xlu1 %v1284_v62 }
 0x32b   :  { %v1283_v50 = vpop.xlane.xlu1 %1282 }
 0x32c   :  { %v1287_v14 = vmul.f32 0.03125, %v1283_v50 }
 0x32e   :  { %v1289_v20 = vadd.f32 1e-05, %v1287_v14 }
 0x330   :  { %6305 = vrsqrt.f32 %v1289_v20 }
 0x33a   :  { %v6306_v26 = vpop.eup %6305 }
 0x33b   :  { %v1295_v62 = vrot.slane %v6306_v26, 1  ;;  %v1296_v46 = vrot.slane %v6306_v26, 2  ;;  %v1297_v7 = vrot.slane %v6306_v26, 3  ;;  %v1325_v59 = vmul.f32 %v6306_v26, %v6996_v56 }
 0x33c   :  { %v1298_v19 = vrot.slane %v6306_v26, 4  ;;  %v1299_v11 = vrot.slane %v6306_v26, 5  ;;  %v1300_v30 = vrot.slane %v6306_v26, 6 }
 0x33d   :  { %v1326_v39 = vmul.f32 %v1295_v62, %v6999_v12  ;;  %v1327_v55 = vmul.f32 %v1296_v46, %v7002_v29  ;;  %v1328_v12 = vmul.f32 %v1297_v7, %v7005_v51  ;;  %v1345_v29 = vmul.f32 %v7103_v28, %v1325_v59 }
 0x33e   :  { %v1329_v37 = vmul.f32 %v1298_v19, %v7008_v2  ;;  %v1330_v50 = vmul.f32 %v1299_v11, %v7011_v60  ;;  %v1331_v7 = vmul.f32 %v1300_v30, %v7014_v41 }
 0x33f   :  { %v1346_v57 = vmul.f32 %v7103_v28, %v1326_v39  ;;  %v1347_v3 = vmul.f32 %v7103_v28, %v1327_v55  ;;  %v1348_v36 = vmul.f32 %v7103_v28, %v1328_v12  ;;  %v1365_v14 = vadd.f32 %v7111_v61, %v1345_v29 }
 0x340   :  { %v1301_v55 = vrot.slane %v6306_v26, 7  ;;  %v1349_v59 = vmul.f32 %v7103_v28, %v1329_v37  ;;  %v1351_v11 = vmul.f32 %v7103_v28, %v1331_v7 }
 0x341   :  { %v1366_v15 = vadd.f32 %v7111_v61, %v1346_v57  ;;  %v1367_v33 = vadd.f32 %v7111_v61, %v1347_v3  ;;  %v1368_v46 = vadd.f32 %v7111_v61, %v1348_v36  ;;  %v1350_v3 = vmul.f32 %v7103_v28, %v1330_v50 }
 0x342   :  { %v1381_v12 = vpack.c.bf16 %v1365_v14, %v1365_v14  ;;  %v1332_v19 = vmul.f32 %v1301_v55, %v7017_v54  ;;  %v1369_v29 = vadd.f32 %v7111_v61, %v1349_v59  ;;  %v1371_v37 = vadd.f32 %v7111_v61, %v1351_v11 }
 0x343   :  { %v1382_v56 = vpack.c.bf16 %v1366_v15, %v1366_v15  ;;  %v1383_v51 = vpack.c.bf16 %v1367_v33, %v1367_v33  ;;  %v1384_v60 = vpack.c.bf16 %v1368_v46, %v1368_v46  ;;  %v1370_v26 = vadd.f32 %v7111_v61, %v1350_v3 }
 0x344   :  { %v1417_v33 = vunpack.c.l.b16 %v1381_v12  ;;  %v1352_v30 = vmul.f32 %v7103_v28, %v1332_v19  ;;  %v1385_v50 = vpack.c.bf16 %v1369_v29, %v1369_v29  ;;  %v1387_v46 = vpack.c.bf16 %v1371_v37, %v1371_v37 }
 0x345   :  { %v1418_v39 = vunpack.c.l.b16 %v1382_v56  ;;  %v1419_v2 = vunpack.c.l.b16 %v1383_v51  ;;  %v1420_v36 = vunpack.c.l.b16 %v1384_v60  ;;  %v1386_v14 = vpack.c.bf16 %v1370_v26, %v1370_v26 }
 0x346   :  { %v1372_v51 = vadd.f32 %v7111_v61, %v1352_v30 }
 0x347   :  { %v1433_v15 = vrot.slane %v1418_v39, 7  ;;  %v1435_v41 = vrot.slane %v1419_v2, 6  ;;  %v1437_v54 = vrot.slane %v1420_v36, 5  ;;  %v1421_v39 = vunpack.c.l.b16 %v1385_v50 }
 0x348   :  { %v1422_v55 = vunpack.c.l.b16 %v1386_v14 }
 0x349   :  { %v1434_v56 = vsel %vm993_vm2, %v1433_v15, %v1417_v33 }
 0x34b   :  { %v1286_v20 = vpop.xlane.xlu1 %1285 }
 0x34c   :  { %v1288_v62 = vmul.f32 0.03125, %v1286_v20  ;;  %v1436_v20 = vsel %vm995_vm3, %v1435_v41, %v1434_v56 }
 0x34d   :  { %v1438_v7 = vsel %vm997_vm4, %v1437_v54, %v1436_v20 }
 0x34e   :  { %v1290_v57 = vadd.f32 1e-05, %v1288_v62 }
 0x350   :  { %6307 = vrsqrt.f32 %v1290_v57 }
 0x35a   :  { %v6308_v62 = vpop.eup %6307 }
 0x35b   :  { %v1302_v57 = vrot.slane %v6308_v62, 1  ;;  %v1303_v59 = vrot.slane %v6308_v62, 2  ;;  %v1304_v3 = vrot.slane %v6308_v62, 3  ;;  %v1305_v12 = vrot.slane %v6308_v62, 4 }
 0x35c   :  { %v1306_v2 = vrot.slane %v6308_v62, 5  ;;  %v1307_v60 = vrot.slane %v6308_v62, 6  ;;  %v1308_v15 = vrot.slane %v6308_v62, 7  ;;  %v1333_v19 = vmul.f32 %v6308_v62, %v7044_v4 }
 0x35d   :  { %v1334_v11 = vmul.f32 %v1302_v57, %v7047_v9  ;;  %v1335_v29 = vmul.f32 %v1303_v59, %v7050_v18  ;;  %v1336_v26 = vmul.f32 %v1304_v3, %v7053_v47  ;;  %v1337_v33 = vmul.f32 %v1305_v12, %v7056_v13 }
 0x35e   :  { %v1338_v41 = vmul.f32 %v1306_v2, %v7059_v5  ;;  %v1339_v36 = vmul.f32 %v1307_v60, %v7062_v23  ;;  %v1340_v56 = vmul.f32 %v1308_v15, %v7065_v25  ;;  %v1353_v30 = vmul.f32 %v7103_v28, %v1333_v19 }
 0x35f   :  { %v1354_v37 = vmul.f32 %v7103_v28, %v1334_v11  ;;  %v1355_v4 = vmul.f32 %v7103_v28, %v1335_v29  ;;  %v1356_v9 = vmul.f32 %v7103_v28, %v1336_v26  ;;  %v1357_v18 = vmul.f32 %v7103_v28, %v1337_v33 }
 0x360   :  { %v1358_v47 = vmul.f32 %v7103_v28, %v1338_v41  ;;  %v1359_v13 = vmul.f32 %v7103_v28, %v1339_v36  ;;  %v1360_v5 = vmul.f32 %v7103_v28, %v1340_v56  ;;  %v1373_v23 = vadd.f32 %v7111_v61, %v1353_v30 }
 0x361   :  { %v1374_v25 = vadd.f32 %v7111_v61, %v1354_v37  ;;  %v1375_v50 = vadd.f32 %v7111_v61, %v1355_v4  ;;  %v1376_v14 = vadd.f32 %v7111_v61, %v1356_v9  ;;  %v1377_v20 = vadd.f32 %v7111_v61, %v1357_v18 }
 0x362   :  { %v1378_v54 = vadd.f32 %v7111_v61, %v1358_v47  ;;  %v1379_v62 = vadd.f32 %v7111_v61, %v1359_v13  ;;  %v1380_v57 = vadd.f32 %v7111_v61, %v1360_v5  ;;  %v1389_v59 = vpack.c.bf16 %v1373_v23, %v1373_v23 }
 0x363   :  { %v1390_v3 = vpack.c.bf16 %v1374_v25, %v1374_v25  ;;  %v1391_v12 = vpack.c.bf16 %v1375_v50, %v1375_v50  ;;  %v1392_v28 = vpack.c.bf16 %v1376_v14, %v1376_v14  ;;  %v1393_v2 = vpack.c.bf16 %v1377_v20, %v1377_v20 }
 0x364   :  { %v1388_v60 = vpack.c.bf16 %v1372_v51, %v1372_v51  ;;  %v1394_v15 = vpack.c.bf16 %v1378_v54, %v1378_v54  ;;  %v1395_v19 = vpack.c.bf16 %v1379_v62, %v1379_v62  ;;  %v1439_v11 = vrot.slane %v1421_v39, 4 }
 0x365   :  { %v1396_v29 = vpack.c.bf16 %v1380_v57, %v1380_v57  ;;  %v1426_v26 = vunpack.c.l.b16 %v1390_v3  ;;  %v1427_v33 = vunpack.c.l.b16 %v1391_v12  ;;  %v1428_v41 = vunpack.c.l.b16 %v1392_v28 }
 0x366   :  { %v1423_v36 = vunpack.c.l.b16 %v1387_v46  ;;  %v1429_v56 = vunpack.c.l.b16 %v1393_v2  ;;  %v1440_v30 = vsel %vm999_vm5, %v1439_v11, %v1438_v7  ;;  %v1441_v37 = vrot.slane %v1422_v55, 3 }
 0x367   :  { %v1425_v4 = vunpack.c.l.b16 %v1389_v59  ;;  %v1430_v61 = vunpack.c.l.b16 %v1394_v15  ;;  %v1447_v9 = vrot.slane %v1426_v26, 7  ;;  %v1449_v18 = vrot.slane %v1427_v33, 6 }
 0x368   :  { %v1424_v47 = vunpack.c.l.b16 %v1388_v60  ;;  %v1431_v13 = vunpack.c.l.b16 %v1395_v19  ;;  %v1432_v5 = vunpack.c.l.b16 %v1396_v29  ;;  %v1442_v51 = vsel %vm1001_vm6, %v1441_v37, %v1440_v30 }
 0x369   :  { %v1448_v39 = vsel %vm993_vm2, %v1447_v9, %v1425_v4  ;;  %v1451_v23 = vrot.slane %v1428_v41, 5  ;;  %v1443_v25 = vrot.slane %v1423_v36, 2  ;;  %v1453_v46 = vrot.slane %v1429_v56, 4 }
 0x36a   :  { %v1450_v50 = vsel %vm995_vm3, %v1449_v18, %v1448_v39  ;;  %v1455_v7 = vrot.slane %v1430_v61, 3  ;;  %v1457_v54 = vrot.slane %v1431_v13, 2  ;;  %v1445_v62 = vrot.slane %v1424_v47, 1 }
 0x36b   :  { %v1452_v14 = vsel %vm997_vm4, %v1451_v23, %v1450_v50  ;;  %v1444_v55 = vsel %vm1003_vm7, %v1443_v25, %v1442_v51  ;;  %v1459_v59 = vrot.slane %v1432_v5, 1 }
 0x36c   :  { %v1454_v20 = vsel %vm999_vm5, %v1453_v46, %v1452_v14  ;;  %v1446_v12 = vsel %vm1005_vm8, %v1445_v62, %v1444_v55 }
 0x36d   :  { %v1456_v57 = vsel %vm1001_vm6, %v1455_v7, %v1454_v20 }
 0x36e   :  { %v1458_v3 = vsel %vm1003_vm7, %v1457_v54, %v1456_v57 }
 0x36f   :  { %v1460_v28 = vsel %vm1005_vm8, %v1459_v59, %v1458_v3 }
 0x370   :  { %v1461_v2 = vpack.c.b16 %v1460_v28, %v1446_v12 }
 0x372   :  { %6090 = vmatmul.mubr.msk.bf16.vlgmr.msra.gmra.mrb[36].mxu0 %vm795_vm11, %v1461_v2 }
 0x373   :  { %6095 = vmatprep.mubr.msk.bf16.mxu0 %vm6362_vm9, %v9262_v63 }
 0x445   :  { %v1511_v60 = vpop.f32.mrb[36].mxu0 }
 0x446   :  { %v1518_v15 = vpack.c.bf16 %v1511_v60, %v1511_v60  ;;  %v6091_v19 = vpop.f32.mrb[37].mxu0 }
 0x447   :  { %v1514_v11 = vpop.f32.mrb[38].mxu0 }
 0x448   :  { %v1519_v29 = vpack.c.bf16 %v1514_v11, %v1514_v11  ;;  %1521 = vrot.lane.b32.xlu0 %v1518_v15, %s6363_s16  ;;  %v6092_v26 = vpop.f32.mrb[39].mxu0 }
 0x44a   :  { %1570 = vrot.lane.b32.xlu1 %v1519_v29, %s6363_s16 }
 0x4ba   :  { %v1522_v33 = vpop.permute.xlu0 %1521 }
 0x4bb   :  { %v1527_v41 = vsel %vm795_vm11, %v1522_v33, 0 }
 0x4bc   :  { %6094 = vmatpush3.bf16.xpose.msra.mxu0 %v1527_v41  ;;  %v1571_v36 = vpop.permute.xlu1 %1570  ;;  %v6277_v41 = vld [vmem:[%s9250_s6] sm:$0xff]  }
 0x4bd   :  { %6099 = vmatprep.subr.bf16.mxu0 %v9262_v63  ;;  %v1576_v56 = vsel %vm795_vm11, %v1571_v36, 0  ;;  %v6278_v36 = vld [vmem:[%s9250_s6 + $0x8] sm:$0xff]  }
 0x4c3   :  { %6096 = vmatmul.mubr.msk.bf16.vlgmr.msra.gmra.mrb[40].mxu0 %vm795_vm11, %v1518_v15 }
 0x4c4   :  { %6100 = vmatpush3.bf16.xpose.msra.mxu0 %v1576_v56  ;;  %6101 = vmatprep.mubr.msk.bf16.mxu0 %vm6362_vm9, %v9262_v63 }
 0x4c5   :  { %6111 = vmatprep.subr.bf16.mxu0 %v9262_v63 }
 0x4cb   :  { %6102 = vmatmul.mubr.msk.bf16.vlgmr.msra.gmra.mrb[44].mxu0 %vm795_vm11, %v1519_v29 }
 0x4cc   :  { %6113 = vmatprep.mubr.msk.bf16.mxu0 %vm6362_vm9, %v9262_v63 }
 0x596   :  { %v1563_v30 = vpop.f32.mrb[40].mxu0 }
 0x597   :  { %v1618_v37 = vmul.f32 0.17677669, %v1563_v30  ;;  %v6097_v4 = vpop.f32.mrb[41].mxu0 }
 0x598   :  { %v1566_v61 = vpop.f32.mrb[42].mxu0 }
 0x599   :  { %v6098_v9 = vpop.f32.mrb[43].mxu0  ;;  %v1620_v18 = vsel %vm73_vm1, %v1618_v37, -inf }
 0x59a   :  { %1621 = vmax.xlane.f32.xlu1 %v1620_v18 }
 0x59e   :  { %v1612_v47 = vpop.f32.mrb[44].mxu0 }
 0x59f   :  { %v1619_v13 = vmul.f32 0.17677669, %v1612_v47  ;;  %v6103_v5 = vpop.f32.mrb[45].mxu0 }
 0x5a0   :  { %v1615_v51 = vpop.f32.mrb[46].mxu0 }
 0x5a1   :  { %v6104_v39 = vpop.f32.mrb[47].mxu0  ;;  %v1623_v23 = vsel %vm73_vm1, %v1619_v13, -inf }
 0x5a2   :  { %1624 = vmax.xlane.f32.xlu0 %v1623_v23 }
 0x627   :  { %v1622_v25 = vpop.xlane.xlu1 %1621 }
 0x628   :  { %v1626_v50 = vsub.f32 %v1618_v37, %v1622_v25 }
 0x62a   :  { %v1628_v46 = vmul.f32 1.442695, %v1626_v50 }
 0x62c   :  { %6309 = vpow2.f32 %v1628_v46 }
 0x62f   :  { %v1625_v14 = vpop.xlane.xlu0 %1624 }
 0x630   :  { %v1627_v7 = vsub.f32 %v1619_v13, %v1625_v14 }
 0x632   :  { %v1630_v55 = vmul.f32 1.442695, %v1627_v7 }
 0x634   :  { %6311 = vpow2.f32 %v1630_v55 }
 0x636   :  { %v6310_v20 = vpop.eup %6309 }
 0x637   :  { %v1632_v54 = vsel %vm73_vm1, %v6310_v20, 0.0 }
 0x638   :  { %1633 = vadd.xlane.f32.xlu0 %v1632_v54 }
 0x63e   :  { %v6312_v62 = vpop.eup %6311 }
 0x63f   :  { %v1635_v57 = vsel %vm73_vm1, %v6312_v62, 0.0 }
 0x640   :  { %1636 = vadd.xlane.f32.xlu1 %v1635_v57 }
 0x64e   :  { %1644 = vrot.lane.b32.xlu0 %v1518_v15, %s6364_s17 }
 0x651   :  { %1692 = vrot.lane.b32.xlu1 %v1519_v29, %s6364_s17 }
 0x6c5   :  { %v1634_v59 = vpop.xlane.xlu0 %1633 }
 0x6c6   :  { %6313 = vrcp.f32 %v1634_v59 }
 0x6c9   :  { %v1645_v3 = vpop.permute.xlu0 %1644 }
 0x6ca   :  { %v1650_v12 = vsel %vm336_vm0, %v1645_v3, 0 }
 0x6cb   :  { %6106 = vmatpush3.bf16.msra.mxu1 %v1650_v12 }
 0x6cc   :  { %6117 = vmatprep.subr.bf16.mxu1 %v9262_v63 }
 0x6cd   :  { %v1637_v28 = vpop.xlane.xlu1 %1636 }
 0x6ce   :  { %6315 = vrcp.f32 %v1637_v28 }
 0x6d0   :  { %v6314_v2 = vpop.eup %6313 }
 0x6d1   :  { %v1640_v60 = vmul.f32 %v6314_v2, %v6310_v20  ;;  %v1693_v19 = vpop.permute.xlu1 %1692 }
 0x6d2   :  { %v1698_v11 = vsel %vm336_vm0, %v1693_v19, 0 }
 0x6d3   :  { %v1642_v26 = vpack.c.bf16 %v1640_v60, %v1640_v60  ;;  %6112 = vmatpush3.bf16.msra.mxu0 %v1698_v11 }
 0x6d4   :  { %6125 = vmatprep.subr.bf16.mxu0 %v9262_v63 }
 0x6d5   :  { %6108 = vmatmul.mubr.msk.bf16.vlgmr.msra.gmra.mrb[32].mxu1 %vm73_vm1, %v1642_v26 }
 0x6d6   :  { %6121 = vmatprep.mubr.msk.bf16.mxu1 %vm6362_vm9, %v9262_v63  ;;  %6118 = vmatpush3.bf16.msra.mxu1 %v6277_v41 }
 0x6d7   :  { %6119 = vmatprep.subr.bf16.mxu1 %v9262_v63 }
 0x6d8   :  { %v6316_v15 = vpop.eup %6315 }
 0x6d9   :  { %v1641_v29 = vmul.f32 %v6316_v15, %v6312_v62 }
 0x6da   :  { %6120 = vmatpush3.bf16.msra.mxu1 %v6278_v36 }
 0x6db   :  { %v1643_v33 = vpack.c.bf16 %v1641_v29, %v1641_v29  ;;  %6133 = vmatprep.subr.bf16.mxu1 %v9262_v63 }
 0x6dd   :  { %6114 = vmatmul.mubr.msk.bf16.vlgmr.msra.gmra.mrb[48].mxu0 %vm73_vm1, %v1643_v33 }
 0x6de   :  { %6129 = vmatprep.mubr.msk.bf16.mxu0 %vm6362_vm9, %v9262_v63 }
 0x7a8   :  { %v1686_v56 = vpop.f32.mrb[32].mxu1 }
 0x7a9   :  { %v6109_v30 = vpop.f32.mrb[33].mxu1 }
 0x7aa   :  { %v1689_v37 = vpop.f32.mrb[34].mxu1 }
 0x7ab   :  { %v6110_v4 = vpop.f32.mrb[35].mxu1 }
 0x7b0   :  { %v1734_v61 = vpop.f32.mrb[48].mxu0 }
 0x7b1   :  { %v1740_v9 = vpack.c.bf16 %v1734_v61, %v1686_v56  ;;  %v6115_v18 = vpop.f32.mrb[49].mxu0 }
 0x7b2   :  { %v1737_v47 = vpop.f32.mrb[50].mxu0 }
 0x7b3   :  { %v6116_v13 = vpop.f32.mrb[51].mxu0  ;;  %6122 = vmatmul.mubr.msk.bf16.vlgmr.msra.gmra.mrb[36].mxu1 %vm795_vm11, %v1740_v9 }
 0x7b4   :  { %6141 = vmatprep.mubr.msk.bf16.mxu1 %vm6362_vm9, %v9262_v63 }
 0x886   :  { %v1794_v5 = vpop.f32.mrb[36].mxu1 }
 0x887   :  { %v1803_v51 = vrot.slane %v1794_v5, 1  ;;  %v1804_v39 = vrot.slane %v1794_v5, 2  ;;  %v1805_v23 = vrot.slane %v1794_v5, 3  ;;  %v6123_v25 = vpop.f32.mrb[37].mxu1  ;;  %v1806_v50 = vrot.slane %v1794_v5, 4 }
 0x888   :  { %v1797_v46 = vpop.f32.mrb[38].mxu1  ;;  %v1807_v14 = vrot.slane %v1794_v5, 5  ;;  %v1808_v7 = vrot.slane %v1794_v5, 6  ;;  %v1809_v55 = vrot.slane %v1794_v5, 7  ;;  %v7217_v57 = vadd.f32 %v1794_v5, %v6867_v52 }
 0x889   :  { %v7214_v20 = vadd.f32 %v1803_v51, %v6853_v35  ;;  %v1810_v54 = vrot.slane %v1797_v46, 1  ;;  %v6124_v62 = vpop.f32.mrb[39].mxu1  ;;  %v7220_v59 = vadd.f32 %v1804_v39, %v6861_v48  ;;  %v7223_v3 = vadd.f32 %v1805_v23, %v6873_v58 }
 0x88a   :  { %v7226_v12 = vadd.f32 %v1806_v50, %v6879_v10  ;;  %v7229_v28 = vadd.f32 %v1807_v14, %v6894_v32  ;;  %v1811_v2 = vrot.slane %v1797_v46, 2  ;;  %v1812_v35 = vrot.slane %v1797_v46, 3 }
 0x88b   :  { %v7232_v60 = vadd.f32 %v1808_v7, %v6907_v49  ;;  %v1865_v52 = vrot.slane %v7214_v20, 7  ;;  %v7236_v19 = vadd.f32 %v1810_v54, %v6945_v16  ;;  %v7239_v48 = vadd.f32 %v1809_v55, %v6902_v44 }
 0x88c   :  { %v1867_v58 = vrot.slane %v7220_v59, 6  ;;  %v1869_v10 = vrot.slane %v7223_v3, 5  ;;  %v1871_v11 = vrot.slane %v7226_v12, 4  ;;  %v1873_v49 = vrot.slane %v7229_v28, 3 }
 0x88d   :  { %v1866_v32 = vsel %vm993_vm2, %v1865_v52, %v7217_v57  ;;  %v1813_v26 = vrot.slane %v1797_v46, 4  ;;  %v1875_v16 = vrot.slane %v7232_v60, 2  ;;  %v1814_v29 = vrot.slane %v1797_v46, 5 }
 0x88e   :  { %v1868_v15 = vsel %vm995_vm3, %v1867_v58, %v1866_v32  ;;  %v1815_v33 = vrot.slane %v1797_v46, 6  ;;  %v1816_v41 = vrot.slane %v1797_v46, 7  ;;  %v7251_v36 = vadd.f32 %v1811_v2, %v6950_v24 }
 0x88f   :  { %v1870_v44 = vsel %vm997_vm4, %v1869_v10, %v1868_v15  ;;  %v7254_v56 = vadd.f32 %v1812_v35, %v6965_v1  ;;  %v1877_v37 = vrot.slane %v7239_v48, 1  ;;  %v7259_v4 = vadd.f32 %v1797_v46, %v6954_v31 }
 0x890   :  { %v1872_v30 = vsel %vm999_vm5, %v1871_v11, %v1870_v44  ;;  %v7262_v61 = vadd.f32 %v1813_v26, %v6959_v45  ;;  %v7266_v18 = vadd.f32 %v1814_v29, %v6973_v8  ;;  %v1879_v24 = vrot.slane %v7236_v19, 7 }
 0x891   :  { %v1874_v9 = vsel %vm1001_vm6, %v1873_v49, %v1872_v30  ;;  %v1881_v1 = vrot.slane %v7251_v36, 6  ;;  %v7272_v13 = vadd.f32 %v1815_v33, %v6985_v0  ;;  %v7276_v5 = vadd.f32 %v1816_v41, %v6980_v21 }
 0x892   :  { %v1876_v47 = vsel %vm1003_vm7, %v1875_v16, %v1874_v9  ;;  %v1880_v45 = vsel %vm993_vm2, %v1879_v24, %v7259_v4  ;;  %v1883_v8 = vrot.slane %v7254_v56, 5  ;;  %v1885_v23 = vrot.slane %v7262_v61, 4 }
 0x893   :  { %v1878_v31 = vsel %vm1005_vm8, %v1877_v37, %v1876_v47  ;;  %v1882_v39 = vsel %vm995_vm3, %v1881_v1, %v1880_v45  ;;  %v1887_v25 = vrot.slane %v7266_v18, 3  ;;  %v1889_v21 = vrot.slane %v7272_v13, 2 }
 0x894   :  { %v1895_v51 = vsel %vm795_vm11, %v1878_v31, 0.0  ;;  %v1884_v0 = vsel %vm997_vm4, %v1883_v8, %v1882_v39  ;;  %v1891_v14 = vrot.slane %v7276_v5, 1 }
 0x895   :  { %1896 = vadd.xlane.f32.xlu1 %v1895_v51  ;;  %v1886_v50 = vsel %vm999_vm5, %v1885_v23, %v1884_v0 }
 0x896   :  { %v1888_v46 = vsel %vm1001_vm6, %v1887_v25, %v1886_v50 }
 0x897   :  { %v1890_v7 = vsel %vm1003_vm7, %v1889_v21, %v1888_v46 }
 0x898   :  { %v1892_v55 = vsel %vm1005_vm8, %v1891_v14, %v1890_v7 }
 0x899   :  { %v1898_v54 = vsel %vm795_vm11, %v1892_v55, 0.0 }
 0x89a   :  { %1899 = vadd.xlane.f32.xlu0 %v1898_v54 }
 0x922   :  { %v1897_v62 = vpop.xlane.xlu1 %1896 }
 0x923   :  { %v1901_v2 = vmul.f32 0.03125, %v1897_v62 }
 0x925   :  { %v1905_v35 = vrot.slane %v1901_v2, 1  ;;  %v1906_v52 = vrot.slane %v1901_v2, 2  ;;  %v1907_v58 = vrot.slane %v1901_v2, 3  ;;  %v1908_v10 = vrot.slane %v1901_v2, 4 }
 0x926   :  { %v1909_v32 = vrot.slane %v1901_v2, 5  ;;  %v1910_v11 = vrot.slane %v1901_v2, 6  ;;  %v1911_v49 = vrot.slane %v1901_v2, 7  ;;  %v7294_v26 = vsub.f32 %v7217_v57, %v1901_v2 }
 0x927   :  { %v7297_v15 = vsub.f32 %v7214_v20, %v1905_v35  ;;  %v7300_v16 = vsub.f32 %v7220_v59, %v1906_v52  ;;  %v7303_v29 = vsub.f32 %v7223_v3, %v1907_v58  ;;  %v7306_v33 = vsub.f32 %v7226_v12, %v1908_v10  ;;  %v1900_v44 = vpop.xlane.xlu0 %1899 }
 0x928   :  { %v7309_v41 = vsub.f32 %v7229_v28, %v1909_v32  ;;  %v7312_v30 = vsub.f32 %v7232_v60, %v1910_v11  ;;  %v7315_v37 = vsub.f32 %v7239_v48, %v1911_v49  ;;  %v1902_v9 = vmul.f32 0.03125, %v1900_v44 }
 0x929   :  { %v1952_v24 = vmul.f32 %v7297_v15, %v7297_v15  ;;  %v1953_v1 = vmul.f32 %v7300_v16, %v7300_v16  ;;  %v1954_v47 = vmul.f32 %v7303_v29, %v7303_v29  ;;  %v1951_v31 = vmul.f32 %v7294_v26, %v7294_v26 }
 0x92a   :  { %v1955_v45 = vmul.f32 %v7306_v33, %v7306_v33  ;;  %v1956_v8 = vmul.f32 %v7309_v41, %v7309_v41  ;;  %v1957_v51 = vmul.f32 %v7312_v30, %v7312_v30  ;;  %v1958_v39 = vmul.f32 %v7315_v37, %v7315_v37 }
 0x92b   :  { %v1983_v23 = vrot.slane %v1952_v24, 7  ;;  %v1985_v0 = vrot.slane %v1953_v1, 6  ;;  %v1912_v25 = vrot.slane %v1902_v9, 1  ;;  %v1987_v50 = vrot.slane %v1954_v47, 5 }
 0x92c   :  { %v1989_v21 = vrot.slane %v1955_v45, 4  ;;  %v1991_v46 = vrot.slane %v1956_v8, 3  ;;  %v1993_v14 = vrot.slane %v1957_v51, 2  ;;  %v1913_v55 = vrot.slane %v1902_v9, 2 }
 0x92d   :  { %v1984_v7 = vsel %vm993_vm2, %v1983_v23, %v1951_v31  ;;  %v1914_v54 = vrot.slane %v1902_v9, 3  ;;  %v1915_v62 = vrot.slane %v1902_v9, 4  ;;  %v1916_v35 = vrot.slane %v1902_v9, 5 }
 0x92e   :  { %v1986_v2 = vsel %vm995_vm3, %v1985_v0, %v1984_v7  ;;  %v1917_v52 = vrot.slane %v1902_v9, 6  ;;  %v1918_v58 = vrot.slane %v1902_v9, 7  ;;  %v7337_v32 = vsub.f32 %v7259_v4, %v1902_v9 }
 0x92f   :  { %v1988_v10 = vsel %vm997_vm4, %v1987_v50, %v1986_v2  ;;  %v7340_v11 = vsub.f32 %v7236_v19, %v1912_v25  ;;  %v7343_v49 = vsub.f32 %v7251_v36, %v1913_v55  ;;  %v7347_v24 = vsub.f32 %v7254_v56, %v1914_v54 }
 0x930   :  { %v1990_v44 = vsel %vm999_vm5, %v1989_v21, %v1988_v10  ;;  %v7350_v1 = vsub.f32 %v7262_v61, %v1915_v62  ;;  %v7353_v47 = vsub.f32 %v7266_v18, %v1916_v35  ;;  %v1995_v31 = vrot.slane %v1958_v39, 1 }
 0x931   :  { %v1992_v9 = vsel %vm1001_vm6, %v1991_v46, %v1990_v44  ;;  %v7357_v45 = vsub.f32 %v7272_v13, %v1917_v52  ;;  %v7360_v8 = vsub.f32 %v7276_v5, %v1918_v58  ;;  %v1960_v23 = vmul.f32 %v7340_v11, %v7340_v11 }
 0x932   :  { %v1994_v51 = vsel %vm1003_vm7, %v1993_v14, %v1992_v9  ;;  %v1961_v0 = vmul.f32 %v7343_v49, %v7343_v49  ;;  %v1962_v25 = vmul.f32 %v7347_v24, %v7347_v24  ;;  %v1959_v39 = vmul.f32 %v7337_v32, %v7337_v32 }
 0x933   :  { %v1996_v50 = vsel %vm1005_vm8, %v1995_v31, %v1994_v51  ;;  %v1963_v21 = vmul.f32 %v7350_v1, %v7350_v1  ;;  %v1964_v14 = vmul.f32 %v7353_v47, %v7353_v47  ;;  %v1997_v7 = vrot.slane %v1960_v23, 7 }
 0x934   :  { %v2013_v46 = vsel %vm795_vm11, %v1996_v50, 0.0  ;;  %v1999_v55 = vrot.slane %v1961_v0, 6  ;;  %v1965_v54 = vmul.f32 %v7357_v45, %v7357_v45  ;;  %v1966_v62 = vmul.f32 %v7360_v8, %v7360_v8 }
 0x935   :  { %2014 = vadd.xlane.f32.xlu0 %v2013_v46  ;;  %v1998_v2 = vsel %vm993_vm2, %v1997_v7, %v1959_v39  ;;  %v2001_v35 = vrot.slane %v1962_v25, 5  ;;  %v2003_v58 = vrot.slane %v1963_v21, 4  ;;  %v2005_v44 = vrot.slane %v1964_v14, 3  ;;  %v6279_v25 = vld [vmem:[%s9251_s7] sm:$0xff]   ;;  %v6280_v39 = vld [vmem:[%s9251_s7 + $0x8] sm:$0xff]  }
 0x936   :  { %v2000_v52 = vsel %vm995_vm3, %v1999_v55, %v1998_v2  ;;  %v2007_v31 = vrot.slane %v1965_v54, 2  ;;  %v2009_v23 = vrot.slane %v1966_v62, 1  ;;  %6126 = vmatpush3.bf16.msra.mxu0 %v6279_v25  ;;  %v6281_v21 = vld [vmem:[%s9252_s8] sm:$0xff]   ;;  %v6282_v14 = vld [vmem:[%s9252_s8 + $0x8] sm:$0xff]  }
 0x937   :  { %v2002_v10 = vsel %vm997_vm4, %v2001_v35, %v2000_v52  ;;  %6127 = vmatprep.subr.bf16.mxu0 %v9262_v63  ;;  %6134 = vmatpush3.bf16.msra.mxu1 %v6281_v21 }
 0x938   :  { %v2004_v9 = vsel %vm999_vm5, %v2003_v58, %v2002_v10  ;;  %6135 = vmatprep.subr.bf16.mxu1 %v9262_v63  ;;  %v5770_v58 = vld [vmem:[%s9249_s9 + $0x2] ss:$0 sm:$0xff] }
 0x939   :  { %v2006_v51 = vsel %vm1001_vm6, %v2005_v44, %v2004_v9 }
 0x93a   :  { %v2008_v0 = vsel %vm1003_vm7, %v2007_v31, %v2006_v51  ;;  %6128 = vmatpush3.bf16.msra.mxu0 %v6280_v39 }
 0x93b   :  { %v2010_v50 = vsel %vm1005_vm8, %v2009_v23, %v2008_v0  ;;  %6145 = vmatprep.subr.bf16.mxu0 %v9262_v63  ;;  %6136 = vmatpush3.bf16.msra.mxu1 %v6282_v14 }
 0x93c   :  { %v2016_v46 = vsel %vm795_vm11, %v2010_v50, 0.0  ;;  %6137 = vmatprep.subr.bf16.mxu1 %v9262_v63 }
 0x93d   :  { %2017 = vadd.xlane.f32.xlu1 %v2016_v46 }
 0x9c2   :  { %v2015_v7 = vpop.xlane.xlu0 %2014 }
 0x9c3   :  { %v2019_v55 = vmul.f32 0.03125, %v2015_v7 }
 0x9c5   :  { %v2021_v54 = vadd.f32 1e-05, %v2019_v55 }
 0x9c7   :  { %6317 = vrsqrt.f32 %v2021_v54 }
 0x9ca   :  { %v2018_v62 = vpop.xlane.xlu1 %2017 }
 0x9cb   :  { %v2020_v2 = vmul.f32 0.03125, %v2018_v62  ;;  %v5771_v62 = vld [vmem:[%s9249_s9 + $0x3] ss:$0 sm:$0xff] }
 0x9cd   :  { %v2022_v35 = vadd.f32 1e-05, %v2020_v2 }
 0x9cf   :  { %6319 = vrsqrt.f32 %v2022_v35 }
 0x9d1   :  { %v6318_v52 = vpop.eup %6317 }
 0x9d2   :  { %v2027_v10 = vrot.slane %v6318_v52, 1  ;;  %v2028_v44 = vrot.slane %v6318_v52, 2  ;;  %v2029_v9 = vrot.slane %v6318_v52, 3  ;;  %v2030_v31 = vrot.slane %v6318_v52, 4 }
 0x9d3   :  { %v2031_v51 = vrot.slane %v6318_v52, 5  ;;  %v2032_v23 = vrot.slane %v6318_v52, 6  ;;  %v2033_v0 = vrot.slane %v6318_v52, 7  ;;  %v2057_v50 = vmul.f32 %v6318_v52, %v7294_v26 }
 0x9d4   :  { %v2058_v46 = vmul.f32 %v2027_v10, %v7297_v15  ;;  %v2059_v25 = vmul.f32 %v2028_v44, %v7300_v16  ;;  %v2060_v39 = vmul.f32 %v2029_v9, %v7303_v29  ;;  %v2061_v21 = vmul.f32 %v2030_v31, %v7306_v33 }
 0x9d5   :  { %v2062_v14 = vmul.f32 %v2031_v51, %v7309_v41  ;;  %v2063_v7 = vmul.f32 %v2032_v23, %v7312_v30  ;;  %v2064_v55 = vmul.f32 %v2033_v0, %v7315_v37  ;;  %v2077_v54 = vmul.f32 %v5770_v58, %v2057_v50 }
 0x9d6   :  { %v2078_v26 = vmul.f32 %v5770_v58, %v2058_v46  ;;  %v2079_v2 = vmul.f32 %v5770_v58, %v2059_v25  ;;  %v2080_v15 = vmul.f32 %v5770_v58, %v2060_v39  ;;  %v2081_v35 = vmul.f32 %v5770_v58, %v2061_v21 }
 0x9d7   :  { %v2082_v16 = vmul.f32 %v5770_v58, %v2062_v14  ;;  %v2083_v52 = vmul.f32 %v5770_v58, %v2063_v7  ;;  %v2084_v29 = vmul.f32 %v5770_v58, %v2064_v55  ;;  %v2097_v10 = vadd.f32 %v5771_v62, %v2077_v54 }
 0x9d8   :  { %v2098_v33 = vadd.f32 %v5771_v62, %v2078_v26  ;;  %v2099_v44 = vadd.f32 %v5771_v62, %v2079_v2  ;;  %v2100_v9 = vadd.f32 %v5771_v62, %v2080_v15  ;;  %v2101_v30 = vadd.f32 %v5771_v62, %v2081_v35 }
 0x9d9   :  { %v6320_v41 = vpop.eup %6319  ;;  %v2102_v31 = vadd.f32 %v5771_v62, %v2082_v16  ;;  %v2103_v37 = vadd.f32 %v5771_v62, %v2083_v52 }
 0x9da   :  { %v2034_v51 = vrot.slane %v6320_v41, 1  ;;  %v2035_v23 = vrot.slane %v6320_v41, 2  ;;  %v2036_v0 = vrot.slane %v6320_v41, 3  ;;  %v2037_v50 = vrot.slane %v6320_v41, 4 }
 0x9db   :  { %v2038_v6 = vrot.slane %v6320_v41, 5  ;;  %v2039_v46 = vrot.slane %v6320_v41, 6  ;;  %v2040_v25 = vrot.slane %v6320_v41, 7  ;;  %v2065_v39 = vmul.f32 %v6320_v41, %v7337_v32 }
 0x9dc   :  { %v2066_v21 = vmul.f32 %v2034_v51, %v7340_v11  ;;  %v2067_v14 = vmul.f32 %v2035_v23, %v7343_v49  ;;  %v2068_v7 = vmul.f32 %v2036_v0, %v7347_v24  ;;  %v2069_v55 = vmul.f32 %v2037_v50, %v7350_v1 }
 0x9dd   :  { %v2070_v54 = vmul.f32 %v2038_v6, %v7353_v47  ;;  %v2071_v26 = vmul.f32 %v2039_v46, %v7357_v45  ;;  %v2072_v2 = vmul.f32 %v2040_v25, %v7360_v8  ;;  %v2085_v15 = vmul.f32 %v5770_v58, %v2065_v39 }
 0x9de   :  { %v2086_v35 = vmul.f32 %v5770_v58, %v2066_v21  ;;  %v2087_v16 = vmul.f32 %v5770_v58, %v2067_v14  ;;  %v2088_v52 = vmul.f32 %v5770_v58, %v2068_v7  ;;  %v2089_v38 = vmul.f32 %v5770_v58, %v2069_v55 }
 0x9df   :  { %v2090_v32 = vmul.f32 %v5770_v58, %v2070_v54  ;;  %v2091_v41 = vmul.f32 %v5770_v58, %v2071_v26  ;;  %v2092_v11 = vmul.f32 %v5770_v58, %v2072_v2  ;;  %v2104_v51 = vadd.f32 %v5771_v62, %v2084_v29 }
 0x9e0   :  { %v2106_v49 = vadd.f32 %v5771_v62, %v2086_v35  ;;  %v2107_v23 = vadd.f32 %v5771_v62, %v2087_v16  ;;  %v2108_v24 = vadd.f32 %v5771_v62, %v2088_v52  ;;  %v2114_v0 = vpack.c.bf16 %v2098_v33, %v2098_v33 }
 0x9e1   :  { %v2105_v1 = vadd.f32 %v5771_v62, %v2085_v15  ;;  %v2109_v50 = vadd.f32 %v5771_v62, %v2089_v38  ;;  %v2110_v6 = vadd.f32 %v5771_v62, %v2090_v32  ;;  %v2115_v47 = vpack.c.bf16 %v2099_v44, %v2099_v44 }
 0x9e2   :  { %v2111_v45 = vadd.f32 %v5771_v62, %v2091_v41  ;;  %v2112_v46 = vadd.f32 %v5771_v62, %v2092_v11  ;;  %v2116_v8 = vpack.c.bf16 %v2100_v9, %v2100_v9  ;;  %v2122_v25 = vpack.c.bf16 %v2106_v49, %v2106_v49 }
 0x9e3   :  { %v2113_v39 = vpack.c.bf16 %v2097_v10, %v2097_v10  ;;  %v2117_v21 = vpack.c.bf16 %v2101_v30, %v2101_v30  ;;  %v2118_v14 = vpack.c.bf16 %v2102_v31, %v2102_v31  ;;  %v2123_v7 = vpack.c.bf16 %v2107_v23, %v2107_v23 }
 0x9e4   :  { %v2119_v55 = vpack.c.bf16 %v2103_v37, %v2103_v37  ;;  %v2120_v54 = vpack.c.bf16 %v2104_v51, %v2104_v51  ;;  %v2124_v58 = vpack.c.bf16 %v2108_v24, %v2108_v24  ;;  %v2154_v29 = vunpack.c.l.b16 %v2114_v0 }
 0x9e5   :  { %v2121_v26 = vpack.c.bf16 %v2105_v1, %v2105_v1  ;;  %v2125_v2 = vpack.c.bf16 %v2109_v50, %v2109_v50  ;;  %v2126_v35 = vpack.c.bf16 %v2110_v6, %v2110_v6  ;;  %v2155_v33 = vunpack.c.l.b16 %v2115_v47 }
 0x9e6   :  { %v2127_v15 = vpack.c.bf16 %v2111_v45, %v2111_v45  ;;  %v2128_v38 = vpack.c.bf16 %v2112_v46, %v2112_v46  ;;  %v2156_v16 = vunpack.c.l.b16 %v2116_v8  ;;  %v2162_v44 = vunpack.c.l.b16 %v2122_v25 }
 0x9e7   :  { %v2153_v52 = vunpack.c.l.b16 %v2113_v39  ;;  %v2157_v62 = vunpack.c.l.b16 %v2117_v21  ;;  %v2158_v9 = vunpack.c.l.b16 %v2118_v14  ;;  %v2163_v32 = vunpack.c.l.b16 %v2123_v7 }
 0x9e8   :  { %v2159_v10 = vunpack.c.l.b16 %v2119_v55  ;;  %v2164_v30 = vunpack.c.l.b16 %v2124_v58  ;;  %v2169_v31 = vrot.slane %v2154_v29, 7  ;;  %v2171_v41 = vrot.slane %v2155_v33, 6 }
 0x9e9   :  { %v2160_v37 = vunpack.c.l.b16 %v2120_v54  ;;  %v2161_v11 = vunpack.c.l.b16 %v2121_v26  ;;  %v2165_v51 = vunpack.c.l.b16 %v2125_v2  ;;  %v2166_v49 = vunpack.c.l.b16 %v2126_v35 }
 0x9ea   :  { %v2170_v23 = vsel %vm993_vm2, %v2169_v31, %v2153_v52  ;;  %v2173_v24 = vrot.slane %v2156_v16, 5  ;;  %v2183_v0 = vrot.slane %v2162_v44, 7  ;;  %v2185_v1 = vrot.slane %v2163_v32, 6  ;;  %v6284_v32 = vld [vmem:[%s9252_s8 + $0x18] sm:$0xff]  }
 0x9eb   :  { %v2167_v50 = vunpack.c.l.b16 %v2127_v15  ;;  %v2168_v6 = vunpack.c.l.b16 %v2128_v38  ;;  %v2172_v47 = vsel %vm995_vm3, %v2171_v41, %v2170_v23  ;;  %v2175_v45 = vrot.slane %v2157_v62, 4 }
 0x9ec   :  { %v2174_v46 = vsel %vm997_vm4, %v2173_v24, %v2172_v47  ;;  %v2177_v8 = vrot.slane %v2158_v9, 3  ;;  %v2184_v25 = vsel %vm993_vm2, %v2183_v0, %v2161_v11  ;;  %v2187_v39 = vrot.slane %v2164_v30, 5  ;;  %v6283_v9 = vld [vmem:[%s9252_s8 + $0x10] sm:$0xff]   ;;  %v5776_v0 = vld [vmem:[%s9249_s9 + $0x5] ss:$0 sm:$0xff] }
 0x9ed   :  { %v2176_v21 = vsel %vm999_vm5, %v2175_v45, %v2174_v46  ;;  %v2179_v14 = vrot.slane %v2159_v10, 2  ;;  %v2186_v7 = vsel %vm995_vm3, %v2185_v1, %v2184_v25  ;;  %v2189_v55 = vrot.slane %v2165_v51, 4  ;;  %6138 = vmatpush3.bf16.msra.mxu1 %v6283_v9  ;;  %v5772_v10 = vld [vmem:[%s9249_s9 + $0x4] ss:$0 sm:$0xff] }
 0x9ee   :  { %v2178_v54 = vsel %vm1001_vm6, %v2177_v8, %v2176_v21  ;;  %v2188_v58 = vsel %vm997_vm4, %v2187_v39, %v2186_v7  ;;  %v2191_v29 = vrot.slane %v2166_v49, 3  ;;  %v2193_v35 = vrot.slane %v2167_v50, 2  ;;  %6139 = vmatprep.subr.bf16.mxu1 %v9262_v63 }
 0x9ef   :  { %v2180_v26 = vsel %vm1003_vm7, %v2179_v14, %v2178_v54  ;;  %v2190_v2 = vsel %vm999_vm5, %v2189_v55, %v2188_v58  ;;  %v2181_v33 = vrot.slane %v2160_v37, 1  ;;  %v2195_v38 = vrot.slane %v2168_v6, 1 }
 0x9f0   :  { %v2192_v15 = vsel %vm1001_vm6, %v2191_v29, %v2190_v2 }
 0x9f1   :  { %v2194_v16 = vsel %vm1003_vm7, %v2193_v35, %v2192_v15  ;;  %v2182_v44 = vsel %vm1005_vm8, %v2181_v33, %v2180_v26  ;;  %6140 = vmatpush3.bf16.msra.mxu1 %v6284_v32 }
 0x9f2   :  { %v2196_v52 = vsel %vm1005_vm8, %v2195_v38, %v2194_v16  ;;  %6159 = vmatprep.subr.bf16.mxu1 %v9262_v63 }
 0x9f3   :  { %v2197_v62 = vpack.c.b16 %v2196_v52, %v2182_v44 }
 0x9f5   :  { %6130 = vmatmul.mubr.msk.bf16.vlgmr.msra.gmra.mrb[52].mxu0 %vm795_vm11, %v2197_v62 }
 0x9f6   :  { %6149 = vmatprep.mubr.msk.bf16.mxu0 %vm6362_vm9, %v9262_v63 }
 0xac8   :  { %v2247_v30 = vpop.f32.mrb[52].mxu0 }
 0xac9   :  { %v2248_v31 = vadd.f32 %v5772_v10, %v2247_v30  ;;  %v6131_v41 = vpop.f32.mrb[53].mxu0 }
 0xaca   :  { %v2250_v37 = vpop.f32.mrb[54].mxu0 }
 0xacb   :  { %v2251_v11 = vadd.f32 %v5772_v10, %v2250_v37  ;;  %v6132_v51 = vpop.f32.mrb[55].mxu0  ;;  %v2254_v49 = vmax.f32 %v2248_v31, 0.0 }
 0xacd   :  { %v2255_v23 = vmax.f32 %v2251_v11, 0.0 }
 0xacf   :  { %v2256_v24 = vpack.c.bf16 %v2255_v23, %v2254_v49 }
 0xad1   :  { %6142 = vmatmul.mubr.msk.bf16.vlgmr.msra.gmra.mrb[40].mxu1 %vm9287_vm10, %v2256_v24 }
 0xad2   :  { %6161 = vmatprep.mubr.msk.bf16.mxu1 %vm6362_vm9, %v9262_v63 }
 0xba4   :  { %v2330_v1 = vpop.f32.mrb[40].mxu1 }
 0xba5   :  { %v2331_v50 = vadd.f32 %v5776_v0, %v2330_v1  ;;  %v6143_v6 = vpop.f32.mrb[41].mxu1 }
 0xba6   :  { %v2333_v47 = vpop.f32.mrb[42].mxu1 }
 0xba7   :  { %v2334_v45 = vadd.f32 %v5776_v0, %v2333_v47  ;;  %v6144_v46 = vpop.f32.mrb[43].mxu1  ;;  %v2339_v8 = vrot.slane %v2331_v50, 1  ;;  %v2340_v25 = vrot.slane %v2331_v50, 2  ;;  %v2341_v39 = vrot.slane %v2331_v50, 3 }
 0xba8   :  { %v2342_v21 = vrot.slane %v2331_v50, 4  ;;  %v2343_v14 = vrot.slane %v2331_v50, 5  ;;  %v2344_v7 = vrot.slane %v2331_v50, 6  ;;  %v2345_v55 = vrot.slane %v2331_v50, 7 }
 0xba9   :  { %v7462_v54 = vadd.f32 %v2339_v8, %v7214_v20  ;;  %v7465_v58 = vadd.f32 %v2340_v25, %v7220_v59  ;;  %v7468_v29 = vadd.f32 %v2341_v39, %v7223_v3  ;;  %v7480_v33 = vadd.f32 %v2331_v50, %v7217_v57 }
 0xbaa   :  { %v7471_v26 = vadd.f32 %v2342_v21, %v7226_v12  ;;  %v7474_v2 = vadd.f32 %v2343_v14, %v7229_v28  ;;  %v7477_v35 = vadd.f32 %v2344_v7, %v7232_v60  ;;  %v2346_v15 = vrot.slane %v2334_v45, 1 }
 0xbab   :  { %v2408_v20 = vrot.slane %v7462_v54, 7  ;;  %v2410_v59 = vrot.slane %v7465_v58, 6  ;;  %v7485_v3 = vadd.f32 %v2345_v55, %v7239_v48  ;;  %v2412_v12 = vrot.slane %v7468_v29, 5 }
 0xbac   :  { %v2414_v38 = vrot.slane %v7471_v26, 4  ;;  %v2416_v28 = vrot.slane %v7474_v2, 3  ;;  %v2347_v16 = vrot.slane %v2334_v45, 2  ;;  %v2348_v57 = vrot.slane %v2334_v45, 3 }
 0xbad   :  { %v2409_v60 = vsel %vm993_vm2, %v2408_v20, %v7480_v33  ;;  %v2349_v44 = vrot.slane %v2334_v45, 4  ;;  %v2418_v62 = vrot.slane %v7477_v35, 2  ;;  %v2350_v9 = vrot.slane %v2334_v45, 5 }
 0xbae   :  { %v2411_v52 = vsel %vm995_vm3, %v2410_v59, %v2409_v60  ;;  %v2351_v32 = vrot.slane %v2334_v45, 6  ;;  %v2352_v10 = vrot.slane %v2334_v45, 7  ;;  %v7496_v30 = vadd.f32 %v2346_v15, %v7236_v19 }
 0xbaf   :  { %v2413_v48 = vsel %vm997_vm4, %v2412_v12, %v2411_v52  ;;  %v7499_v31 = vadd.f32 %v2347_v16, %v7251_v36  ;;  %v2420_v37 = vrot.slane %v7485_v3, 1  ;;  %v7504_v11 = vadd.f32 %v2348_v57, %v7254_v56 }
 0xbb0   :  { %v2415_v41 = vsel %vm999_vm5, %v2414_v38, %v2413_v48  ;;  %v7507_v51 = vadd.f32 %v2349_v44, %v7262_v61  ;;  %v7511_v23 = vadd.f32 %v2334_v45, %v7259_v4  ;;  %v7514_v19 = vadd.f32 %v2350_v9, %v7266_v18 }
 0xbb1   :  { %v2417_v49 = vsel %vm1001_vm6, %v2416_v28, %v2415_v41  ;;  %v2422_v36 = vrot.slane %v7496_v30, 7  ;;  %v7519_v0 = vadd.f32 %v2351_v32, %v7272_v13  ;;  %v2424_v56 = vrot.slane %v7499_v31, 6 }
 0xbb2   :  { %v2419_v24 = vsel %vm1003_vm7, %v2418_v62, %v2417_v49  ;;  %v7524_v1 = vadd.f32 %v2352_v10, %v7276_v5  ;;  %v2426_v18 = vrot.slane %v7504_v11, 5  ;;  %v2428_v47 = vrot.slane %v7507_v51, 4 }
 0xbb3   :  { %v2421_v61 = vsel %vm1005_vm8, %v2420_v37, %v2419_v24  ;;  %v2423_v4 = vsel %vm993_vm2, %v2422_v36, %v7511_v23  ;;  %v2430_v45 = vrot.slane %v7514_v19, 3  ;;  %v2432_v5 = vrot.slane %v7519_v0, 2 }
 0xbb4   :  { %v2438_v50 = vsel %vm795_vm11, %v2421_v61, 0.0  ;;  %v2425_v6 = vsel %vm995_vm3, %v2424_v56, %v2423_v4  ;;  %v2434_v25 = vrot.slane %v7524_v1, 1 }
 0xbb5   :  { %2439 = vadd.xlane.f32.xlu0 %v2438_v50  ;;  %v2427_v13 = vsel %vm997_vm4, %v2426_v18, %v2425_v6 }
 0xbb6   :  { %v2429_v46 = vsel %vm999_vm5, %v2428_v47, %v2427_v13 }
 0xbb7   :  { %v2431_v8 = vsel %vm1001_vm6, %v2430_v45, %v2429_v46 }
 0xbb8   :  { %v2433_v39 = vsel %vm1003_vm7, %v2432_v5, %v2431_v8 }
 0xbb9   :  { %v2435_v21 = vsel %vm1005_vm8, %v2434_v25, %v2433_v39 }
 0xbba   :  { %v2441_v14 = vsel %vm795_vm11, %v2435_v21, 0.0 }
 0xbbb   :  { %2442 = vadd.xlane.f32.xlu1 %v2441_v14 }
 0xc42   :  { %v2440_v7 = vpop.xlane.xlu0 %2439 }
 0xc43   :  { %v2444_v55 = vmul.f32 0.03125, %v2440_v7 }
 0xc45   :  { %v2448_v20 = vrot.slane %v2444_v55, 1  ;;  %v2449_v59 = vrot.slane %v2444_v55, 2  ;;  %v2450_v15 = vrot.slane %v2444_v55, 3  ;;  %v2451_v12 = vrot.slane %v2444_v55, 4 }
 0xc46   :  { %v2452_v38 = vrot.slane %v2444_v55, 5  ;;  %v2453_v28 = vrot.slane %v2444_v55, 6  ;;  %v2454_v60 = vrot.slane %v2444_v55, 7  ;;  %v7542_v16 = vsub.f32 %v7480_v33, %v2444_v55 }
 0xc47   :  { %v7545_v57 = vsub.f32 %v7462_v54, %v2448_v20  ;;  %v7548_v44 = vsub.f32 %v7465_v58, %v2449_v59  ;;  %v7551_v52 = vsub.f32 %v7468_v29, %v2450_v15  ;;  %v7554_v62 = vsub.f32 %v7471_v26, %v2451_v12 }
 0xc48   :  { %v2443_v9 = vpop.xlane.xlu1 %2442  ;;  %v7557_v32 = vsub.f32 %v7474_v2, %v2452_v38  ;;  %v7560_v48 = vsub.f32 %v7477_v35, %v2453_v28  ;;  %v7563_v10 = vsub.f32 %v7485_v3, %v2454_v60  ;;  %v2494_v24 = vmul.f32 %v7542_v16, %v7542_v16 }
 0xc49   :  { %v2445_v41 = vmul.f32 0.03125, %v2443_v9  ;;  %v2495_v37 = vmul.f32 %v7545_v57, %v7545_v57  ;;  %v2496_v49 = vmul.f32 %v7548_v44, %v7548_v44  ;;  %v2497_v36 = vmul.f32 %v7551_v52, %v7551_v52 }
 0xc4a   :  { %v2498_v56 = vmul.f32 %v7554_v62, %v7554_v62  ;;  %v2499_v61 = vmul.f32 %v7557_v32, %v7557_v32  ;;  %v2500_v4 = vmul.f32 %v7560_v48, %v7560_v48  ;;  %v2501_v18 = vmul.f32 %v7563_v10, %v7563_v10 }
 0xc4b   :  { %v2526_v50 = vrot.slane %v2495_v37, 7  ;;  %v2528_v6 = vrot.slane %v2496_v49, 6  ;;  %v2455_v47 = vrot.slane %v2445_v41, 1  ;;  %v2530_v13 = vrot.slane %v2497_v36, 5 }
 0xc4c   :  { %v2532_v45 = vrot.slane %v2498_v56, 4  ;;  %v2534_v46 = vrot.slane %v2499_v61, 3  ;;  %v2536_v5 = vrot.slane %v2500_v4, 2  ;;  %v2456_v25 = vrot.slane %v2445_v41, 2 }
 0xc4d   :  { %v2527_v8 = vsel %vm993_vm2, %v2526_v50, %v2494_v24  ;;  %v2457_v39 = vrot.slane %v2445_v41, 3  ;;  %v2458_v21 = vrot.slane %v2445_v41, 4  ;;  %v2459_v7 = vrot.slane %v2445_v41, 5 }
 0xc4e   :  { %v2529_v14 = vsel %vm995_vm3, %v2528_v6, %v2527_v8  ;;  %v2460_v55 = vrot.slane %v2445_v41, 6  ;;  %v2461_v20 = vrot.slane %v2445_v41, 7  ;;  %v7585_v15 = vsub.f32 %v7511_v23, %v2445_v41 }
 0xc4f   :  { %v2531_v59 = vsel %vm997_vm4, %v2530_v13, %v2529_v14  ;;  %v7588_v12 = vsub.f32 %v7496_v30, %v2455_v47  ;;  %v7591_v38 = vsub.f32 %v7499_v31, %v2456_v25  ;;  %v7595_v60 = vsub.f32 %v7504_v11, %v2457_v39 }
 0xc50   :  { %v2533_v28 = vsel %vm999_vm5, %v2532_v45, %v2531_v59  ;;  %v7598_v9 = vsub.f32 %v7507_v51, %v2458_v21  ;;  %v7601_v37 = vsub.f32 %v7514_v19, %v2459_v7  ;;  %v2538_v49 = vrot.slane %v2501_v18, 1 }
 0xc51   :  { %v2535_v41 = vsel %vm1001_vm6, %v2534_v46, %v2533_v28  ;;  %v7605_v36 = vsub.f32 %v7519_v0, %v2460_v55  ;;  %v7608_v24 = vsub.f32 %v7524_v1, %v2461_v20  ;;  %v2503_v61 = vmul.f32 %v7588_v12, %v7588_v12 }
 0xc52   :  { %v2537_v56 = vsel %vm1003_vm7, %v2536_v5, %v2535_v41  ;;  %v2504_v4 = vmul.f32 %v7591_v38, %v7591_v38  ;;  %v2505_v50 = vmul.f32 %v7595_v60, %v7595_v60  ;;  %v2502_v18 = vmul.f32 %v7585_v15, %v7585_v15 }
 0xc53   :  { %v2539_v6 = vsel %vm1005_vm8, %v2538_v49, %v2537_v56  ;;  %v2506_v47 = vmul.f32 %v7598_v9, %v7598_v9  ;;  %v2507_v45 = vmul.f32 %v7601_v37, %v7601_v37  ;;  %v2540_v46 = vrot.slane %v2503_v61, 7 }
 0xc54   :  { %v2556_v13 = vsel %vm795_vm11, %v2539_v6, 0.0  ;;  %v2542_v5 = vrot.slane %v2504_v4, 6  ;;  %v2508_v8 = vmul.f32 %v7605_v36, %v7605_v36  ;;  %v2509_v25 = vmul.f32 %v7608_v24, %v7608_v24  ;;  %v6286_v6 = vld [vmem:[%s9248_s5 + $0x18] sm:$0xff]  }
 0xc55   :  { %2557 = vadd.xlane.f32.xlu0 %v2556_v13  ;;  %v2541_v39 = vsel %vm993_vm2, %v2540_v46, %v2502_v18  ;;  %v2544_v21 = vrot.slane %v2505_v50, 5  ;;  %v2546_v7 = vrot.slane %v2506_v47, 4  ;;  %v2548_v20 = vrot.slane %v2507_v45, 3  ;;  %v6285_v50 = vld [vmem:[%s9248_s5 + $0x10] sm:$0xff]  }
 0xc56   :  { %v2543_v14 = vsel %vm995_vm3, %v2542_v5, %v2541_v39  ;;  %v2550_v28 = vrot.slane %v2508_v8, 2  ;;  %v2552_v49 = vrot.slane %v2509_v25, 1  ;;  %6146 = vmatpush3.bf16.msra.mxu0 %v6285_v50  ;;  %v5788_v25 = vld [vmem:[%s9249_s9 + $0x8] ss:$0 sm:$0xff] }
 0xc57   :  { %v2545_v55 = vsel %vm997_vm4, %v2544_v21, %v2543_v14  ;;  %6147 = vmatprep.subr.bf16.mxu0 %v9262_v63 }
 0xc58   :  { %v2547_v59 = vsel %vm999_vm5, %v2546_v7, %v2545_v55 }
 0xc59   :  { %v2549_v41 = vsel %vm1001_vm6, %v2548_v20, %v2547_v59 }
 0xc5a   :  { %v2551_v56 = vsel %vm1003_vm7, %v2550_v28, %v2549_v41  ;;  %6148 = vmatpush3.bf16.msra.mxu0 %v6286_v6 }
 0xc5b   :  { %v2553_v61 = vsel %vm1005_vm8, %v2552_v49, %v2551_v56  ;;  %6153 = vmatprep.subr.bf16.mxu0 %v9262_v63 }
 0xc5c   :  { %v2559_v4 = vsel %vm795_vm11, %v2553_v61, 0.0 }
 0xc5d   :  { %2560 = vadd.xlane.f32.xlu1 %v2559_v4 }
 0xce2   :  { %v2558_v18 = vpop.xlane.xlu0 %2557 }
 0xce3   :  { %v2562_v47 = vmul.f32 0.03125, %v2558_v18 }
 0xce5   :  { %v2564_v13 = vadd.f32 1e-05, %v2562_v47  ;;  %v5789_v47 = vld [vmem:[%s9249_s9 + $0x9] ss:$0 sm:$0xff] }
 0xce7   :  { %6321 = vrsqrt.f32 %v2564_v13 }
 0xcea   :  { %v2561_v45 = vpop.xlane.xlu1 %2560 }
 0xceb   :  { %v2563_v46 = vmul.f32 0.03125, %v2561_v45 }
 0xced   :  { %v2565_v5 = vadd.f32 1e-05, %v2563_v46 }
 0xcef   :  { %6323 = vrsqrt.f32 %v2565_v5 }
 0xcf1   :  { %v6322_v8 = vpop.eup %6321 }
 0xcf2   :  { %v2570_v39 = vrot.slane %v6322_v8, 1  ;;  %v2571_v21 = vrot.slane %v6322_v8, 2  ;;  %v2572_v14 = vrot.slane %v6322_v8, 3  ;;  %v2573_v7 = vrot.slane %v6322_v8, 4 }
 0xcf3   :  { %v2574_v55 = vrot.slane %v6322_v8, 5  ;;  %v2575_v20 = vrot.slane %v6322_v8, 6  ;;  %v2576_v59 = vrot.slane %v6322_v8, 7  ;;  %v2600_v28 = vmul.f32 %v6322_v8, %v7542_v16 }
 0xcf4   :  { %v2601_v41 = vmul.f32 %v2570_v39, %v7545_v57  ;;  %v2602_v49 = vmul.f32 %v2571_v21, %v7548_v44  ;;  %v2603_v56 = vmul.f32 %v2572_v14, %v7551_v52  ;;  %v2604_v61 = vmul.f32 %v2573_v7, %v7554_v62 }
 0xcf5   :  { %v2605_v4 = vmul.f32 %v2574_v55, %v7557_v32  ;;  %v2606_v50 = vmul.f32 %v2575_v20, %v7560_v48  ;;  %v2607_v6 = vmul.f32 %v2576_v59, %v7563_v10  ;;  %v2620_v18 = vmul.f32 %v5788_v25, %v2600_v28 }
 0xcf6   :  { %v2621_v16 = vmul.f32 %v5788_v25, %v2601_v41  ;;  %v2622_v13 = vmul.f32 %v5788_v25, %v2602_v49  ;;  %v2623_v57 = vmul.f32 %v5788_v25, %v2603_v56  ;;  %v2624_v45 = vmul.f32 %v5788_v25, %v2604_v61 }
 0xcf7   :  { %v2625_v44 = vmul.f32 %v5788_v25, %v2605_v4  ;;  %v2626_v46 = vmul.f32 %v5788_v25, %v2606_v50  ;;  %v2627_v52 = vmul.f32 %v5788_v25, %v2607_v6  ;;  %v2640_v5 = vadd.f32 %v5789_v47, %v2620_v18 }
 0xcf8   :  { %v2641_v62 = vadd.f32 %v5789_v47, %v2621_v16  ;;  %v2642_v8 = vadd.f32 %v5789_v47, %v2622_v13  ;;  %v2643_v39 = vadd.f32 %v5789_v47, %v2623_v57  ;;  %v2644_v48 = vadd.f32 %v5789_v47, %v2624_v45 }
 0xcf9   :  { %v6324_v32 = vpop.eup %6323  ;;  %v2645_v21 = vadd.f32 %v5789_v47, %v2625_v44  ;;  %v2646_v10 = vadd.f32 %v5789_v47, %v2626_v46 }
 0xcfa   :  { %v2577_v14 = vrot.slane %v6324_v32, 1  ;;  %v2578_v7 = vrot.slane %v6324_v32, 2  ;;  %v2579_v55 = vrot.slane %v6324_v32, 3  ;;  %v2580_v20 = vrot.slane %v6324_v32, 4 }
 0xcfb   :  { %v2581_v59 = vrot.slane %v6324_v32, 5  ;;  %v2582_v28 = vrot.slane %v6324_v32, 6  ;;  %v2583_v41 = vrot.slane %v6324_v32, 7  ;;  %v2608_v49 = vmul.f32 %v6324_v32, %v7585_v15 }
 0xcfc   :  { %v2609_v56 = vmul.f32 %v2577_v14, %v7588_v12  ;;  %v2610_v61 = vmul.f32 %v2578_v7, %v7591_v38  ;;  %v2611_v4 = vmul.f32 %v2579_v55, %v7595_v60  ;;  %v2612_v50 = vmul.f32 %v2580_v20, %v7598_v9 }
 0xcfd   :  { %v2613_v6 = vmul.f32 %v2581_v59, %v7601_v37  ;;  %v2614_v18 = vmul.f32 %v2582_v28, %v7605_v36  ;;  %v2615_v16 = vmul.f32 %v2583_v41, %v7608_v24  ;;  %v2628_v13 = vmul.f32 %v5788_v25, %v2608_v49 }
 0xcfe   :  { %v2629_v57 = vmul.f32 %v5788_v25, %v2609_v56  ;;  %v2630_v45 = vmul.f32 %v5788_v25, %v2610_v61  ;;  %v2631_v44 = vmul.f32 %v5788_v25, %v2611_v4  ;;  %v2632_v46 = vmul.f32 %v5788_v25, %v2612_v50 }
 0xcff   :  { %v2633_v15 = vmul.f32 %v5788_v25, %v2613_v6  ;;  %v2634_v32 = vmul.f32 %v5788_v25, %v2614_v18  ;;  %v2635_v12 = vmul.f32 %v5788_v25, %v2615_v16  ;;  %v2647_v14 = vadd.f32 %v5789_v47, %v2627_v52 }
 0xd00   :  { %v2649_v38 = vadd.f32 %v5789_v47, %v2629_v57  ;;  %v2650_v7 = vadd.f32 %v5789_v47, %v2630_v45  ;;  %v2651_v60 = vadd.f32 %v5789_v47, %v2631_v44  ;;  %v2657_v55 = vpack.c.bf16 %v2641_v62, %v2641_v62 }
 0xd01   :  { %v2648_v9 = vadd.f32 %v5789_v47, %v2628_v13  ;;  %v2652_v20 = vadd.f32 %v5789_v47, %v2632_v46  ;;  %v2653_v37 = vadd.f32 %v5789_v47, %v2633_v15  ;;  %v2658_v59 = vpack.c.bf16 %v2642_v8, %v2642_v8 }
 0xd02   :  { %v2654_v36 = vadd.f32 %v5789_v47, %v2634_v32  ;;  %v2655_v28 = vadd.f32 %v5789_v47, %v2635_v12  ;;  %v2659_v24 = vpack.c.bf16 %v2643_v39, %v2643_v39  ;;  %v2665_v41 = vpack.c.bf16 %v2649_v38, %v2649_v38 }
 0xd03   :  { %v2656_v49 = vpack.c.bf16 %v2640_v5, %v2640_v5  ;;  %v2660_v56 = vpack.c.bf16 %v2644_v48, %v2644_v48  ;;  %v2661_v61 = vpack.c.bf16 %v2645_v21, %v2645_v21  ;;  %v2666_v4 = vpack.c.bf16 %v2650_v7, %v2650_v7 }
 0xd04   :  { %v2662_v50 = vpack.c.bf16 %v2646_v10, %v2646_v10  ;;  %v2663_v6 = vpack.c.bf16 %v2647_v14, %v2647_v14  ;;  %v2667_v25 = vpack.c.bf16 %v2651_v60, %v2651_v60  ;;  %v2694_v52 = vunpack.c.l.b16 %v2657_v55 }
 0xd05   :  { %v2664_v18 = vpack.c.bf16 %v2648_v9, %v2648_v9  ;;  %v2668_v16 = vpack.c.bf16 %v2652_v20, %v2652_v20  ;;  %v2669_v57 = vpack.c.bf16 %v2653_v37, %v2653_v37  ;;  %v2695_v62 = vunpack.c.l.b16 %v2658_v59 }
 0xd06   :  { %v2670_v13 = vpack.c.bf16 %v2654_v36, %v2654_v36  ;;  %v2671_v45 = vpack.c.bf16 %v2655_v28, %v2655_v28  ;;  %v2696_v44 = vunpack.c.l.b16 %v2659_v24  ;;  %v2702_v8 = vunpack.c.l.b16 %v2665_v41 }
 0xd07   :  { %v2693_v46 = vunpack.c.l.b16 %v2656_v49  ;;  %v2697_v47 = vunpack.c.l.b16 %v2660_v56  ;;  %v2698_v39 = vunpack.c.l.b16 %v2661_v61  ;;  %v2703_v15 = vunpack.c.l.b16 %v2666_v4 }
 0xd08   :  { %v2699_v5 = vunpack.c.l.b16 %v2662_v50  ;;  %v2704_v48 = vunpack.c.l.b16 %v2667_v25  ;;  %v2709_v21 = vrot.slane %v2694_v52, 7  ;;  %v2711_v32 = vrot.slane %v2695_v62, 6 }
 0xd09   :  { %v2700_v10 = vunpack.c.l.b16 %v2663_v6  ;;  %v2701_v12 = vunpack.c.l.b16 %v2664_v18  ;;  %v2705_v14 = vunpack.c.l.b16 %v2668_v16  ;;  %v2706_v38 = vunpack.c.l.b16 %v2669_v57 }
 0xd0a   :  { %v2710_v7 = vsel %vm993_vm2, %v2709_v21, %v2693_v46  ;;  %v2713_v60 = vrot.slane %v2696_v44, 5  ;;  %v2723_v55 = vrot.slane %v2702_v8, 7  ;;  %v2725_v9 = vrot.slane %v2703_v15, 6 }
 0xd0b   :  { %v2707_v20 = vunpack.c.l.b16 %v2670_v13  ;;  %v2708_v37 = vunpack.c.l.b16 %v2671_v45  ;;  %v2712_v59 = vsel %vm995_vm3, %v2711_v32, %v2710_v7  ;;  %v2715_v36 = vrot.slane %v2697_v47, 4 }
 0xd0c   :  { %v2714_v28 = vsel %vm997_vm4, %v2713_v60, %v2712_v59  ;;  %v2717_v24 = vrot.slane %v2698_v39, 3  ;;  %v2724_v41 = vsel %vm993_vm2, %v2723_v55, %v2701_v12  ;;  %v2727_v49 = vrot.slane %v2704_v48, 5 }
 0xd0d   :  { %v2716_v56 = vsel %vm999_vm5, %v2715_v36, %v2714_v28  ;;  %v2719_v61 = vrot.slane %v2699_v5, 2  ;;  %v2726_v4 = vsel %vm995_vm3, %v2725_v9, %v2724_v41  ;;  %v2729_v50 = vrot.slane %v2705_v14, 4 }
 0xd0e   :  { %v2718_v6 = vsel %vm1001_vm6, %v2717_v24, %v2716_v56  ;;  %v2728_v25 = vsel %vm997_vm4, %v2727_v49, %v2726_v4  ;;  %v2731_v52 = vrot.slane %v2706_v38, 3  ;;  %v2733_v57 = vrot.slane %v2707_v20, 2 }
 0xd0f   :  { %v2720_v18 = vsel %vm1003_vm7, %v2719_v61, %v2718_v6  ;;  %v2730_v16 = vsel %vm999_vm5, %v2729_v50, %v2728_v25  ;;  %v2721_v62 = vrot.slane %v2700_v10, 1  ;;  %v2735_v45 = vrot.slane %v2708_v37, 1 }
 0xd10   :  { %v2732_v13 = vsel %vm1001_vm6, %v2731_v52, %v2730_v16 }
 0xd11   :  { %v2734_v44 = vsel %vm1003_vm7, %v2733_v57, %v2732_v13  ;;  %v2722_v8 = vsel %vm1005_vm8, %v2721_v62, %v2720_v18 }
 0xd12   :  { %v2736_v46 = vsel %vm1005_vm8, %v2735_v45, %v2734_v44 }
 0xd13   :  { %v2737_v47 = vpack.c.b16 %v2736_v46, %v2722_v8 }
 0xd15   :  { %6150 = vmatmul.mubr.msk.bf16.vlgmr.msra.gmra.mrb[56].mxu0 %vm795_vm11, %v2737_v47 }
 0xd16   :  { %6155 = vmatprep.mubr.msk.bf16.mxu0 %vm6362_vm9, %v9262_v63 }
 0xde8   :  { %v2787_v39 = vpop.f32.mrb[56].mxu0 }
 0xde9   :  { %v2794_v15 = vpack.c.bf16 %v2787_v39, %v2787_v39  ;;  %v6151_v5 = vpop.f32.mrb[57].mxu0 }
 0xdea   :  { %v2790_v48 = vpop.f32.mrb[58].mxu0 }
 0xdeb   :  { %v2795_v21 = vpack.c.bf16 %v2790_v48, %v2790_v48  ;;  %2797 = vrot.lane.b32.xlu0 %v2794_v15, %s6363_s16  ;;  %v6152_v32 = vpop.f32.mrb[59].mxu0 }
 0xded   :  { %2846 = vrot.lane.b32.xlu1 %v2795_v21, %s6363_s16 }
 0xe5d   :  { %v2798_v10 = vpop.permute.xlu0 %2797 }
 0xe5e   :  { %v2803_v12 = vsel %vm795_vm11, %v2798_v10, 0  ;;  %v6288_v10 = vld [vmem:[%s9250_s6 + $0x18] sm:$0xff]  }
 0xe5f   :  { %6154 = vmatpush3.bf16.xpose.msra.mxu0 %v2803_v12  ;;  %v2847_v14 = vpop.permute.xlu1 %2846 }
 0xe60   :  { %v2852_v38 = vsel %vm795_vm11, %v2847_v14, 0  ;;  %6165 = vmatprep.subr.bf16.mxu0 %v9262_v63 }
 0xe61   :  { %6160 = vmatpush3.bf16.xpose.msra.mxu1 %v2852_v38 }
 0xe62   :  { %6171 = vmatprep.subr.bf16.mxu1 %v9262_v63 }
 0xe66   :  { %6156 = vmatmul.mubr.msk.bf16.vlgmr.msra.gmra.mrb[60].mxu0 %vm795_vm11, %v2794_v15 }
 0xe67   :  { %6167 = vmatprep.mubr.msk.bf16.mxu0 %vm6362_vm9, %v9262_v63 }
 0xe68   :  { %6162 = vmatmul.mubr.msk.bf16.vlgmr.msra.gmra.mrb[44].mxu1 %vm795_vm11, %v2795_v21 }
 0xe69   :  { %6173 = vmatprep.mubr.msk.bf16.mxu1 %vm6362_vm9, %v9262_v63 }
 0xf39   :  { %v2839_v7 = vpop.f32.mrb[60].mxu0 }
 0xf3a   :  { %v2894_v60 = vmul.f32 0.17677669, %v2839_v7  ;;  %v6157_v55 = vpop.f32.mrb[61].mxu0 }
 0xf3b   :  { %v2842_v9 = vpop.f32.mrb[62].mxu0  ;;  %v2888_v20 = vpop.f32.mrb[44].mxu1 }
 0xf3c   :  { %v2895_v37 = vmul.f32 0.17677669, %v2888_v20  ;;  %v6158_v59 = vpop.f32.mrb[63].mxu0  ;;  %v6163_v36 = vpop.f32.mrb[45].mxu1  ;;  %v2896_v28 = vsel %vm73_vm1, %v2894_v60, -inf }
 0xf3d   :  { %v2891_v24 = vpop.f32.mrb[46].mxu1  ;;  %2897 = vmax.xlane.f32.xlu1 %v2896_v28 }
 0xf3e   :  { %v6164_v41 = vpop.f32.mrb[47].mxu1  ;;  %v2899_v49 = vsel %vm73_vm1, %v2895_v37, -inf }
 0xf3f   :  { %2900 = vmax.xlane.f32.xlu0 %v2899_v49 }
 0xfca   :  { %v2898_v56 = vpop.xlane.xlu1 %2897 }
 0xfcb   :  { %v2902_v61 = vsub.f32 %v2894_v60, %v2898_v56 }
 0xfcc   :  { %v2901_v4 = vpop.xlane.xlu0 %2900 }
 0xfcd   :  { %v2904_v50 = vmul.f32 1.442695, %v2902_v61  ;;  %v2903_v6 = vsub.f32 %v2895_v37, %v2901_v4 }
 0xfcf   :  { %6325 = vpow2.f32 %v2904_v50  ;;  %v2906_v25 = vmul.f32 1.442695, %v2903_v6 }
 0xfd1   :  { %6327 = vpow2.f32 %v2906_v25 }
 0xfd9   :  { %v6326_v52 = vpop.eup %6325 }
 0xfda   :  { %v2908_v18 = vsel %vm73_vm1, %v6326_v52, 0.0 }
 0xfdb   :  { %v6328_v16 = vpop.eup %6327  ;;  %2909 = vadd.xlane.f32.xlu0 %v2908_v18 }
 0xfdc   :  { %v2911_v57 = vsel %vm73_vm1, %v6328_v16, 0.0 }
 0xfdd   :  { %2912 = vadd.xlane.f32.xlu1 %v2911_v57 }
 0xfee   :  { %2968 = vrot.lane.b32.xlu1 %v2795_v21, %s6364_s17 }
 0xff1   :  { %2920 = vrot.lane.b32.xlu0 %v2794_v15, %s6364_s17  ;;  %v6287_v15 = vld [vmem:[%s9250_s6 + $0x10] sm:$0xff]  }
0x1068   :  { %v2910_v62 = vpop.xlane.xlu0 %2909 }
0x1069   :  { %6329 = vrcp.f32 %v2910_v62 }
0x106a   :  { %v2913_v13 = vpop.xlane.xlu1 %2912 }
0x106b   :  { %6331 = vrcp.f32 %v2913_v13 }
0x106c   :  { %v2921_v45 = vpop.permute.xlu0 %2920 }
0x106d   :  { %v2926_v44 = vsel %vm336_vm0, %v2921_v45, 0 }
0x106e   :  { %6166 = vmatpush3.bf16.msra.mxu0 %v2926_v44  ;;  %v2969_v8 = vpop.permute.xlu1 %2968 }
0x106f   :  { %v2974_v46 = vsel %vm336_vm0, %v2969_v8, 0  ;;  %6177 = vmatprep.subr.bf16.mxu0 %v9262_v63 }
0x1070   :  { %6172 = vmatpush3.bf16.msra.mxu1 %v2974_v46 }
0x1071   :  { %6185 = vmatprep.subr.bf16.mxu1 %v9262_v63 }
0x1073   :  { %v6330_v47 = vpop.eup %6329 }
0x1074   :  { %v2916_v39 = vmul.f32 %v6330_v47, %v6326_v52 }
0x1075   :  { %v6332_v5 = vpop.eup %6331 }
0x1076   :  { %v2917_v48 = vmul.f32 %v6332_v5, %v6328_v16  ;;  %v2918_v21 = vpack.c.bf16 %v2916_v39, %v2916_v39 }
0x1078   :  { %6168 = vmatmul.mubr.msk.bf16.vlgmr.msra.gmra.mrb[64].mxu0 %vm73_vm1, %v2918_v21  ;;  %v2919_v32 = vpack.c.bf16 %v2917_v48, %v2917_v48 }
0x1079   :  { %6178 = vmatpush3.bf16.msra.mxu0 %v6287_v15  ;;  %6181 = vmatprep.mubr.msk.bf16.mxu0 %vm6362_vm9, %v9262_v63 }
0x107a   :  { %6174 = vmatmul.mubr.msk.bf16.vlgmr.msra.gmra.mrb[48].mxu1 %vm73_vm1, %v2919_v32  ;;  %6179 = vmatprep.subr.bf16.mxu0 %v9262_v63 }
0x107b   :  { %6189 = vmatprep.mubr.msk.bf16.mxu1 %vm6362_vm9, %v9262_v63 }
0x107d   :  { %6180 = vmatpush3.bf16.msra.mxu0 %v6288_v10 }
0x107e   :  { %6193 = vmatprep.subr.bf16.mxu0 %v9262_v63 }
0x114b   :  { %v2962_v12 = vpop.f32.mrb[64].mxu0 }
0x114c   :  { %v6169_v14 = vpop.f32.mrb[65].mxu0 }
0x114d   :  { %v2965_v38 = vpop.f32.mrb[66].mxu0  ;;  %v3010_v7 = vpop.f32.mrb[48].mxu1 }
0x114e   :  { %v3016_v60 = vpack.c.bf16 %v3010_v7, %v2962_v12  ;;  %v6170_v55 = vpop.f32.mrb[67].mxu0  ;;  %v6175_v9 = vpop.f32.mrb[49].mxu1 }
0x114f   :  { %v3013_v20 = vpop.f32.mrb[50].mxu1 }
0x1150   :  { %v6176_v37 = vpop.f32.mrb[51].mxu1  ;;  %6182 = vmatmul.mubr.msk.bf16.vlgmr.msra.gmra.mrb[68].mxu0 %vm795_vm11, %v3016_v60 }
0x1151   :  { %6201 = vmatprep.mubr.msk.bf16.mxu0 %vm6362_vm9, %v9262_v63 }
0x1223   :  { %v3071_v59 = vpop.f32.mrb[68].mxu0 }
0x1224   :  { %v3080_v36 = vrot.slane %v3071_v59, 1  ;;  %v3081_v28 = vrot.slane %v3071_v59, 2  ;;  %v3082_v24 = vrot.slane %v3071_v59, 3  ;;  %v6183_v41 = vpop.f32.mrb[69].mxu0  ;;  %v3083_v49 = vrot.slane %v3071_v59, 4 }
0x1225   :  { %v3074_v56 = vpop.f32.mrb[70].mxu0  ;;  %v3084_v61 = vrot.slane %v3071_v59, 5  ;;  %v3085_v4 = vrot.slane %v3071_v59, 6  ;;  %v3086_v50 = vrot.slane %v3071_v59, 7  ;;  %v7727_v18 = vadd.f32 %v3071_v59, %v7480_v33 }
0x1226   :  { %v7724_v6 = vadd.f32 %v3080_v36, %v7462_v54  ;;  %v3087_v25 = vrot.slane %v3074_v56, 1  ;;  %v6184_v52 = vpop.f32.mrb[71].mxu0  ;;  %v7730_v16 = vadd.f32 %v3081_v28, %v7465_v58  ;;  %v7733_v57 = vadd.f32 %v3082_v24, %v7468_v29 }
0x1227   :  { %v7736_v62 = vadd.f32 %v3083_v49, %v7471_v26  ;;  %v7739_v13 = vadd.f32 %v3084_v61, %v7474_v2  ;;  %v3088_v45 = vrot.slane %v3074_v56, 2  ;;  %v3089_v54 = vrot.slane %v3074_v56, 3 }
0x1228   :  { %v7742_v44 = vadd.f32 %v3085_v4, %v7477_v35  ;;  %v3142_v33 = vrot.slane %v7724_v6, 7  ;;  %v7746_v8 = vadd.f32 %v3087_v25, %v7496_v30  ;;  %v7749_v58 = vadd.f32 %v3086_v50, %v7485_v3 }
0x1229   :  { %v3144_v29 = vrot.slane %v7730_v16, 6  ;;  %v3146_v26 = vrot.slane %v7733_v57, 5  ;;  %v3148_v46 = vrot.slane %v7736_v62, 4  ;;  %v3150_v35 = vrot.slane %v7739_v13, 3 }
0x122a   :  { %v3143_v2 = vsel %vm993_vm2, %v3142_v33, %v7727_v18  ;;  %v3090_v47 = vrot.slane %v3074_v56, 4  ;;  %v3152_v30 = vrot.slane %v7742_v44, 2  ;;  %v3091_v5 = vrot.slane %v3074_v56, 5 }
0x122b   :  { %v3145_v39 = vsel %vm995_vm3, %v3144_v29, %v3143_v2  ;;  %v3092_v15 = vrot.slane %v3074_v56, 6  ;;  %v3093_v48 = vrot.slane %v3074_v56, 7  ;;  %v7761_v21 = vadd.f32 %v3088_v45, %v7499_v31 }
0x122c   :  { %v3147_v3 = vsel %vm997_vm4, %v3146_v26, %v3145_v39  ;;  %v7764_v32 = vadd.f32 %v3089_v54, %v7504_v11  ;;  %v3154_v12 = vrot.slane %v7749_v58, 1  ;;  %v7769_v14 = vadd.f32 %v3074_v56, %v7511_v23 }
0x122d   :  { %v3149_v10 = vsel %vm999_vm5, %v3148_v46, %v3147_v3  ;;  %v7772_v38 = vadd.f32 %v3090_v47, %v7507_v51  ;;  %v7776_v60 = vadd.f32 %v3091_v5, %v7514_v19  ;;  %v3156_v31 = vrot.slane %v7746_v8, 7 }
0x122e   :  { %v3151_v7 = vsel %vm1001_vm6, %v3150_v35, %v3149_v10  ;;  %v3158_v11 = vrot.slane %v7761_v21, 6  ;;  %v7782_v9 = vadd.f32 %v3092_v15, %v7519_v0  ;;  %v7786_v20 = vadd.f32 %v3093_v48, %v7524_v1 }
0x122f   :  { %v3153_v55 = vsel %vm1003_vm7, %v3152_v30, %v3151_v7  ;;  %v3157_v51 = vsel %vm993_vm2, %v3156_v31, %v7769_v14  ;;  %v3160_v19 = vrot.slane %v7764_v32, 5  ;;  %v3162_v36 = vrot.slane %v7772_v38, 4 }
0x1230   :  { %v3155_v23 = vsel %vm1005_vm8, %v3154_v12, %v3153_v55  ;;  %v3159_v59 = vsel %vm995_vm3, %v3158_v11, %v3157_v51  ;;  %v3164_v28 = vrot.slane %v7776_v60, 3  ;;  %v3166_v1 = vrot.slane %v7782_v9, 2 }
0x1231   :  { %v3172_v37 = vsel %vm795_vm11, %v3155_v23, 0.0  ;;  %v3161_v0 = vsel %vm997_vm4, %v3160_v19, %v3159_v59  ;;  %v3168_v49 = vrot.slane %v7786_v20, 1 }
0x1232   :  { %3173 = vadd.xlane.f32.xlu1 %v3172_v37  ;;  %v3163_v24 = vsel %vm999_vm5, %v3162_v36, %v3161_v0 }
0x1233   :  { %v3165_v41 = vsel %vm1001_vm6, %v3164_v28, %v3163_v24 }
0x1234   :  { %v3167_v56 = vsel %vm1003_vm7, %v3166_v1, %v3165_v41 }
0x1235   :  { %v3169_v61 = vsel %vm1005_vm8, %v3168_v49, %v3167_v56 }
0x1236   :  { %v3175_v4 = vsel %vm795_vm11, %v3169_v61, 0.0 }
0x1237   :  { %3176 = vadd.xlane.f32.xlu0 %v3175_v4 }
0x12bf   :  { %v3174_v50 = vpop.xlane.xlu1 %3173 }
0x12c0   :  { %v3178_v25 = vmul.f32 0.03125, %v3174_v50 }
0x12c2   :  { %v3182_v52 = vrot.slane %v3178_v25, 1  ;;  %v3183_v45 = vrot.slane %v3178_v25, 2  ;;  %v3184_v54 = vrot.slane %v3178_v25, 3  ;;  %v3185_v33 = vrot.slane %v3178_v25, 4 }
0x12c3   :  { %v3186_v29 = vrot.slane %v3178_v25, 5  ;;  %v3187_v26 = vrot.slane %v3178_v25, 6  ;;  %v3188_v2 = vrot.slane %v3178_v25, 7  ;;  %v7804_v46 = vsub.f32 %v7727_v18, %v3178_v25 }
0x12c4   :  { %v7807_v35 = vsub.f32 %v7724_v6, %v3182_v52  ;;  %v7810_v47 = vsub.f32 %v7730_v16, %v3183_v45  ;;  %v7813_v39 = vsub.f32 %v7733_v57, %v3184_v54  ;;  %v7816_v30 = vsub.f32 %v7736_v62, %v3185_v33  ;;  %v3177_v5 = vpop.xlane.xlu0 %3176 }
0x12c5   :  { %v7819_v15 = vsub.f32 %v7739_v13, %v3186_v29  ;;  %v7822_v3 = vsub.f32 %v7742_v44, %v3187_v26  ;;  %v7825_v48 = vsub.f32 %v7749_v58, %v3188_v2  ;;  %v3179_v10 = vmul.f32 0.03125, %v3177_v5 }
0x12c6   :  { %v3229_v12 = vmul.f32 %v7807_v35, %v7807_v35  ;;  %v3230_v7 = vmul.f32 %v7810_v47, %v7810_v47  ;;  %v3231_v31 = vmul.f32 %v7813_v39, %v7813_v39  ;;  %v3228_v11 = vmul.f32 %v7804_v46, %v7804_v46 }
0x12c7   :  { %v3232_v55 = vmul.f32 %v7816_v30, %v7816_v30  ;;  %v3233_v23 = vmul.f32 %v7819_v15, %v7819_v15  ;;  %v3234_v51 = vmul.f32 %v7822_v3, %v7822_v3  ;;  %v3235_v19 = vmul.f32 %v7825_v48, %v7825_v48 }
0x12c8   :  { %v3260_v37 = vrot.slane %v3229_v12, 7  ;;  %v3262_v59 = vrot.slane %v3230_v7, 6  ;;  %v3189_v36 = vrot.slane %v3179_v10, 1  ;;  %v3264_v0 = vrot.slane %v3231_v31, 5 }
0x12c9   :  { %v3266_v28 = vrot.slane %v3232_v55, 4  ;;  %v3268_v24 = vrot.slane %v3233_v23, 3  ;;  %v3270_v1 = vrot.slane %v3234_v51, 2  ;;  %v3190_v49 = vrot.slane %v3179_v10, 2 }
0x12ca   :  { %v3261_v41 = vsel %vm993_vm2, %v3260_v37, %v3228_v11  ;;  %v3191_v56 = vrot.slane %v3179_v10, 3  ;;  %v3192_v61 = vrot.slane %v3179_v10, 4  ;;  %v3193_v50 = vrot.slane %v3179_v10, 5 }
0x12cb   :  { %v3263_v4 = vsel %vm995_vm3, %v3262_v59, %v3261_v41  ;;  %v3194_v25 = vrot.slane %v3179_v10, 6  ;;  %v3195_v52 = vrot.slane %v3179_v10, 7  ;;  %v7847_v54 = vsub.f32 %v7769_v14, %v3179_v10 }
0x12cc   :  { %v3265_v45 = vsel %vm997_vm4, %v3264_v0, %v3263_v4  ;;  %v7850_v33 = vsub.f32 %v7746_v8, %v3189_v36  ;;  %v7853_v29 = vsub.f32 %v7761_v21, %v3190_v49  ;;  %v7857_v2 = vsub.f32 %v7764_v32, %v3191_v56 }
0x12cd   :  { %v3267_v26 = vsel %vm999_vm5, %v3266_v28, %v3265_v45  ;;  %v7860_v5 = vsub.f32 %v7772_v38, %v3192_v61  ;;  %v7863_v12 = vsub.f32 %v7776_v60, %v3193_v50  ;;  %v3272_v7 = vrot.slane %v3235_v19, 1 }
0x12ce   :  { %v3269_v10 = vsel %vm1001_vm6, %v3268_v24, %v3267_v26  ;;  %v7867_v31 = vsub.f32 %v7782_v9, %v3194_v25  ;;  %v7870_v11 = vsub.f32 %v7786_v20, %v3195_v52  ;;  %v3237_v23 = vmul.f32 %v7850_v33, %v7850_v33 }
0x12cf   :  { %v3271_v55 = vsel %vm1003_vm7, %v3270_v1, %v3269_v10  ;;  %v3238_v51 = vmul.f32 %v7853_v29, %v7853_v29  ;;  %v3239_v37 = vmul.f32 %v7857_v2, %v7857_v2  ;;  %v3236_v19 = vmul.f32 %v7847_v54, %v7847_v54 }
0x12d0   :  { %v3273_v59 = vsel %vm1005_vm8, %v3272_v7, %v3271_v55  ;;  %v3240_v36 = vmul.f32 %v7860_v5, %v7860_v5  ;;  %v3241_v28 = vmul.f32 %v7863_v12, %v7863_v12  ;;  %v3274_v24 = vrot.slane %v3237_v23, 7 }
0x12d1   :  { %v3290_v0 = vsel %vm795_vm11, %v3273_v59, 0.0  ;;  %v3276_v1 = vrot.slane %v3238_v51, 6  ;;  %v3242_v41 = vmul.f32 %v7867_v31, %v7867_v31  ;;  %v3243_v49 = vmul.f32 %v7870_v11, %v7870_v11  ;;  %v6290_v59 = vld [vmem:[%s9251_s7 + $0x18] sm:$0xff]  }
0x12d2   :  { %3291 = vadd.xlane.f32.xlu0 %v3290_v0  ;;  %v3275_v56 = vsel %vm993_vm2, %v3274_v24, %v3236_v19  ;;  %v3278_v61 = vrot.slane %v3239_v37, 5  ;;  %v3280_v50 = vrot.slane %v3240_v36, 4  ;;  %v3282_v52 = vrot.slane %v3241_v28, 3  ;;  %v6289_v37 = vld [vmem:[%s9251_s7 + $0x10] sm:$0xff]   ;;  %v6291_v19 = vld [vmem:[%s9252_s8 + $0x20] sm:$0xff]   ;;  %v6292_v36 = vld [vmem:[%s9252_s8 + $0x28] sm:$0xff]  }
0x12d3   :  { %v3277_v4 = vsel %vm995_vm3, %v3276_v1, %v3275_v56  ;;  %v3284_v26 = vrot.slane %v3242_v41, 2  ;;  %v3286_v7 = vrot.slane %v3243_v49, 1  ;;  %6186 = vmatpush3.bf16.msra.mxu1 %v6289_v37  ;;  %6194 = vmatpush3.bf16.msra.mxu0 %v6291_v19 }
0x12d4   :  { %v3279_v25 = vsel %vm997_vm4, %v3278_v61, %v3277_v4  ;;  %6187 = vmatprep.subr.bf16.mxu1 %v9262_v63  ;;  %6195 = vmatprep.subr.bf16.mxu0 %v9262_v63  ;;  %v5808_v61 = vld [vmem:[%s9249_s9 + $0xa] ss:$0 sm:$0xff] }
0x12d5   :  { %v3281_v45 = vsel %vm999_vm5, %v3280_v50, %v3279_v25 }
0x12d6   :  { %v3283_v10 = vsel %vm1001_vm6, %v3282_v52, %v3281_v45 }
0x12d7   :  { %v3285_v55 = vsel %vm1003_vm7, %v3284_v26, %v3283_v10  ;;  %6188 = vmatpush3.bf16.msra.mxu1 %v6290_v59  ;;  %6196 = vmatpush3.bf16.msra.mxu0 %v6292_v36 }
0x12d8   :  { %v3287_v23 = vsel %vm1005_vm8, %v3286_v7, %v3285_v55  ;;  %6205 = vmatprep.subr.bf16.mxu1 %v9262_v63  ;;  %6197 = vmatprep.subr.bf16.mxu0 %v9262_v63 }
0x12d9   :  { %v3293_v51 = vsel %vm795_vm11, %v3287_v23, 0.0 }
0x12da   :  { %3294 = vadd.xlane.f32.xlu1 %v3293_v51 }
0x135f   :  { %v3292_v0 = vpop.xlane.xlu0 %3291 }
0x1360   :  { %v3296_v28 = vmul.f32 0.03125, %v3292_v0 }
0x1362   :  { %v3298_v24 = vadd.f32 1e-05, %v3296_v28  ;;  %v5809_v28 = vld [vmem:[%s9249_s9 + $0xb] ss:$0 sm:$0xff] }
0x1364   :  { %6333 = vrsqrt.f32 %v3298_v24 }
0x1367   :  { %v3295_v1 = vpop.xlane.xlu1 %3294 }
0x1368   :  { %v3297_v41 = vmul.f32 0.03125, %v3295_v1 }
0x136a   :  { %v3299_v49 = vadd.f32 1e-05, %v3297_v41 }
0x136c   :  { %6335 = vrsqrt.f32 %v3299_v49 }
0x136e   :  { %v6334_v56 = vpop.eup %6333 }
0x136f   :  { %v3304_v4 = vrot.slane %v6334_v56, 1  ;;  %v3305_v50 = vrot.slane %v6334_v56, 2  ;;  %v3306_v25 = vrot.slane %v6334_v56, 3  ;;  %v3307_v52 = vrot.slane %v6334_v56, 4 }
0x1370   :  { %v3308_v45 = vrot.slane %v6334_v56, 5  ;;  %v3309_v26 = vrot.slane %v6334_v56, 6  ;;  %v3310_v10 = vrot.slane %v6334_v56, 7  ;;  %v3334_v7 = vmul.f32 %v6334_v56, %v7804_v46 }
0x1371   :  { %v3335_v55 = vmul.f32 %v3304_v4, %v7807_v35  ;;  %v3336_v23 = vmul.f32 %v3305_v50, %v7810_v47  ;;  %v3337_v51 = vmul.f32 %v3306_v25, %v7813_v39  ;;  %v3338_v37 = vmul.f32 %v3307_v52, %v7816_v30 }
0x1372   :  { %v3339_v59 = vmul.f32 %v3308_v45, %v7819_v15  ;;  %v3340_v19 = vmul.f32 %v3309_v26, %v7822_v3  ;;  %v3341_v36 = vmul.f32 %v3310_v10, %v7825_v48  ;;  %v3354_v0 = vmul.f32 %v5808_v61, %v3334_v7 }
0x1373   :  { %v3355_v46 = vmul.f32 %v5808_v61, %v3335_v55  ;;  %v3356_v24 = vmul.f32 %v5808_v61, %v3336_v23  ;;  %v3357_v35 = vmul.f32 %v5808_v61, %v3337_v51  ;;  %v3358_v1 = vmul.f32 %v5808_v61, %v3338_v37 }
0x1374   :  { %v3359_v47 = vmul.f32 %v5808_v61, %v3339_v59  ;;  %v3360_v41 = vmul.f32 %v5808_v61, %v3340_v19  ;;  %v3361_v39 = vmul.f32 %v5808_v61, %v3341_v36  ;;  %v3374_v49 = vadd.f32 %v5809_v28, %v3354_v0 }
0x1375   :  { %v3375_v30 = vadd.f32 %v5809_v28, %v3355_v46  ;;  %v3376_v56 = vadd.f32 %v5809_v28, %v3356_v24  ;;  %v3377_v4 = vadd.f32 %v5809_v28, %v3357_v35  ;;  %v3378_v3 = vadd.f32 %v5809_v28, %v3358_v1 }
0x1376   :  { %v6336_v15 = vpop.eup %6335  ;;  %v3379_v50 = vadd.f32 %v5809_v28, %v3359_v47  ;;  %v3380_v48 = vadd.f32 %v5809_v28, %v3360_v41 }
0x1377   :  { %v3311_v25 = vrot.slane %v6336_v15, 1  ;;  %v3312_v52 = vrot.slane %v6336_v15, 2  ;;  %v3313_v45 = vrot.slane %v6336_v15, 3  ;;  %v3314_v26 = vrot.slane %v6336_v15, 4 }
0x1378   :  { %v3315_v10 = vrot.slane %v6336_v15, 5  ;;  %v3316_v7 = vrot.slane %v6336_v15, 6  ;;  %v3317_v55 = vrot.slane %v6336_v15, 7  ;;  %v3342_v23 = vmul.f32 %v6336_v15, %v7847_v54 }
0x1379   :  { %v3343_v51 = vmul.f32 %v3311_v25, %v7850_v33  ;;  %v3344_v37 = vmul.f32 %v3312_v52, %v7853_v29  ;;  %v3345_v59 = vmul.f32 %v3313_v45, %v7857_v2  ;;  %v3346_v19 = vmul.f32 %v3314_v26, %v7860_v5 }
0x137a   :  { %v3347_v36 = vmul.f32 %v3315_v10, %v7863_v12  ;;  %v3348_v0 = vmul.f32 %v3316_v7, %v7867_v31  ;;  %v3349_v46 = vmul.f32 %v3317_v55, %v7870_v11  ;;  %v3362_v24 = vmul.f32 %v5808_v61, %v3342_v23 }
0x137b   :  { %v3363_v35 = vmul.f32 %v5808_v61, %v3343_v51  ;;  %v3364_v1 = vmul.f32 %v5808_v61, %v3344_v37  ;;  %v3365_v47 = vmul.f32 %v5808_v61, %v3345_v59  ;;  %v3366_v41 = vmul.f32 %v5808_v61, %v3346_v19 }
0x137c   :  { %v3367_v54 = vmul.f32 %v5808_v61, %v3347_v36  ;;  %v3368_v15 = vmul.f32 %v5808_v61, %v3348_v0  ;;  %v3369_v33 = vmul.f32 %v5808_v61, %v3349_v46  ;;  %v3381_v25 = vadd.f32 %v5809_v28, %v3361_v39 }
0x137d   :  { %v3383_v29 = vadd.f32 %v5809_v28, %v3363_v35  ;;  %v3384_v52 = vadd.f32 %v5809_v28, %v3364_v1  ;;  %v3385_v2 = vadd.f32 %v5809_v28, %v3365_v47  ;;  %v3391_v45 = vpack.c.bf16 %v3375_v30, %v3375_v30 }
0x137e   :  { %v3382_v5 = vadd.f32 %v5809_v28, %v3362_v24  ;;  %v3386_v26 = vadd.f32 %v5809_v28, %v3366_v41  ;;  %v3387_v12 = vadd.f32 %v5809_v28, %v3367_v54  ;;  %v3392_v10 = vpack.c.bf16 %v3376_v56, %v3376_v56 }
0x137f   :  { %v3388_v31 = vadd.f32 %v5809_v28, %v3368_v15  ;;  %v3389_v7 = vadd.f32 %v5809_v28, %v3369_v33  ;;  %v3393_v11 = vpack.c.bf16 %v3377_v4, %v3377_v4  ;;  %v3399_v55 = vpack.c.bf16 %v3383_v29, %v3383_v29 }
0x1380   :  { %v3390_v23 = vpack.c.bf16 %v3374_v49, %v3374_v49  ;;  %v3394_v51 = vpack.c.bf16 %v3378_v3, %v3378_v3  ;;  %v3395_v37 = vpack.c.bf16 %v3379_v50, %v3379_v50  ;;  %v3400_v59 = vpack.c.bf16 %v3384_v52, %v3384_v52 }
0x1381   :  { %v3396_v19 = vpack.c.bf16 %v3380_v48, %v3380_v48  ;;  %v3397_v36 = vpack.c.bf16 %v3381_v25, %v3381_v25  ;;  %v3401_v61 = vpack.c.bf16 %v3385_v2, %v3385_v2  ;;  %v3432_v39 = vunpack.c.l.b16 %v3391_v45 }
0x1382   :  { %v3398_v0 = vpack.c.bf16 %v3382_v5, %v3382_v5  ;;  %v3402_v46 = vpack.c.bf16 %v3386_v26, %v3386_v26  ;;  %v3403_v35 = vpack.c.bf16 %v3387_v12, %v3387_v12  ;;  %v3433_v30 = vunpack.c.l.b16 %v3392_v10 }
0x1383   :  { %v3404_v24 = vpack.c.bf16 %v3388_v31, %v3388_v31  ;;  %v3405_v1 = vpack.c.bf16 %v3389_v7, %v3389_v7  ;;  %v3434_v47 = vunpack.c.l.b16 %v3393_v11  ;;  %v3440_v56 = vunpack.c.l.b16 %v3399_v55 }
0x1384   :  { %v3431_v41 = vunpack.c.l.b16 %v3390_v23  ;;  %v3435_v28 = vunpack.c.l.b16 %v3394_v51  ;;  %v3436_v4 = vunpack.c.l.b16 %v3395_v37  ;;  %v3441_v54 = vunpack.c.l.b16 %v3400_v59 }
0x1385   :  { %v3437_v49 = vunpack.c.l.b16 %v3396_v19  ;;  %v3442_v3 = vunpack.c.l.b16 %v3401_v61  ;;  %v3447_v50 = vrot.slane %v3432_v39, 7  ;;  %v3449_v15 = vrot.slane %v3433_v30, 6 }
0x1386   :  { %v3438_v48 = vunpack.c.l.b16 %v3397_v36  ;;  %v3439_v33 = vunpack.c.l.b16 %v3398_v0  ;;  %v3443_v25 = vunpack.c.l.b16 %v3402_v46  ;;  %v3444_v29 = vunpack.c.l.b16 %v3403_v35 }
0x1387   :  { %v3448_v52 = vsel %vm993_vm2, %v3447_v50, %v3431_v41  ;;  %v3451_v2 = vrot.slane %v3434_v47, 5  ;;  %v3461_v45 = vrot.slane %v3440_v56, 7  ;;  %v3463_v5 = vrot.slane %v3441_v54, 6  ;;  %v6294_v54 = vld [vmem:[%s9252_s8 + $0x38] sm:$0xff]  }
0x1388   :  { %v3445_v26 = vunpack.c.l.b16 %v3404_v24  ;;  %v3446_v12 = vunpack.c.l.b16 %v3405_v1  ;;  %v3450_v10 = vsel %vm995_vm3, %v3449_v15, %v3448_v52  ;;  %v3453_v31 = vrot.slane %v3435_v28, 4 }
0x1389   :  { %v3452_v7 = vsel %vm997_vm4, %v3451_v2, %v3450_v10  ;;  %v3455_v11 = vrot.slane %v3436_v4, 3  ;;  %v3462_v55 = vsel %vm993_vm2, %v3461_v45, %v3439_v33  ;;  %v3465_v23 = vrot.slane %v3442_v3, 5  ;;  %v6293_v4 = vld [vmem:[%s9252_s8 + $0x30] sm:$0xff]   ;;  %v5826_v45 = vld [vmem:[%s9249_s9 + $0xd] ss:$0 sm:$0xff] }
0x138a   :  { %v3454_v51 = vsel %vm999_vm5, %v3453_v31, %v3452_v7  ;;  %v3457_v37 = vrot.slane %v3437_v49, 2  ;;  %v3464_v59 = vsel %vm995_vm3, %v3463_v5, %v3462_v55  ;;  %v3467_v19 = vrot.slane %v3443_v25, 4  ;;  %6198 = vmatpush3.bf16.msra.mxu0 %v6293_v4  ;;  %v5814_v49 = vld [vmem:[%s9249_s9 + $0xc] ss:$0 sm:$0xff] }
0x138b   :  { %v3456_v36 = vsel %vm1001_vm6, %v3455_v11, %v3454_v51  ;;  %v3466_v61 = vsel %vm997_vm4, %v3465_v23, %v3464_v59  ;;  %v3469_v39 = vrot.slane %v3444_v29, 3  ;;  %v3471_v35 = vrot.slane %v3445_v26, 2  ;;  %6199 = vmatprep.subr.bf16.mxu0 %v9262_v63 }
0x138c   :  { %v3458_v0 = vsel %vm1003_vm7, %v3457_v37, %v3456_v36  ;;  %v3468_v46 = vsel %vm999_vm5, %v3467_v19, %v3466_v61  ;;  %v3459_v30 = vrot.slane %v3438_v48, 1  ;;  %v3473_v1 = vrot.slane %v3446_v12, 1 }
0x138d   :  { %v3470_v24 = vsel %vm1001_vm6, %v3469_v39, %v3468_v46 }
0x138e   :  { %v3472_v47 = vsel %vm1003_vm7, %v3471_v35, %v3470_v24  ;;  %v3460_v56 = vsel %vm1005_vm8, %v3459_v30, %v3458_v0  ;;  %6200 = vmatpush3.bf16.msra.mxu0 %v6294_v54 }
0x138f   :  { %v3474_v41 = vsel %vm1005_vm8, %v3473_v1, %v3472_v47  ;;  %6219 = vmatprep.subr.bf16.mxu0 %v9262_v63 }
0x1390   :  { %v3475_v28 = vpack.c.b16 %v3474_v41, %v3460_v56 }
0x1392   :  { %6190 = vmatmul.mubr.msk.bf16.vlgmr.msra.gmra.mrb[52].mxu1 %vm795_vm11, %v3475_v28 }
0x1393   :  { %6209 = vmatprep.mubr.msk.bf16.mxu1 %vm6362_vm9, %v9262_v63 }
0x1465   :  { %v3525_v3 = vpop.f32.mrb[52].mxu1 }
0x1466   :  { %v3526_v50 = vadd.f32 %v5814_v49, %v3525_v3  ;;  %v6191_v15 = vpop.f32.mrb[53].mxu1 }
0x1467   :  { %v3528_v48 = vpop.f32.mrb[54].mxu1 }
0x1468   :  { %v3529_v33 = vadd.f32 %v5814_v49, %v3528_v48  ;;  %v6192_v25 = vpop.f32.mrb[55].mxu1  ;;  %v3532_v29 = vmax.f32 %v3526_v50, 0.0 }
0x146a   :  { %v3533_v52 = vmax.f32 %v3529_v33, 0.0 }
0x146c   :  { %v3534_v2 = vpack.c.bf16 %v3533_v52, %v3532_v29 }
0x146e   :  { %6202 = vmatmul.mubr.msk.bf16.vlgmr.msra.gmra.mrb[72].mxu0 %vm9287_vm10, %v3534_v2 }
0x146f   :  { %6221 = vmatprep.mubr.msk.bf16.mxu0 %vm6362_vm9, %v9262_v63 }
0x1541   :  { %v3609_v5 = vpop.f32.mrb[72].mxu0 }
0x1542   :  { %v3610_v26 = vadd.f32 %v5826_v45, %v3609_v5  ;;  %v6203_v12 = vpop.f32.mrb[73].mxu0 }
0x1543   :  { %v3612_v10 = vpop.f32.mrb[74].mxu0 }
0x1544   :  { %v3613_v31 = vadd.f32 %v5826_v45, %v3612_v10  ;;  %v6204_v7 = vpop.f32.mrb[75].mxu0  ;;  %v3618_v11 = vrot.slane %v3610_v26, 1  ;;  %v3619_v55 = vrot.slane %v3610_v26, 2  ;;  %v3620_v23 = vrot.slane %v3610_v26, 3 }
0x1545   :  { %v3621_v51 = vrot.slane %v3610_v26, 4  ;;  %v3622_v37 = vrot.slane %v3610_v26, 5  ;;  %v3623_v59 = vrot.slane %v3610_v26, 6  ;;  %v3624_v19 = vrot.slane %v3610_v26, 7 }
0x1546   :  { %v7972_v36 = vadd.f32 %v3618_v11, %v7724_v6  ;;  %v7975_v61 = vadd.f32 %v3619_v55, %v7730_v16  ;;  %v7978_v39 = vadd.f32 %v3620_v23, %v7733_v57  ;;  %v3648_v30 = vadd.f32 %v3610_v26, %v7727_v18 }
0x1547   :  { %v7981_v0 = vadd.f32 %v3621_v51, %v7736_v62  ;;  %v7984_v46 = vadd.f32 %v3622_v37, %v7739_v13  ;;  %v7987_v35 = vadd.f32 %v3623_v59, %v7742_v44  ;;  %v3625_v16 = vrot.slane %v3613_v31, 1 }
0x1548   :  { %v3680_v6 = vrot.slane %v7972_v36, 7  ;;  %v3682_v24 = vrot.slane %v7975_v61, 6  ;;  %v3655_v1 = vadd.f32 %v3624_v19, %v7749_v58  ;;  %v3684_v57 = vrot.slane %v7978_v39, 5 }
0x1549   :  { %v3686_v62 = vrot.slane %v7981_v0, 4  ;;  %v3688_v47 = vrot.slane %v7984_v46, 3  ;;  %v3626_v56 = vrot.slane %v3613_v31, 2  ;;  %v3627_v44 = vrot.slane %v3613_v31, 3 }
0x154a   :  { %v3681_v13 = vsel %vm993_vm2, %v3680_v6, %v3648_v30  ;;  %v3628_v41 = vrot.slane %v3613_v31, 4  ;;  %v3690_v28 = vrot.slane %v7987_v35, 2  ;;  %v3629_v4 = vrot.slane %v3613_v31, 5 }
0x154b   :  { %v3683_v18 = vsel %vm995_vm3, %v3682_v24, %v3681_v13  ;;  %v3630_v54 = vrot.slane %v3613_v31, 6  ;;  %v3631_v58 = vrot.slane %v3613_v31, 7  ;;  %v8001_v3 = vadd.f32 %v3625_v16, %v7746_v8 }
0x154c   :  { %v3685_v49 = vsel %vm997_vm4, %v3684_v57, %v3683_v18  ;;  %v8004_v50 = vadd.f32 %v3626_v56, %v7761_v21  ;;  %v3692_v48 = vrot.slane %v3655_v1, 1  ;;  %v8008_v33 = vadd.f32 %v3627_v44, %v7764_v32 }
0x154d   :  { %v3687_v15 = vsel %vm999_vm5, %v3686_v62, %v3685_v49  ;;  %v8011_v25 = vadd.f32 %v3628_v41, %v7772_v38  ;;  %v8015_v52 = vadd.f32 %v3613_v31, %v7769_v14  ;;  %v8018_v8 = vadd.f32 %v3629_v4, %v7776_v60 }
0x154e   :  { %v3689_v29 = vsel %vm1001_vm6, %v3688_v47, %v3687_v15  ;;  %v3694_v21 = vrot.slane %v8001_v3, 7  ;;  %v8023_v45 = vadd.f32 %v3630_v54, %v7782_v9  ;;  %v3696_v32 = vrot.slane %v8004_v50, 6 }
0x154f   :  { %v3691_v2 = vsel %vm1003_vm7, %v3690_v28, %v3689_v29  ;;  %v8028_v5 = vadd.f32 %v3631_v58, %v7786_v20  ;;  %v3698_v60 = vrot.slane %v8008_v33, 5  ;;  %v3700_v10 = vrot.slane %v8011_v25, 4 }
0x1550   :  { %v3693_v38 = vsel %vm1005_vm8, %v3692_v48, %v3691_v2  ;;  %v3695_v14 = vsel %vm993_vm2, %v3694_v21, %v8015_v52  ;;  %v3702_v31 = vrot.slane %v8018_v8, 3  ;;  %v3704_v20 = vrot.slane %v8023_v45, 2 }
0x1551   :  { %v3710_v26 = vsel %vm795_vm11, %v3693_v38, 0.0  ;;  %v3697_v12 = vsel %vm995_vm3, %v3696_v32, %v3695_v14  ;;  %v3706_v55 = vrot.slane %v8028_v5, 1 }
0x1552   :  { %3711 = vadd.xlane.f32.xlu0 %v3710_v26  ;;  %v3699_v9 = vsel %vm997_vm4, %v3698_v60, %v3697_v12 }
0x1553   :  { %v3701_v7 = vsel %vm999_vm5, %v3700_v10, %v3699_v9 }
0x1554   :  { %v3703_v11 = vsel %vm1001_vm6, %v3702_v31, %v3701_v7 }
0x1555   :  { %v3705_v23 = vsel %vm1003_vm7, %v3704_v20, %v3703_v11 }
0x1556   :  { %v3707_v51 = vsel %vm1005_vm8, %v3706_v55, %v3705_v23 }
0x1557   :  { %v3713_v37 = vsel %vm795_vm11, %v3707_v51, 0.0 }
0x1558   :  { %3714 = vadd.xlane.f32.xlu1 %v3713_v37 }
0x15df   :  { %v3712_v59 = vpop.xlane.xlu0 %3711 }
0x15e0   :  { %v3716_v19 = vmul.f32 0.03125, %v3712_v59 }
0x15e2   :  { %v3720_v6 = vrot.slane %v3716_v19, 1  ;;  %v3721_v24 = vrot.slane %v3716_v19, 2  ;;  %v3722_v16 = vrot.slane %v3716_v19, 3  ;;  %v3723_v57 = vrot.slane %v3716_v19, 4 }
0x15e3   :  { %v3724_v62 = vrot.slane %v3716_v19, 5  ;;  %v3725_v47 = vrot.slane %v3716_v19, 6  ;;  %v3726_v13 = vrot.slane %v3716_v19, 7  ;;  %v8045_v56 = vsub.f32 %v3648_v30, %v3716_v19 }
0x15e4   :  { %v8048_v44 = vsub.f32 %v7972_v36, %v3720_v6  ;;  %v8051_v41 = vsub.f32 %v7975_v61, %v3721_v24  ;;  %v8054_v18 = vsub.f32 %v7978_v39, %v3722_v16  ;;  %v8057_v28 = vsub.f32 %v7981_v0, %v3723_v57 }
0x15e5   :  { %v3715_v4 = vpop.xlane.xlu1 %3714  ;;  %v8060_v54 = vsub.f32 %v7984_v46, %v3724_v62  ;;  %v8063_v49 = vsub.f32 %v7987_v35, %v3725_v47  ;;  %v8065_v30 = vsub.f32 %v3655_v1, %v3726_v13  ;;  %v3766_v58 = vmul.f32 %v8045_v56, %v8045_v56 }
0x15e6   :  { %v3717_v36 = vmul.f32 0.03125, %v3715_v4  ;;  %v3767_v61 = vmul.f32 %v8048_v44, %v8048_v44  ;;  %v3768_v39 = vmul.f32 %v8051_v41, %v8051_v41  ;;  %v3769_v0 = vmul.f32 %v8054_v18, %v8054_v18 }
0x15e7   :  { %v3770_v46 = vmul.f32 %v8057_v28, %v8057_v28  ;;  %v3771_v35 = vmul.f32 %v8060_v54, %v8060_v54  ;;  %v3772_v1 = vmul.f32 %v8063_v49, %v8063_v49  ;;  %v3773_v15 = vmul.f32 %v8065_v30, %v8065_v30 }
0x15e8   :  { %v3798_v48 = vrot.slane %v3767_v61, 7  ;;  %v3800_v29 = vrot.slane %v3768_v39, 6  ;;  %v3727_v21 = vrot.slane %v3717_v36, 1  ;;  %v3802_v2 = vrot.slane %v3769_v0, 5 }
0x15e9   :  { %v3804_v32 = vrot.slane %v3770_v46, 4  ;;  %v3806_v38 = vrot.slane %v3771_v35, 3  ;;  %v3808_v14 = vrot.slane %v3772_v1, 2  ;;  %v3728_v26 = vrot.slane %v3717_v36, 2 }
0x15ea   :  { %v3799_v60 = vsel %vm993_vm2, %v3798_v48, %v3766_v58  ;;  %v3729_v12 = vrot.slane %v3717_v36, 3  ;;  %v3730_v10 = vrot.slane %v3717_v36, 4  ;;  %v3731_v31 = vrot.slane %v3717_v36, 5 }
0x15eb   :  { %v3801_v9 = vsel %vm995_vm3, %v3800_v29, %v3799_v60  ;;  %v3732_v7 = vrot.slane %v3717_v36, 6  ;;  %v3733_v20 = vrot.slane %v3717_v36, 7  ;;  %v8087_v55 = vsub.f32 %v8015_v52, %v3717_v36 }
0x15ec   :  { %v3803_v11 = vsel %vm997_vm4, %v3802_v2, %v3801_v9  ;;  %v8090_v23 = vsub.f32 %v8001_v3, %v3727_v21  ;;  %v8093_v51 = vsub.f32 %v8004_v50, %v3728_v26  ;;  %v8097_v59 = vsub.f32 %v8008_v33, %v3729_v12 }
0x15ed   :  { %v3805_v37 = vsel %vm999_vm5, %v3804_v32, %v3803_v11  ;;  %v8100_v19 = vsub.f32 %v8011_v25, %v3730_v10  ;;  %v8103_v6 = vsub.f32 %v8018_v8, %v3731_v31  ;;  %v3810_v24 = vrot.slane %v3773_v15, 1 }
0x15ee   :  { %v3807_v52 = vsel %vm1001_vm6, %v3806_v38, %v3805_v37  ;;  %v8107_v3 = vsub.f32 %v8023_v45, %v3732_v7  ;;  %v8110_v50 = vsub.f32 %v8028_v5, %v3733_v20  ;;  %v3775_v33 = vmul.f32 %v8090_v23, %v8090_v23  ;;  %v8142_v7 = vld [vmem:[%s9247_s4 + $0x3] ss:$0 sm:$0xff] }
0x15ef   :  { %v3809_v16 = vsel %vm1003_vm7, %v3808_v14, %v3807_v52  ;;  %v3776_v25 = vmul.f32 %v8093_v51, %v8093_v51  ;;  %v3777_v8 = vmul.f32 %v8097_v59, %v8097_v59  ;;  %v3774_v45 = vmul.f32 %v8087_v55, %v8087_v55 }
0x15f0   :  { %v3811_v57 = vsel %vm1005_vm8, %v3810_v24, %v3809_v16  ;;  %v3778_v5 = vmul.f32 %v8100_v19, %v8100_v19  ;;  %v3779_v47 = vmul.f32 %v8103_v6, %v8103_v6  ;;  %v3812_v13 = vrot.slane %v3775_v33, 7 }
0x15f1   :  { %v3828_v62 = vsel %vm795_vm11, %v3811_v57, 0.0  ;;  %v3814_v4 = vrot.slane %v3776_v25, 6  ;;  %v3780_v36 = vmul.f32 %v8107_v3, %v8107_v3  ;;  %v3781_v61 = vmul.f32 %v8110_v50, %v8110_v50 }
0x15f2   :  { %3829 = vadd.xlane.f32.xlu0 %v3828_v62  ;;  %v3813_v39 = vsel %vm993_vm2, %v3812_v13, %v3774_v45  ;;  %v3816_v0 = vrot.slane %v3777_v8, 5  ;;  %v3818_v46 = vrot.slane %v3778_v5, 4  ;;  %v3820_v1 = vrot.slane %v3779_v47, 3  ;;  %v8150_v8 = vld [vmem:[%s9247_s4 + $0x4] ss:$0 sm:$0xff] }
0x15f3   :  { %v3815_v58 = vsel %vm995_vm3, %v3814_v4, %v3813_v39  ;;  %v3822_v48 = vrot.slane %v3780_v36, 2  ;;  %v3824_v21 = vrot.slane %v3781_v61, 1 }
0x15f4   :  { %v3817_v35 = vsel %vm997_vm4, %v3816_v0, %v3815_v58 }
0x15f5   :  { %v3819_v15 = vsel %vm999_vm5, %v3818_v46, %v3817_v35 }
0x15f6   :  { %v3821_v29 = vsel %vm1001_vm6, %v3820_v1, %v3819_v15 }
0x15f7   :  { %v3823_v2 = vsel %vm1003_vm7, %v3822_v48, %v3821_v29 }
0x15f8   :  { %v3825_v32 = vsel %vm1005_vm8, %v3824_v21, %v3823_v2 }
0x15f9   :  { %v3831_v38 = vsel %vm795_vm11, %v3825_v32, 0.0 }
0x15fa   :  { %3832 = vadd.xlane.f32.xlu1 %v3831_v38 }
0x167f   :  { %v3830_v14 = vpop.xlane.xlu0 %3829 }
0x1680   :  { %v3834_v60 = vmul.f32 0.03125, %v3830_v14  ;;  %v9295_v14 = vrot.slane %v6836_v53, 7 }
0x1682   :  { %v3836_v26 = vadd.f32 1e-05, %v3834_v60 }
0x1684   :  { %6337 = vrsqrt.f32 %v3836_v26 }
0x1687   :  { %v3833_v12 = vpop.xlane.xlu1 %3832 }
0x1688   :  { %v3835_v10 = vmul.f32 0.03125, %v3833_v12 }
0x168a   :  { %v3837_v9 = vadd.f32 1e-05, %v3835_v10 }
0x168c   :  { %6339 = vrsqrt.f32 %v3837_v9 }
0x168e   :  { %v6338_v31 = vpop.eup %6337 }
0x168f   :  { %v3842_v20 = vrot.slane %v6338_v31, 1  ;;  %v3843_v11 = vrot.slane %v6338_v31, 2  ;;  %v3844_v37 = vrot.slane %v6338_v31, 3  ;;  %v3845_v52 = vrot.slane %v6338_v31, 4 }
0x1690   :  { %v3846_v24 = vrot.slane %v6338_v31, 5  ;;  %v3847_v16 = vrot.slane %v6338_v31, 6  ;;  %v3848_v33 = vrot.slane %v6338_v31, 7  ;;  %v8145_v25 = vmul.f32 %v6338_v31, %v8045_v56 }
0x1691   :  { %v8153_v57 = vmul.f32 %v3842_v20, %v8048_v44  ;;  %v8156_v45 = vmul.f32 %v3843_v11, %v8051_v41  ;;  %v8159_v5 = vmul.f32 %v3844_v37, %v8054_v18  ;;  %v8162_v62 = vmul.f32 %v3845_v52, %v8057_v28 }
0x1692   :  { %v8165_v56 = vmul.f32 %v3846_v24, %v8060_v54  ;;  %v8168_v47 = vmul.f32 %v3847_v16, %v8063_v49  ;;  %v8171_v13 = vmul.f32 %v3848_v33, %v8065_v30  ;;  %v4116_v44 = vmul.f32 %v8142_v7, %v8145_v25 }
0x1693   :  { %v4117_v41 = vmul.f32 %v8142_v7, %v8153_v57  ;;  %v4118_v18 = vmul.f32 %v8142_v7, %v8156_v45  ;;  %v4119_v28 = vmul.f32 %v8142_v7, %v8159_v5  ;;  %v4120_v54 = vmul.f32 %v8142_v7, %v8162_v62 }
0x1694   :  { %9294 = vst [vmem:[#allocation2_spill] sm:$0xff] %v8171_v13  ;;  %v4121_v49 = vmul.f32 %v8142_v7, %v8165_v56  ;;  %v4122_v30 = vmul.f32 %v8142_v7, %v8168_v47  ;;  %v4123_v4 = vmul.f32 %v8142_v7, %v8171_v13  ;;  %v4136_v36 = vadd.f32 %v8150_v8, %v4116_v44 }
0x1695   :  { %v4137_v61 = vadd.f32 %v8150_v8, %v4117_v41  ;;  %v4138_v39 = vadd.f32 %v8150_v8, %v4118_v18  ;;  %v4139_v0 = vadd.f32 %v8150_v8, %v4119_v28  ;;  %v4140_v58 = vadd.f32 %v8150_v8, %v4120_v54 }
0x1696   :  { %v4141_v46 = vadd.f32 %v8150_v8, %v4121_v49  ;;  %v4142_v35 = vadd.f32 %v8150_v8, %v4122_v30  ;;  %v4143_v1 = vadd.f32 %v8150_v8, %v4123_v4  ;;  %v8198_v15 = vadd.f32 %v4136_v36, %v6836_v53  ;;  %v6340_v48 = vpop.eup %6339 }
0x1697   :  { %v8202_v29 = vadd.f32 %v4137_v61, %v1064_v22  ;;  %v8206_v21 = vadd.f32 %v4138_v39, %v1065_v17  ;;  %v8210_v2 = vadd.f32 %v4139_v0, %v1066_v40  ;;  %v8214_v32 = vadd.f32 %v4140_v58, %v1067_v42 }
0x1698   :  { %v8218_v38 = vadd.f32 %v4141_v46, %v1068_v43  ;;  %v8222_v22 = vadd.f32 %v4142_v35, %v1069_v27  ;;  %v8226_v17 = vadd.f32 %v4143_v1, %v9295_v14  ;;  %v3849_v60 = vrot.slane %v6340_v48, 1 }
0x1699   :  { %v4191_v40 = vrot.slane %v8202_v29, 7  ;;  %v4193_v26 = vrot.slane %v8206_v21, 6  ;;  %v4195_v42 = vrot.slane %v8210_v2, 5  ;;  %v4197_v12 = vrot.slane %v8214_v32, 4 }
0x169a   :  { %v4199_v43 = vrot.slane %v8218_v38, 3  ;;  %v4201_v10 = vrot.slane %v8222_v22, 2  ;;  %v4203_v27 = vrot.slane %v8226_v17, 1  ;;  %v3850_v9 = vrot.slane %v6340_v48, 2 }
0x169b   :  { %v4192_v53 = vsel %vm993_vm2, %v4191_v40, %v8198_v15  ;;  %v3851_v31 = vrot.slane %v6340_v48, 3  ;;  %v3852_v20 = vrot.slane %v6340_v48, 4  ;;  %v3853_v11 = vrot.slane %v6340_v48, 5 }
0x169c   :  { %v4194_v37 = vsel %vm995_vm3, %v4193_v26, %v4192_v53  ;;  %v3854_v52 = vrot.slane %v6340_v48, 6  ;;  %v3855_v24 = vrot.slane %v6340_v48, 7  ;;  %v8239_v16 = vmul.f32 %v6340_v48, %v8087_v55 }
0x169d   :  { %v4196_v33 = vsel %vm997_vm4, %v4195_v42, %v4194_v37  ;;  %v8243_v44 = vmul.f32 %v3849_v60, %v8090_v23  ;;  %v8246_v41 = vmul.f32 %v3850_v9, %v8093_v51  ;;  %v8249_v18 = vmul.f32 %v3851_v31, %v8097_v59 }
0x169e   :  { %v4198_v28 = vsel %vm999_vm5, %v4197_v12, %v4196_v33  ;;  %v8253_v54 = vmul.f32 %v3852_v20, %v8100_v19  ;;  %v8256_v49 = vmul.f32 %v3853_v11, %v8103_v6  ;;  %v8259_v55 = vmul.f32 %v3854_v52, %v8107_v3 }
0x169f   :  { %9296 = vst [vmem:[#allocation3_spill] sm:$0xff] %v8249_v18  ;;  %v4200_v23 = vsel %vm1001_vm6, %v4199_v43, %v4198_v28  ;;  %v8263_v30 = vmul.f32 %v3855_v24, %v8110_v50  ;;  %v4124_v51 = vmul.f32 %v8142_v7, %v8239_v16  ;;  %v4125_v59 = vmul.f32 %v8142_v7, %v8243_v44 }
0x16a0   :  { %9297 = vst [vmem:[#allocation4_spill] sm:$0xff] %v8253_v54  ;;  %9298 = vst [vmem:[#allocation5_spill] sm:$0xff] %v8256_v49  ;;  %v4202_v19 = vsel %vm1003_vm7, %v4201_v10, %v4200_v23  ;;  %v4126_v6 = vmul.f32 %v8142_v7, %v8246_v41  ;;  %v4127_v3 = vmul.f32 %v8142_v7, %v8249_v18  ;;  %v9302_v42 = vrot.slane %v6929_v34, 2 }
0x16a1   :  { %9299 = vst [vmem:[#allocation6_spill] sm:$0xff] %v8259_v55  ;;  %9300 = vst [vmem:[#allocation7_spill] sm:$0xff] %v8263_v30  ;;  %v4128_v4 = vmul.f32 %v8142_v7, %v8253_v54  ;;  %v4204_v50 = vsel %vm1005_vm8, %v4203_v27, %v4202_v19  ;;  %v4129_v36 = vmul.f32 %v8142_v7, %v8256_v49  ;;  %v9303_v43 = vrot.slane %v6929_v34, 3 }
0x16a2   :  { %v4130_v61 = vmul.f32 %v8142_v7, %v8259_v55  ;;  %v4131_v39 = vmul.f32 %v8142_v7, %v8263_v30  ;;  %v4221_v0 = vsel %vm795_vm11, %v4204_v50, 0.0  ;;  %v4144_v58 = vadd.f32 %v8150_v8, %v4124_v51 }
0x16a3   :  { %v4145_v46 = vadd.f32 %v8150_v8, %v4125_v59  ;;  %v4146_v35 = vadd.f32 %v8150_v8, %v4126_v6  ;;  %4222 = vadd.xlane.f32.xlu0 %v4221_v0  ;;  %v4147_v1 = vadd.f32 %v8150_v8, %v4127_v3  ;;  %v4148_v48 = vadd.f32 %v8150_v8, %v4128_v4 }
0x16a4   :  { %v4149_v14 = vadd.f32 %v8150_v8, %v4129_v36  ;;  %v4150_v60 = vadd.f32 %v8150_v8, %v4130_v61  ;;  %v4151_v40 = vadd.f32 %v8150_v8, %v4131_v39  ;;  %v9301_v7 = vrot.slane %v6929_v34, 1 }
0x16a5   :  { %v8298_v12 = vadd.f32 %v4146_v35, %v9302_v42  ;;  %v8302_v10 = vadd.f32 %v4147_v1, %v9303_v43  ;;  %v9304_v27 = vrot.slane %v6929_v34, 4  ;;  %v8309_v53 = vadd.f32 %v4144_v58, %v6929_v34 }
0x16a6   :  { %v8294_v26 = vadd.f32 %v4145_v46, %v9301_v7  ;;  %v9305_v8 = vrot.slane %v6929_v34, 5  ;;  %v9306_v37 = vrot.slane %v6929_v34, 6  ;;  %v9307_v24 = vrot.slane %v6929_v34, 7 }
0x16a7   :  { %v8306_v9 = vadd.f32 %v4148_v48, %v9304_v27  ;;  %v4207_v11 = vrot.slane %v8298_v12, 6  ;;  %v4209_v23 = vrot.slane %v8302_v10, 5 }
0x16a8   :  { %v8313_v31 = vadd.f32 %v4149_v14, %v9305_v8  ;;  %v4205_v20 = vrot.slane %v8294_v26, 7  ;;  %v8319_v52 = vadd.f32 %v4150_v60, %v9306_v37  ;;  %v8323_v33 = vadd.f32 %v4151_v40, %v9307_v24 }
0x16a9   :  { %v4211_v59 = vrot.slane %v8306_v9, 4 }
0x16aa   :  { %v4206_v28 = vsel %vm993_vm2, %v4205_v20, %v8309_v53  ;;  %v4213_v6 = vrot.slane %v8313_v31, 3  ;;  %v4215_v4 = vrot.slane %v8319_v52, 2  ;;  %v4217_v50 = vrot.slane %v8323_v33, 1 }
0x16ab   :  { %v4208_v51 = vsel %vm995_vm3, %v4207_v11, %v4206_v28 }
0x16ac   :  { %v4210_v19 = vsel %vm997_vm4, %v4209_v23, %v4208_v51 }
0x16ad   :  { %v4212_v3 = vsel %vm999_vm5, %v4211_v59, %v4210_v19 }
0x16ae   :  { %v4214_v34 = vsel %vm1001_vm6, %v4213_v6, %v4212_v3 }
0x16af   :  { %v4216_v36 = vsel %vm1003_vm7, %v4215_v4, %v4214_v34 }
0x16b0   :  { %v4218_v61 = vsel %vm1005_vm8, %v4217_v50, %v4216_v36 }
0x16b1   :  { %v4224_v39 = vsel %vm795_vm11, %v4218_v61, 0.0 }
0x16b2   :  { %4225 = vadd.xlane.f32.xlu1 %v4224_v39 }
0x1730   :  { %v4223_v0 = vpop.xlane.xlu0 %4222 }
0x1731   :  { %v4227_v58 = vmul.f32 0.03125, %v4223_v0 }
0x1733   :  { %v4231_v46 = vrot.slane %v4227_v58, 1  ;;  %v4232_v35 = vrot.slane %v4227_v58, 2  ;;  %v4233_v1 = vrot.slane %v4227_v58, 3  ;;  %v4234_v48 = vrot.slane %v4227_v58, 4 }
0x1734   :  { %v4235_v14 = vrot.slane %v4227_v58, 5  ;;  %v4236_v60 = vrot.slane %v4227_v58, 6  ;;  %v4237_v40 = vrot.slane %v4227_v58, 7  ;;  %v8340_v7 = vsub.f32 %v8198_v15, %v4227_v58 }
0x1735   :  { %v8343_v42 = vsub.f32 %v8202_v29, %v4231_v46  ;;  %v8346_v43 = vsub.f32 %v8206_v21, %v4232_v35  ;;  %v8349_v27 = vsub.f32 %v8210_v2, %v4233_v1  ;;  %v8352_v8 = vsub.f32 %v8214_v32, %v4234_v48 }
0x1736   :  { %v8355_v20 = vsub.f32 %v8218_v38, %v4235_v14  ;;  %v8358_v11 = vsub.f32 %v8222_v22, %v4236_v60  ;;  %v8361_v37 = vsub.f32 %v8226_v17, %v4237_v40  ;;  %v4277_v59 = vmul.f32 %v8340_v7, %v8340_v7 }
0x1737   :  { %v4278_v24 = vmul.f32 %v8343_v42, %v8343_v42  ;;  %v4279_v28 = vmul.f32 %v8346_v43, %v8346_v43  ;;  %v4280_v23 = vmul.f32 %v8349_v27, %v8349_v27  ;;  %v4281_v51 = vmul.f32 %v8352_v8, %v8352_v8 }
0x1738   :  { %v4282_v19 = vmul.f32 %v8355_v20, %v8355_v20  ;;  %v4283_v4 = vmul.f32 %v8358_v11, %v8358_v11  ;;  %v4284_v34 = vmul.f32 %v8361_v37, %v8361_v37 }
0x1739   :  { %v4309_v6 = vrot.slane %v4278_v24, 7  ;;  %v4311_v3 = vrot.slane %v4279_v28, 6  ;;  %v4313_v36 = vrot.slane %v4280_v23, 5  ;;  %v4315_v39 = vrot.slane %v4281_v51, 4 }
0x173a   :  { %v4317_v46 = vrot.slane %v4282_v19, 3  ;;  %v4319_v48 = vrot.slane %v4283_v4, 2  ;;  %v4321_v60 = vrot.slane %v4284_v34, 1 }
0x173b   :  { %v4310_v50 = vsel %vm993_vm2, %v4309_v6, %v4277_v59 }
0x173c   :  { %v4312_v61 = vsel %vm995_vm3, %v4311_v3, %v4310_v50 }
0x173d   :  { %v4314_v58 = vsel %vm997_vm4, %v4313_v36, %v4312_v61 }
0x173e   :  { %v4316_v1 = vsel %vm999_vm5, %v4315_v39, %v4314_v58 }
0x173f   :  { %v4226_v0 = vpop.xlane.xlu1 %4225  ;;  %v4318_v14 = vsel %vm1001_vm6, %v4317_v46, %v4316_v1 }
0x1740   :  { %v4228_v35 = vmul.f32 0.03125, %v4226_v0  ;;  %v4320_v40 = vsel %vm1003_vm7, %v4319_v48, %v4318_v14 }
0x1741   :  { %v4322_v23 = vsel %vm1005_vm8, %v4321_v60, %v4320_v40 }
0x1742   :  { %v4238_v24 = vrot.slane %v4228_v35, 1  ;;  %v4239_v28 = vrot.slane %v4228_v35, 2  ;;  %v4240_v59 = vrot.slane %v4228_v35, 3  ;;  %v4241_v6 = vrot.slane %v4228_v35, 4 }
0x1743   :  { %v4242_v51 = vrot.slane %v4228_v35, 5  ;;  %v4243_v3 = vrot.slane %v4228_v35, 6  ;;  %v4339_v50 = vsel %vm795_vm11, %v4322_v23, 0.0  ;;  %v4244_v19 = vrot.slane %v4228_v35, 7 }
0x1744   :  { %v8388_v36 = vsub.f32 %v8309_v53, %v4228_v35  ;;  %v8391_v4 = vsub.f32 %v8294_v26, %v4238_v24  ;;  %4340 = vadd.xlane.f32.xlu0 %v4339_v50  ;;  %v8394_v34 = vsub.f32 %v8298_v12, %v4239_v28  ;;  %v8397_v61 = vsub.f32 %v8302_v10, %v4240_v59 }
0x1745   :  { %v8400_v39 = vsub.f32 %v8306_v9, %v4241_v6  ;;  %v8403_v0 = vsub.f32 %v8313_v31, %v4242_v51  ;;  %v8406_v58 = vsub.f32 %v8319_v52, %v4243_v3  ;;  %v8409_v46 = vsub.f32 %v8323_v33, %v4244_v19 }
0x1746   :  { %v4286_v35 = vmul.f32 %v8391_v4, %v8391_v4  ;;  %v4287_v1 = vmul.f32 %v8394_v34, %v8394_v34  ;;  %v4288_v48 = vmul.f32 %v8397_v61, %v8397_v61  ;;  %v4285_v60 = vmul.f32 %v8388_v36, %v8388_v36 }
0x1747   :  { %v4289_v14 = vmul.f32 %v8400_v39, %v8400_v39  ;;  %v4290_v40 = vmul.f32 %v8403_v0, %v8403_v0  ;;  %v4291_v28 = vmul.f32 %v8406_v58, %v8406_v58  ;;  %v4292_v23 = vmul.f32 %v8409_v46, %v8409_v46 }
0x1748   :  { %v4323_v24 = vrot.slane %v4286_v35, 7  ;;  %v4325_v59 = vrot.slane %v4287_v1, 6  ;;  %v4327_v51 = vrot.slane %v4288_v48, 5  ;;  %v6295_v48 = vld [vmem:[%s9248_s5 + $0x20] sm:$0xff]  }
0x1749   :  { %v4329_v50 = vrot.slane %v4289_v14, 4  ;;  %v4331_v63 = vrot.slane %v4290_v40, 3  ;;  %v4333_v55 = vrot.slane %v4291_v28, 2  ;;  %v4335_v49 = vrot.slane %v4292_v23, 1  ;;  %6206 = vmatpush3.bf16.msra.mxu1 %v6295_v48  ;;  %v6296_v14 = vld [vmem:[%s9248_s5 + $0x28] sm:$0xff]  }
0x174a   :  { %v4324_v6 = vsel %vm993_vm2, %v4323_v24, %v4285_v60  ;;  %v9308_v60 = vmov 0.0   ;;  %v8446_v23 = vld [vmem:[%s9249_s9 + $0x10] ss:$0 sm:$0xff] }
0x174b   :  { %v4326_v3 = vsel %vm995_vm3, %v4325_v59, %v4324_v6  ;;  %6207 = vmatprep.subr.bf16.mxu1 %v9308_v60 }
0x174c   :  { %v4328_v19 = vsel %vm997_vm4, %v4327_v51, %v4326_v3 }
0x174d   :  { %v4330_v30 = vsel %vm999_vm5, %v4329_v50, %v4328_v19  ;;  %6208 = vmatpush3.bf16.msra.mxu1 %v6296_v14 }
0x174e   :  { %v4332_v35 = vsel %vm1001_vm6, %v4331_v63, %v4330_v30  ;;  %6213 = vmatprep.subr.bf16.mxu1 %v9308_v60 }
0x174f   :  { %v4334_v1 = vsel %vm1003_vm7, %v4333_v55, %v4332_v35 }
0x1750   :  { %v4336_v54 = vsel %vm1005_vm8, %v4335_v49, %v4334_v1 }
0x1751   :  { %v4342_v18 = vsel %vm795_vm11, %v4336_v54, 0.0 }
0x1752   :  { %4343 = vadd.xlane.f32.xlu1 %v4342_v18 }
0x17d1   :  { %v4341_v63 = vpop.xlane.xlu0 %4340 }
0x17d2   :  { %v4345_v55 = vmul.f32 0.03125, %v4341_v63 }
0x17d4   :  { %v4347_v49 = vadd.f32 1e-05, %v4345_v55 }
0x17d6   :  { %6341 = vrsqrt.f32 %v4347_v49  ;;  %v5841_v49 = vld [vmem:[%s9249_s9 + $0x11] ss:$0 sm:$0xff] }
0x17df   :  { %v4344_v54 = vpop.xlane.xlu1 %4343 }
0x17e0   :  { %v4346_v18 = vmul.f32 0.03125, %v4344_v54  ;;  %v6342_v30 = vpop.eup %6341 }
0x17e1   :  { %v4353_v24 = vrot.slane %v6342_v30, 1  ;;  %v4354_v28 = vrot.slane %v6342_v30, 2  ;;  %v4355_v59 = vrot.slane %v6342_v30, 3  ;;  %v4356_v6 = vrot.slane %v6342_v30, 4 }
0x17e2   :  { %v4348_v40 = vadd.f32 1e-05, %v4346_v18  ;;  %v4357_v51 = vrot.slane %v6342_v30, 5  ;;  %v4358_v3 = vrot.slane %v6342_v30, 6  ;;  %v4359_v50 = vrot.slane %v6342_v30, 7 }
0x17e3   :  { %v4383_v19 = vmul.f32 %v6342_v30, %v8340_v7  ;;  %v4384_v35 = vmul.f32 %v4353_v24, %v8343_v42  ;;  %v4385_v1 = vmul.f32 %v4354_v28, %v8346_v43  ;;  %v4386_v48 = vmul.f32 %v4355_v59, %v8349_v27 }
0x17e4   :  { %6343 = vrsqrt.f32 %v4348_v40  ;;  %v4387_v14 = vmul.f32 %v4356_v6, %v8352_v8  ;;  %v4388_v63 = vmul.f32 %v4357_v51, %v8355_v20  ;;  %v4389_v55 = vmul.f32 %v4358_v3, %v8358_v11 }
0x17e5   :  { %v4390_v54 = vmul.f32 %v4359_v50, %v8361_v37  ;;  %v4403_v7 = vmul.f32 %v8446_v23, %v4383_v19  ;;  %v4404_v42 = vmul.f32 %v8446_v23, %v4384_v35  ;;  %v4405_v43 = vmul.f32 %v8446_v23, %v4385_v1 }
0x17e6   :  { %v4406_v27 = vmul.f32 %v8446_v23, %v4386_v48  ;;  %v4407_v8 = vmul.f32 %v8446_v23, %v4387_v14  ;;  %v4408_v20 = vmul.f32 %v8446_v23, %v4388_v63  ;;  %v4409_v11 = vmul.f32 %v8446_v23, %v4389_v55 }
0x17e7   :  { %v4410_v18 = vmul.f32 %v8446_v23, %v4390_v54  ;;  %v4424_v30 = vadd.f32 %v5841_v49, %v4404_v42  ;;  %v4425_v40 = vadd.f32 %v5841_v49, %v4405_v43  ;;  %v4423_v24 = vadd.f32 %v5841_v49, %v4403_v7 }
0x17e8   :  { %v4426_v37 = vadd.f32 %v5841_v49, %v4406_v27  ;;  %v4427_v28 = vadd.f32 %v5841_v49, %v4407_v8  ;;  %v4428_v59 = vadd.f32 %v5841_v49, %v4408_v20  ;;  %v4429_v6 = vadd.f32 %v5841_v49, %v4409_v11 }
0x17e9   :  { %v4440_v51 = vpack.c.bf16 %v4424_v30, %v4424_v30  ;;  %v4441_v3 = vpack.c.bf16 %v4425_v40, %v4425_v40  ;;  %v8467_v1 = vadd.f32 %v5841_v49, %v4410_v18  ;;  %v4439_v48 = vpack.c.bf16 %v4423_v24, %v4423_v24 }
0x17ea   :  { %v4442_v50 = vpack.c.bf16 %v4426_v37, %v4426_v37  ;;  %v4443_v14 = vpack.c.bf16 %v4427_v28, %v4427_v28  ;;  %v4444_v63 = vpack.c.bf16 %v4428_v59, %v4428_v59  ;;  %v4445_v13 = vpack.c.bf16 %v4429_v6, %v4429_v6 }
0x17eb   :  { %v4477_v19 = vunpack.c.l.b16 %v4440_v51  ;;  %v4478_v35 = vunpack.c.l.b16 %v4441_v3 }
0x17ec   :  { %v8469_v54 = vunpack.c.l.b16 %v4442_v50 }
0x17ed   :  { %v4492_v42 = vrot.slane %v4477_v19, 7  ;;  %v4494_v7 = vrot.slane %v4478_v35, 6 }
0x17ee   :  { %v6344_v55 = vpop.eup %6343 }
0x17ef   :  { %v4360_v43 = vrot.slane %v6344_v55, 1  ;;  %v4361_v27 = vrot.slane %v6344_v55, 2  ;;  %v4362_v8 = vrot.slane %v6344_v55, 3  ;;  %v4363_v20 = vrot.slane %v6344_v55, 4 }
0x17f0   :  { %v4364_v11 = vrot.slane %v6344_v55, 5  ;;  %v4365_v30 = vrot.slane %v6344_v55, 6  ;;  %v4366_v40 = vrot.slane %v6344_v55, 7  ;;  %v4391_v37 = vmul.f32 %v6344_v55, %v8388_v36 }
0x17f1   :  { %v4392_v18 = vmul.f32 %v4360_v43, %v8391_v4  ;;  %v4393_v24 = vmul.f32 %v4361_v27, %v8394_v34  ;;  %v4394_v28 = vmul.f32 %v4362_v8, %v8397_v61  ;;  %v4395_v59 = vmul.f32 %v4363_v20, %v8400_v39 }
0x17f2   :  { %v4396_v6 = vmul.f32 %v4364_v11, %v8403_v0  ;;  %v4397_v51 = vmul.f32 %v4365_v30, %v8406_v58  ;;  %v4398_v3 = vmul.f32 %v4366_v40, %v8409_v46  ;;  %v4411_v50 = vmul.f32 %v8446_v23, %v4391_v37 }
0x17f3   :  { %v4412_v19 = vmul.f32 %v8446_v23, %v4392_v18  ;;  %v4413_v36 = vmul.f32 %v8446_v23, %v4393_v24  ;;  %v4414_v4 = vmul.f32 %v8446_v23, %v4394_v28  ;;  %v4415_v34 = vmul.f32 %v8446_v23, %v4395_v59 }
0x17f4   :  { %v4416_v61 = vmul.f32 %v8446_v23, %v4396_v6  ;;  %v4417_v39 = vmul.f32 %v8446_v23, %v4397_v51  ;;  %v4418_v0 = vmul.f32 %v8446_v23, %v4398_v3  ;;  %v4431_v35 = vadd.f32 %v5841_v49, %v4411_v50 }
0x17f5   :  { %v4432_v58 = vadd.f32 %v5841_v49, %v4412_v19  ;;  %v4433_v55 = vadd.f32 %v5841_v49, %v4413_v36  ;;  %v4434_v46 = vadd.f32 %v5841_v49, %v4414_v4  ;;  %v4435_v43 = vadd.f32 %v5841_v49, %v4415_v34 }
0x17f6   :  { %v4436_v27 = vadd.f32 %v5841_v49, %v4416_v61  ;;  %v4437_v8 = vadd.f32 %v5841_v49, %v4417_v39  ;;  %v4438_v20 = vadd.f32 %v5841_v49, %v4418_v0  ;;  %v4447_v11 = vpack.c.bf16 %v4431_v35, %v4431_v35 }
0x17f7   :  { %v4448_v30 = vpack.c.bf16 %v4432_v58, %v4432_v58  ;;  %v4449_v40 = vpack.c.bf16 %v4433_v55, %v4433_v55  ;;  %v4450_v37 = vpack.c.bf16 %v4434_v46, %v4434_v46  ;;  %v4451_v18 = vpack.c.bf16 %v4435_v43, %v4435_v43 }
0x17f8   :  { %v4446_v24 = vpack.c.bf16 %v8467_v1, %v8467_v1  ;;  %v4452_v28 = vpack.c.bf16 %v4436_v27, %v4436_v27  ;;  %v4476_v59 = vunpack.c.l.b16 %v4439_v48  ;;  %v4480_v6 = vunpack.c.l.b16 %v4443_v14 }
0x17f9   :  { %v4453_v23 = vpack.c.bf16 %v4437_v8, %v4437_v8  ;;  %v4481_v51 = vunpack.c.l.b16 %v4444_v63  ;;  %v4485_v3 = vunpack.c.l.b16 %v4448_v30  ;;  %v4486_v50 = vunpack.c.l.b16 %v4449_v40 }
0x17fa   :  { %v4454_v19 = vpack.c.bf16 %v4438_v20, %v4438_v20  ;;  %v4482_v36 = vunpack.c.l.b16 %v4445_v13  ;;  %v4487_v4 = vunpack.c.l.b16 %v4450_v37  ;;  %v4493_v49 = vsel %vm993_vm2, %v4492_v42, %v4476_v59 }
0x17fb   :  { %v4484_v34 = vunpack.c.l.b16 %v4447_v11  ;;  %v4488_v61 = vunpack.c.l.b16 %v4451_v18  ;;  %v4495_v39 = vsel %vm995_vm3, %v4494_v7, %v4493_v49  ;;  %v4496_v0 = vrot.slane %v8469_v54, 5 }
0x17fc   :  { %v4489_v35 = vunpack.c.l.b16 %v4452_v28  ;;  %v4498_v1 = vrot.slane %v4480_v6, 4  ;;  %v4506_v58 = vrot.slane %v4485_v3, 7  ;;  %v4508_v48 = vrot.slane %v4486_v50, 6 }
0x17fd   :  { %v4483_v14 = vunpack.c.l.b16 %v4446_v24  ;;  %v4490_v55 = vunpack.c.l.b16 %v4453_v23  ;;  %v4497_v63 = vsel %vm997_vm4, %v4496_v0, %v4495_v39  ;;  %v4500_v46 = vrot.slane %v4481_v51, 3 }
0x17fe   :  { %v4491_v43 = vunpack.c.l.b16 %v4454_v19  ;;  %v4499_v13 = vsel %vm999_vm5, %v4498_v1, %v4497_v63  ;;  %v4507_v42 = vsel %vm993_vm2, %v4506_v58, %v4484_v34  ;;  %v4510_v27 = vrot.slane %v4487_v4, 5 }
0x17ff   :  { %v4501_v8 = vsel %vm1001_vm6, %v4500_v46, %v4499_v13  ;;  %v4502_v7 = vrot.slane %v4482_v36, 2  ;;  %v4509_v54 = vsel %vm995_vm3, %v4508_v48, %v4507_v42  ;;  %v4512_v20 = vrot.slane %v4488_v61, 4 }
0x1800   :  { %v4511_v11 = vsel %vm997_vm4, %v4510_v27, %v4509_v54  ;;  %v4514_v30 = vrot.slane %v4489_v35, 3  ;;  %v4516_v18 = vrot.slane %v4490_v55, 2  ;;  %v4504_v24 = vrot.slane %v4483_v14, 1 }
0x1801   :  { %v4503_v40 = vsel %vm1003_vm7, %v4502_v7, %v4501_v8  ;;  %v4513_v37 = vsel %vm999_vm5, %v4512_v20, %v4511_v11  ;;  %v4518_v59 = vrot.slane %v4491_v43, 1 }
0x1802   :  { %v4515_v28 = vsel %vm1001_vm6, %v4514_v30, %v4513_v37  ;;  %v4505_v23 = vsel %vm1005_vm8, %v4504_v24, %v4503_v40 }
0x1803   :  { %v4517_v6 = vsel %vm1003_vm7, %v4516_v18, %v4515_v28 }
0x1804   :  { %v4519_v51 = vsel %vm1005_vm8, %v4518_v59, %v4517_v6 }
0x1805   :  { %v4520_v3 = vpack.c.b16 %v4519_v51, %v4505_v23 }
0x1807   :  { %6210 = vmatmul.mubr.msk.bf16.vlgmr.msra.gmra.mrb[56].mxu1 %vm795_vm11, %v4520_v3 }
0x1808   :  { %6215 = vmatprep.mubr.msk.bf16.mxu1 %vm6362_vm9, %v9308_v60 }
0x18da   :  { %v4570_v50 = vpop.f32.mrb[56].mxu1 }
0x18db   :  { %v4577_v19 = vpack.c.bf16 %v4570_v50, %v4570_v50  ;;  %v6211_v36 = vpop.f32.mrb[57].mxu1 }
0x18dc   :  { %v4573_v4 = vpop.f32.mrb[58].mxu1 }
0x18dd   :  { %v4578_v49 = vpack.c.bf16 %v4573_v4, %v4573_v4  ;;  %4580 = vrot.lane.b32.xlu0 %v4577_v19, %s6363_s16  ;;  %v6212_v34 = vpop.f32.mrb[59].mxu1 }
0x18df   :  { %4629 = vrot.lane.b32.xlu1 %v4578_v49, %s6363_s16 }
0x194f   :  { %v4581_v61 = vpop.permute.xlu0 %4580 }
0x1950   :  { %v4586_v39 = vsel %vm795_vm11, %v4581_v61, 0 }
0x1951   :  { %6214 = vmatpush3.bf16.xpose.msra.mxu1 %v4586_v39  ;;  %v4630_v0 = vpop.permute.xlu1 %4629 }
0x1952   :  { %v4635_v35 = vsel %vm795_vm11, %v4630_v0, 0  ;;  %6225 = vmatprep.subr.bf16.mxu1 %v9308_v60  ;;  %v6298_v0 = vld [vmem:[%s9250_s6 + $0x28] sm:$0xff]  }
0x1953   :  { %6220 = vmatpush3.bf16.xpose.msra.mxu0 %v4635_v35 }
0x1954   :  { %6231 = vmatprep.subr.bf16.mxu0 %v9308_v60 }
0x1958   :  { %6216 = vmatmul.mubr.msk.bf16.vlgmr.msra.gmra.mrb[60].mxu1 %vm795_vm11, %v4577_v19 }
0x1959   :  { %6227 = vmatprep.mubr.msk.bf16.mxu1 %vm6362_vm9, %v9308_v60 }
0x195a   :  { %6222 = vmatmul.mubr.msk.bf16.vlgmr.msra.gmra.mrb[76].mxu0 %vm795_vm11, %v4578_v49 }
0x195b   :  { %6233 = vmatprep.mubr.msk.bf16.mxu0 %vm6362_vm9, %v9308_v60 }
0x1a2b   :  { %v4622_v1 = vpop.f32.mrb[60].mxu1 }
0x1a2c   :  { %v4677_v58 = vmul.f32 0.17677669, %v4622_v1  ;;  %v6217_v48 = vpop.f32.mrb[61].mxu1 }
0x1a2d   :  { %v4625_v14 = vpop.f32.mrb[62].mxu1  ;;  %v4671_v55 = vpop.f32.mrb[76].mxu0 }
0x1a2e   :  { %v4678_v63 = vmul.f32 0.17677669, %v4671_v55  ;;  %v6218_v46 = vpop.f32.mrb[63].mxu1  ;;  %v6223_v43 = vpop.f32.mrb[77].mxu0  ;;  %v4679_v13 = vsel %vm73_vm1, %v4677_v58, -inf }
0x1a2f   :  { %4680 = vmax.xlane.f32.xlu1 %v4679_v13  ;;  %v4674_v42 = vpop.f32.mrb[78].mxu0 }
0x1a30   :  { %v6224_v27 = vpop.f32.mrb[79].mxu0  ;;  %v4682_v8 = vsel %vm73_vm1, %v4678_v63, -inf }
0x1a31   :  { %4683 = vmax.xlane.f32.xlu0 %v4682_v8 }
0x1abc   :  { %v4681_v7 = vpop.xlane.xlu1 %4680 }
0x1abd   :  { %v4685_v54 = vsub.f32 %v4677_v58, %v4681_v7 }
0x1abe   :  { %v4684_v20 = vpop.xlane.xlu0 %4683 }
0x1abf   :  { %v4687_v11 = vmul.f32 1.442695, %v4685_v54  ;;  %v4686_v30 = vsub.f32 %v4678_v63, %v4684_v20 }
0x1ac1   :  { %6345 = vpow2.f32 %v4687_v11  ;;  %v4689_v40 = vmul.f32 1.442695, %v4686_v30 }
0x1ac3   :  { %6347 = vpow2.f32 %v4689_v40 }
0x1acb   :  { %v6346_v37 = vpop.eup %6345 }
0x1acc   :  { %v4691_v18 = vsel %vm73_vm1, %v6346_v37, 0.0 }
0x1acd   :  { %v6348_v24 = vpop.eup %6347  ;;  %4692 = vadd.xlane.f32.xlu0 %v4691_v18 }
0x1ace   :  { %v4694_v28 = vsel %vm73_vm1, %v6348_v24, 0.0 }
0x1acf   :  { %4695 = vadd.xlane.f32.xlu1 %v4694_v28 }
0x1ae0   :  { %4751 = vrot.lane.b32.xlu1 %v4578_v49, %s6364_s17 }
0x1ae3   :  { %4703 = vrot.lane.b32.xlu0 %v4577_v19, %s6364_s17  ;;  %v6297_v19 = vld [vmem:[%s9250_s6 + $0x20] sm:$0xff]  }
0x1b5a   :  { %v4693_v59 = vpop.xlane.xlu0 %4692 }
0x1b5b   :  { %6349 = vrcp.f32 %v4693_v59 }
0x1b5c   :  { %v4696_v6 = vpop.xlane.xlu1 %4695 }
0x1b5d   :  { %6351 = vrcp.f32 %v4696_v6 }
0x1b5e   :  { %v4704_v23 = vpop.permute.xlu0 %4703 }
0x1b5f   :  { %v4709_v51 = vsel %vm336_vm0, %v4704_v23, 0 }
0x1b60   :  { %v4752_v3 = vpop.permute.xlu1 %4751  ;;  %6226 = vmatpush3.bf16.msra.mxu1 %v4709_v51 }
0x1b61   :  { %v4757_v50 = vsel %vm336_vm0, %v4752_v3, 0  ;;  %6237 = vmatprep.subr.bf16.mxu1 %v9308_v60 }
0x1b62   :  { %6232 = vmatpush3.bf16.msra.mxu0 %v4757_v50 }
0x1b63   :  { %6245 = vmatprep.subr.bf16.mxu0 %v9308_v60 }
0x1b65   :  { %v6350_v36 = vpop.eup %6349 }
0x1b66   :  { %v4699_v4 = vmul.f32 %v6350_v36, %v6346_v37 }
0x1b67   :  { %v6352_v49 = vpop.eup %6351 }
0x1b68   :  { %v4700_v34 = vmul.f32 %v6352_v49, %v6348_v24  ;;  %v4701_v61 = vpack.c.bf16 %v4699_v4, %v4699_v4 }
0x1b6a   :  { %6228 = vmatmul.mubr.msk.bf16.vlgmr.msra.gmra.mrb[64].mxu1 %vm73_vm1, %v4701_v61  ;;  %v4702_v39 = vpack.c.bf16 %v4700_v34, %v4700_v34 }
0x1b6b   :  { %6238 = vmatpush3.bf16.msra.mxu1 %v6297_v19  ;;  %6241 = vmatprep.mubr.msk.bf16.mxu1 %vm6362_vm9, %v9308_v60 }
0x1b6c   :  { %6234 = vmatmul.mubr.msk.bf16.vlgmr.msra.gmra.mrb[80].mxu0 %vm73_vm1, %v4702_v39  ;;  %6239 = vmatprep.subr.bf16.mxu1 %v9308_v60 }
0x1b6d   :  { %6249 = vmatprep.mubr.msk.bf16.mxu0 %vm6362_vm9, %v9308_v60 }
0x1b6f   :  { %6240 = vmatpush3.bf16.msra.mxu1 %v6298_v0 }
0x1b70   :  { %6253 = vmatprep.subr.bf16.mxu1 %v9308_v60 }
0x1c3d   :  { %v4745_v35 = vpop.f32.mrb[64].mxu1 }
0x1c3e   :  { %v6229_v1 = vpop.f32.mrb[65].mxu1 }
0x1c3f   :  { %v4748_v58 = vpop.f32.mrb[66].mxu1  ;;  %v4793_v48 = vpop.f32.mrb[80].mxu0 }
0x1c40   :  { %v4799_v14 = vpack.c.bf16 %v4793_v48, %v4745_v35  ;;  %v6230_v55 = vpop.f32.mrb[67].mxu1  ;;  %v6235_v63 = vpop.f32.mrb[81].mxu0 }
0x1c41   :  { %v4796_v46 = vpop.f32.mrb[82].mxu0 }
0x1c42   :  { %v6236_v43 = vpop.f32.mrb[83].mxu0  ;;  %6242 = vmatmul.mubr.msk.bf16.vlgmr.msra.gmra.mrb[68].mxu1 %vm795_vm11, %v4799_v14 }
0x1c43   :  { %6261 = vmatprep.mubr.msk.bf16.mxu1 %vm6362_vm9, %v9308_v60 }
0x1d15   :  { %v4854_v13 = vpop.f32.mrb[68].mxu1 }
0x1d16   :  { %v4863_v42 = vrot.slane %v4854_v13, 1  ;;  %v4864_v27 = vrot.slane %v4854_v13, 2  ;;  %v4865_v8 = vrot.slane %v4854_v13, 3  ;;  %v6243_v7 = vpop.f32.mrb[69].mxu1  ;;  %v4866_v54 = vrot.slane %v4854_v13, 4 }
0x1d17   :  { %v4857_v20 = vpop.f32.mrb[70].mxu1  ;;  %v4867_v11 = vrot.slane %v4854_v13, 5  ;;  %v4868_v30 = vrot.slane %v4854_v13, 6  ;;  %v4869_v40 = vrot.slane %v4854_v13, 7  ;;  %v8550_v28 = vadd.f32 %v4854_v13, %v8198_v15 }
0x1d18   :  { %v8547_v37 = vadd.f32 %v4863_v42, %v8202_v29  ;;  %v4870_v18 = vrot.slane %v4857_v20, 1  ;;  %v6244_v24 = vpop.f32.mrb[71].mxu1  ;;  %v8553_v59 = vadd.f32 %v4864_v27, %v8206_v21  ;;  %v8556_v6 = vadd.f32 %v4865_v8, %v8210_v2 }
0x1d19   :  { %v8559_v23 = vadd.f32 %v4866_v54, %v8214_v32  ;;  %v8562_v51 = vadd.f32 %v4867_v11, %v8218_v38  ;;  %v4871_v3 = vrot.slane %v4857_v20, 2  ;;  %v4872_v29 = vrot.slane %v4857_v20, 3 }
0x1d1a   :  { %v8565_v50 = vadd.f32 %v4868_v30, %v8222_v22  ;;  %v4925_v15 = vrot.slane %v8547_v37, 7  ;;  %v8569_v36 = vadd.f32 %v4870_v18, %v8294_v26  ;;  %v8572_v21 = vadd.f32 %v4869_v40, %v8226_v17 }
0x1d1b   :  { %9309 = vst [vmem:[#allocation8_spill] sm:$0xff] %v8562_v51  ;;  %v4927_v2 = vrot.slane %v8553_v59, 6  ;;  %v4929_v32 = vrot.slane %v8556_v6, 5  ;;  %v4931_v4 = vrot.slane %v8559_v23, 4  ;;  %v4933_v22 = vrot.slane %v8562_v51, 3 }
0x1d1c   :  { %9310 = vst [vmem:[#allocation9_spill] sm:$0xff] %v8565_v50  ;;  %9311 = vst [vmem:[#allocation10_spill] sm:$0xff] %v8569_v36  ;;  %v4926_v38 = vsel %vm993_vm2, %v4925_v15, %v8550_v28  ;;  %v4873_v49 = vrot.slane %v4857_v20, 4  ;;  %v4935_v26 = vrot.slane %v8565_v50, 2  ;;  %v4874_v34 = vrot.slane %v4857_v20, 5 }
0x1d1d   :  { %9312 = vst [vmem:[#allocation11_spill] sm:$0xff] %v8572_v21  ;;  %v4928_v19 = vsel %vm995_vm3, %v4927_v2, %v4926_v38  ;;  %v4875_v61 = vrot.slane %v4857_v20, 6  ;;  %v4876_v39 = vrot.slane %v4857_v20, 7  ;;  %v8584_v0 = vadd.f32 %v4871_v3, %v8298_v12 }
0x1d1e   :  { %v4930_v17 = vsel %vm997_vm4, %v4929_v32, %v4928_v19  ;;  %v8587_v35 = vadd.f32 %v4872_v29, %v8302_v10  ;;  %v4937_v58 = vrot.slane %v8572_v21, 1  ;;  %v8592_v48 = vadd.f32 %v4857_v20, %v8309_v53 }
0x1d1f   :  { %9313 = vst [vmem:[#allocation12_spill] sm:$0xff] %v8584_v0  ;;  %v4932_v1 = vsel %vm999_vm5, %v4931_v4, %v4930_v17  ;;  %v8595_v14 = vadd.f32 %v4873_v49, %v8306_v9  ;;  %v8599_v63 = vadd.f32 %v4874_v34, %v8313_v31  ;;  %v4939_v12 = vrot.slane %v8569_v36, 7 }
0x1d20   :  { %9314 = vst [vmem:[#allocation13_spill] sm:$0xff] %v8587_v35  ;;  %9315 = vst [vmem:[#allocation14_spill] sm:$0xff] %v8592_v48  ;;  %v4934_v55 = vsel %vm1001_vm6, %v4933_v22, %v4932_v1  ;;  %v4941_v10 = vrot.slane %v8584_v0, 6  ;;  %v8605_v43 = vadd.f32 %v4875_v61, %v8319_v52  ;;  %v8609_v13 = vadd.f32 %v4876_v39, %v8323_v33 }
0x1d21   :  { %9316 = vst [vmem:[#allocation15_spill] sm:$0xff] %v8595_v14  ;;  %9317 = vst [vmem:[#allocation16_spill] sm:$0xff] %v8599_v63  ;;  %v4936_v46 = vsel %vm1003_vm7, %v4935_v26, %v4934_v55  ;;  %v4940_v9 = vsel %vm993_vm2, %v4939_v12, %v8592_v48  ;;  %v4943_v31 = vrot.slane %v8587_v35, 5  ;;  %v4945_v8 = vrot.slane %v8595_v14, 4 }
0x1d22   :  { %9318 = vst [vmem:[#allocation17_spill] sm:$0xff] %v8605_v43  ;;  %v4938_v53 = vsel %vm1005_vm8, %v4937_v58, %v4936_v46  ;;  %9319 = vst [vmem:[#allocation18_spill] sm:$0xff] %v8609_v13  ;;  %v4942_v27 = vsel %vm995_vm3, %v4941_v10, %v4940_v9  ;;  %v4947_v7 = vrot.slane %v8599_v63, 3  ;;  %v4949_v33 = vrot.slane %v8605_v43, 2  ;;  %v9320_v58 = vld [vmem:[#allocation2_spill] sm:$0xff]  ;;  %v9321_v10 = vld [vmem:[#allocation3_spill] sm:$0xff] }
0x1d23   :  { %v4955_v42 = vsel %vm795_vm11, %v4938_v53, 0.0  ;;  %v4944_v52 = vsel %vm997_vm4, %v4943_v31, %v4942_v27  ;;  %v4951_v11 = vrot.slane %v8609_v13, 1  ;;  %v3904_v24 = vrot.slane %v8153_v57, 7 }
0x1d24   :  { %4956 = vadd.xlane.f32.xlu1 %v4955_v42  ;;  %v4946_v54 = vsel %vm999_vm5, %v4945_v8, %v4944_v52  ;;  %v3906_v3 = vrot.slane %v8156_v45, 6  ;;  %v3908_v2 = vrot.slane %v8159_v5, 5  ;;  %v3910_v38 = vrot.slane %v8162_v62, 4 }
0x1d25   :  { %v4948_v20 = vsel %vm1001_vm6, %v4947_v7, %v4946_v54  ;;  %v3905_v29 = vsel %vm993_vm2, %v3904_v24, %v8145_v25  ;;  %v3918_v4 = vrot.slane %v8243_v44, 7  ;;  %v3912_v49 = vrot.slane %v8165_v56, 3 }
0x1d26   :  { %v4950_v30 = vsel %vm1003_vm7, %v4949_v33, %v4948_v20  ;;  %v3907_v15 = vsel %vm995_vm3, %v3906_v3, %v3905_v29  ;;  %v3920_v19 = vrot.slane %v8246_v41, 6  ;;  %v3914_v17 = vrot.slane %v8168_v47, 2 }
0x1d27   :  { %v4952_v40 = vsel %vm1005_vm8, %v4951_v11, %v4950_v30  ;;  %v3909_v32 = vsel %vm997_vm4, %v3908_v2, %v3907_v15  ;;  %v3919_v34 = vsel %vm993_vm2, %v3918_v4, %v8239_v16  ;;  %v3922_v46 = vrot.slane %v9321_v10, 5 }
0x1d28   :  { %v4958_v18 = vsel %vm795_vm11, %v4952_v40, 0.0  ;;  %v3911_v22 = vsel %vm999_vm5, %v3910_v38, %v3909_v32  ;;  %v3921_v12 = vsel %vm995_vm3, %v3920_v19, %v3919_v34 }
0x1d29   :  { %4959 = vadd.xlane.f32.xlu0 %v4958_v18  ;;  %v3913_v26 = vsel %vm1001_vm6, %v3912_v49, %v3911_v22  ;;  %v3923_v3 = vsel %vm997_vm4, %v3922_v46, %v3921_v12 }
0x1d2a   :  { %v8643_v1 = vsel %vm1003_vm7, %v3914_v17, %v3913_v26 }
0x1db1   :  { %v4957_v61 = vpop.xlane.xlu1 %4956 }
0x1db2   :  { %v4961_v39 = vmul.f32 0.03125, %v4957_v61 }
0x1db4   :  { %v4965_v53 = vrot.slane %v4961_v39, 1  ;;  %v4966_v9 = vrot.slane %v4961_v39, 2  ;;  %v4967_v31 = vrot.slane %v4961_v39, 3  ;;  %v4968_v42 = vrot.slane %v4961_v39, 4 }
0x1db5   :  { %v4969_v27 = vrot.slane %v4961_v39, 5  ;;  %v4970_v8 = vrot.slane %v4961_v39, 6  ;;  %v4971_v52 = vrot.slane %v4961_v39, 7  ;;  %v8649_v7 = vsub.f32 %v8550_v28, %v4961_v39 }
0x1db6   :  { %v8652_v54 = vsub.f32 %v8547_v37, %v4965_v53  ;;  %v8655_v33 = vsub.f32 %v8553_v59, %v4966_v9  ;;  %v8658_v20 = vsub.f32 %v8556_v6, %v4967_v31  ;;  %v8661_v11 = vsub.f32 %v8559_v23, %v4968_v42  ;;  %v4960_v30 = vpop.xlane.xlu0 %4959 }
0x1db7   :  { %v8664_v40 = vsub.f32 %v8562_v51, %v4969_v27  ;;  %v8667_v18 = vsub.f32 %v8565_v50, %v4970_v8  ;;  %v8670_v24 = vsub.f32 %v8572_v21, %v4971_v52  ;;  %v4962_v29 = vmul.f32 0.03125, %v4960_v30 }
0x1db8   :  { %v5012_v15 = vmul.f32 %v8652_v54, %v8652_v54  ;;  %v5013_v2 = vmul.f32 %v8655_v33, %v8655_v33  ;;  %v5014_v32 = vmul.f32 %v8658_v20, %v8658_v20  ;;  %v5011_v38 = vmul.f32 %v8649_v7, %v8649_v7 }
0x1db9   :  { %v5015_v4 = vmul.f32 %v8661_v11, %v8661_v11  ;;  %v5016_v22 = vmul.f32 %v8664_v40, %v8664_v40  ;;  %v5017_v49 = vmul.f32 %v8667_v18, %v8667_v18  ;;  %v5018_v19 = vmul.f32 %v8670_v24, %v8670_v24 }
0x1dba   :  { %v5043_v26 = vrot.slane %v5012_v15, 7  ;;  %v5045_v34 = vrot.slane %v5013_v2, 6  ;;  %v4972_v61 = vrot.slane %v4962_v29, 1  ;;  %v5047_v17 = vrot.slane %v5014_v32, 5 }
0x1dbb   :  { %v5049_v39 = vrot.slane %v5015_v4, 4  ;;  %v5051_v12 = vrot.slane %v5016_v22, 3  ;;  %v5053_v46 = vrot.slane %v5017_v49, 2  ;;  %v4973_v9 = vrot.slane %v4962_v29, 2 }
0x1dbc   :  { %v5044_v53 = vsel %vm993_vm2, %v5043_v26, %v5011_v38  ;;  %v4974_v31 = vrot.slane %v4962_v29, 3  ;;  %v4975_v42 = vrot.slane %v4962_v29, 4  ;;  %v4976_v8 = vrot.slane %v4962_v29, 5 }
0x1dbd   :  { %v5046_v27 = vsel %vm995_vm3, %v5045_v34, %v5044_v53  ;;  %v4977_v52 = vrot.slane %v4962_v29, 6  ;;  %v4978_v30 = vrot.slane %v4962_v29, 7  ;;  %v8693_v15 = vsub.f32 %v8592_v48, %v4962_v29 }
0x1dbe   :  { %v5048_v55 = vsel %vm997_vm4, %v5047_v17, %v5046_v27  ;;  %v8696_v2 = vsub.f32 %v8569_v36, %v4972_v61  ;;  %v8699_v32 = vsub.f32 %v8584_v0, %v4973_v9  ;;  %v8703_v4 = vsub.f32 %v8587_v35, %v4974_v31  ;;  %v9322_v31 = vld [vmem:[#allocation4_spill] sm:$0xff] }
0x1dbf   :  { %v5050_v38 = vsel %vm999_vm5, %v5049_v39, %v5048_v55  ;;  %v8706_v22 = vsub.f32 %v8595_v14, %v4975_v42  ;;  %v8709_v49 = vsub.f32 %v8599_v63, %v4976_v8  ;;  %v5055_v26 = vrot.slane %v5018_v19, 1 }
0x1dc0   :  { %v5052_v29 = vsel %vm1001_vm6, %v5051_v12, %v5050_v38  ;;  %v8713_v34 = vsub.f32 %v8605_v43, %v4977_v52  ;;  %v8716_v61 = vsub.f32 %v8609_v13, %v4978_v30  ;;  %v5020_v17 = vmul.f32 %v8696_v2, %v8696_v2  ;;  %v9324_v43 = vld [vmem:[#allocation5_spill] sm:$0xff] }
0x1dc1   :  { %v5054_v55 = vsel %vm1003_vm7, %v5053_v46, %v5052_v29  ;;  %v5021_v39 = vmul.f32 %v8699_v32, %v8699_v32  ;;  %v5022_v53 = vmul.f32 %v8703_v4, %v8703_v4  ;;  %v5019_v19 = vmul.f32 %v8693_v15, %v8693_v15 }
0x1dc2   :  { %v5056_v12 = vsel %vm1005_vm8, %v5055_v26, %v5054_v55  ;;  %v5023_v9 = vmul.f32 %v8706_v22, %v8706_v22  ;;  %v3924_v42 = vrot.slane %v9322_v31, 4  ;;  %v5024_v27 = vmul.f32 %v8709_v49, %v8709_v49 }
0x1dc3   :  { %v5073_v46 = vsel %vm795_vm11, %v5056_v12, 0.0  ;;  %v5057_v8 = vrot.slane %v5020_v17, 7  ;;  %v5059_v52 = vrot.slane %v5021_v39, 6  ;;  %v5025_v30 = vmul.f32 %v8713_v34, %v8713_v34 }
0x1dc4   :  { %5074 = vadd.xlane.f32.xlu0 %v5073_v46  ;;  %v9323_v38 = vrot.slane %v9320_v58, 1  ;;  %v3925_v26 = vsel %vm999_vm5, %v3924_v42, %v3923_v3  ;;  %v5026_v55 = vmul.f32 %v8716_v61, %v8716_v61  ;;  %v5061_v13 = vrot.slane %v5022_v53, 5 }
0x1dc5   :  { %v5058_v12 = vsel %vm993_vm2, %v5057_v8, %v5019_v19  ;;  %v3926_v17 = vrot.slane %v9324_v43, 3  ;;  %v5063_v46 = vrot.slane %v5023_v9, 4  ;;  %v5065_v14 = vrot.slane %v5024_v27, 3  ;;  %v9326_v27 = vld [vmem:[#allocation7_spill] sm:$0xff] }
0x1dc6   :  { %v3917_v29 = vsel %vm1005_vm8, %v9323_v38, %v8643_v1  ;;  %v5060_v39 = vsel %vm995_vm3, %v5059_v52, %v5058_v12  ;;  %v5067_v42 = vrot.slane %v5025_v30, 2  ;;  %v9325_v38 = vld [vmem:[#allocation6_spill] sm:$0xff]  ;;  %v5069_v19 = vrot.slane %v5026_v55, 1 }
0x1dc7   :  { %v5062_v63 = vsel %vm997_vm4, %v5061_v13, %v5060_v39  ;;  %v3934_v35 = vsel %vm795_vm11, %v3917_v29, 0.0  ;;  %v3927_v1 = vsel %vm1001_vm6, %v3926_v17, %v3925_v26  ;;  %v3928_v0 = vrot.slane %v9325_v38, 2 }
0x1dc8   :  { %v5064_v3 = vsel %vm999_vm5, %v5063_v46, %v5062_v63  ;;  %3935 = vadd.xlane.f32.xlu0 %v3934_v35  ;;  %v3930_v52 = vrot.slane %v9326_v27, 1 }
0x1dc9   :  { %v5066_v53 = vsel %vm1001_vm6, %v5065_v14, %v5064_v3  ;;  %v3929_v9 = vsel %vm1003_vm7, %v3928_v0, %v3927_v1  ;;  %v6299_v14 = vld [vmem:[%s9251_s7 + $0x20] sm:$0xff]   ;;  %v6300_v0 = vld [vmem:[%s9251_s7 + $0x28] sm:$0xff]  }
0x1dca   :  { %v5068_v8 = vsel %vm1003_vm7, %v5067_v42, %v5066_v53  ;;  %v3931_v63 = vsel %vm1005_vm8, %v3930_v52, %v3929_v9  ;;  %6246 = vmatpush3.bf16.msra.mxu0 %v6299_v14 }
0x1dcb   :  { %v5070_v13 = vsel %vm1005_vm8, %v5069_v19, %v5068_v8  ;;  %v3937_v35 = vsel %vm795_vm11, %v3931_v63, 0.0  ;;  %6247 = vmatprep.subr.bf16.mxu0 %v9308_v60 }
0x1dcc   :  { %v5076_v29 = vsel %vm795_vm11, %v5070_v13, 0.0 }
0x1dcd   :  { %5077 = vadd.xlane.f32.xlu1 %v5076_v29 }
0x1dce   :  { %6248 = vmatpush3.bf16.msra.mxu0 %v6300_v0 }
0x1dd1   :  { %3938 = vadd.xlane.f32.xlu1 %v3937_v35 }
0x1e51   :  { %v5075_v30 = vpop.xlane.xlu0 %5074 }
0x1e52   :  { %v5079_v26 = vmul.f32 0.03125, %v5075_v30 }
0x1e54   :  { %v5081_v17 = vadd.f32 1e-05, %v5079_v26 }
0x1e55   :  { %v3936_v55 = vpop.xlane.xlu0 %3935 }
0x1e56   :  { %v3940_v12 = vmul.f32 0.03125, %v3936_v55  ;;  %6353 = vrsqrt.f32 %v5081_v17 }
0x1e58   :  { %v3944_v39 = vrot.slane %v3940_v12, 1  ;;  %v3945_v46 = vrot.slane %v3940_v12, 2  ;;  %v3946_v1 = vrot.slane %v3940_v12, 3  ;;  %v3947_v3 = vrot.slane %v3940_v12, 4 }
0x1e59   :  { %v3948_v42 = vrot.slane %v3940_v12, 5  ;;  %v3949_v53 = vrot.slane %v3940_v12, 6  ;;  %v3950_v19 = vrot.slane %v3940_v12, 7  ;;  %v8767_v8 = vsub.f32 %v8145_v25, %v3940_v12 }
0x1e5a   :  { %v5078_v9 = vpop.xlane.xlu1 %5077  ;;  %v8770_v13 = vsub.f32 %v8153_v57, %v3944_v39  ;;  %v8773_v52 = vsub.f32 %v8156_v45, %v3945_v46  ;;  %v8776_v29 = vsub.f32 %v8159_v5, %v3946_v1  ;;  %v8779_v63 = vsub.f32 %v8162_v62, %v3947_v3 }
0x1e5b   :  { %v5080_v35 = vmul.f32 0.03125, %v5078_v9  ;;  %v8782_v14 = vsub.f32 %v8165_v56, %v3948_v42  ;;  %v8785_v25 = vsub.f32 %v8168_v47, %v3949_v53  ;;  %v8788_v0 = vsub.f32 %v9320_v58, %v3950_v19 }
0x1e5c   :  { %v3991_v57 = vmul.f32 %v8770_v13, %v8770_v13  ;;  %v3992_v45 = vmul.f32 %v8773_v52, %v8773_v52  ;;  %v3993_v5 = vmul.f32 %v8776_v29, %v8776_v29  ;;  %v3994_v56 = vmul.f32 %v8779_v63, %v8779_v63 }
0x1e5d   :  { %v5082_v62 = vadd.f32 1e-05, %v5080_v35  ;;  %v3995_v47 = vmul.f32 %v8782_v14, %v8782_v14  ;;  %v3996_v58 = vmul.f32 %v8785_v25, %v8785_v25  ;;  %v3990_v26 = vmul.f32 %v8767_v8, %v8767_v8 }
0x1e5e   :  { %v3939_v30 = vpop.xlane.xlu1 %3938  ;;  %v3997_v55 = vmul.f32 %v8788_v0, %v8788_v0  ;;  %v4022_v12 = vrot.slane %v3991_v57, 7  ;;  %v4024_v17 = vrot.slane %v3992_v45, 6  ;;  %v4026_v46 = vrot.slane %v3993_v5, 5 }
0x1e5f   :  { %6355 = vrsqrt.f32 %v5082_v62  ;;  %v3941_v39 = vmul.f32 0.03125, %v3939_v30  ;;  %v4028_v1 = vrot.slane %v3994_v56, 4  ;;  %v4030_v42 = vrot.slane %v3995_v47, 3 }
0x1e60   :  { %v4023_v3 = vsel %vm993_vm2, %v4022_v12, %v3990_v26  ;;  %v4032_v53 = vrot.slane %v3996_v58, 2  ;;  %v4034_v19 = vrot.slane %v3997_v55, 1  ;;  %v6354_v12 = vpop.eup %6353 }
0x1e61   :  { %v4025_v9 = vsel %vm995_vm3, %v4024_v17, %v4023_v3  ;;  %v3951_v35 = vrot.slane %v3941_v39, 1  ;;  %v3952_v36 = vrot.slane %v3941_v39, 2  ;;  %v3953_v48 = vrot.slane %v3941_v39, 3 }
0x1e62   :  { %v4027_v21 = vsel %vm997_vm4, %v4026_v46, %v4025_v9  ;;  %v3954_v50 = vrot.slane %v3941_v39, 4  ;;  %v3955_v51 = vrot.slane %v3941_v39, 5  ;;  %v3956_v57 = vrot.slane %v3941_v39, 6 }
0x1e63   :  { %v4029_v45 = vsel %vm999_vm5, %v4028_v1, %v4027_v21  ;;  %v3957_v62 = vrot.slane %v3941_v39, 7  ;;  %v8811_v5 = vsub.f32 %v8239_v16, %v3941_v39  ;;  %v8814_v56 = vsub.f32 %v8243_v44, %v3951_v35 }
0x1e64   :  { %v4031_v47 = vsel %vm1001_vm6, %v4030_v42, %v4029_v45  ;;  %v8818_v58 = vsub.f32 %v8246_v41, %v3952_v36  ;;  %v8821_v30 = vsub.f32 %v9321_v10, %v3953_v48  ;;  %v8824_v26 = vsub.f32 %v9322_v31, %v3954_v50 }
0x1e65   :  { %v4033_v21 = vsel %vm1003_vm7, %v4032_v53, %v4031_v47  ;;  %v8828_v55 = vsub.f32 %v9324_v43, %v3955_v51  ;;  %v8831_v16 = vsub.f32 %v9325_v38, %v3956_v57  ;;  %v8834_v44 = vsub.f32 %v9326_v27, %v3957_v62 }
0x1e66   :  { %v4035_v41 = vsel %vm1005_vm8, %v4034_v19, %v4033_v21  ;;  %v3998_v36 = vmul.f32 %v8811_v5, %v8811_v5  ;;  %v3999_v50 = vmul.f32 %v8814_v56, %v8814_v56  ;;  %v4000_v48 = vmul.f32 %v8818_v58, %v8818_v58 }
0x1e67   :  { %v4052_v51 = vsel %vm795_vm11, %v4035_v41, 0.0  ;;  %v4001_v43 = vmul.f32 %v8821_v30, %v8821_v30  ;;  %v4002_v10 = vmul.f32 %v8824_v26, %v8824_v26  ;;  %v4003_v31 = vmul.f32 %v8828_v55, %v8828_v55 }
0x1e68   :  { %4053 = vadd.xlane.f32.xlu0 %v4052_v51  ;;  %v4004_v38 = vmul.f32 %v8831_v16, %v8831_v16  ;;  %v4005_v27 = vmul.f32 %v8834_v44, %v8834_v44  ;;  %v4036_v17 = vrot.slane %v3999_v50, 7  ;;  %v4038_v39 = vrot.slane %v4000_v48, 6 }
0x1e69   :  { %v6356_v46 = vpop.eup %6355  ;;  %v4040_v3 = vrot.slane %v4001_v43, 5  ;;  %v4042_v42 = vrot.slane %v4002_v10, 4  ;;  %v4044_v19 = vrot.slane %v4003_v31, 3  ;;  %v5087_v35 = vrot.slane %v6354_v12, 1 }
0x1e6a   :  { %v4037_v1 = vsel %vm993_vm2, %v4036_v17, %v3998_v36  ;;  %v4046_v9 = vrot.slane %v4004_v38, 2  ;;  %v4048_v45 = vrot.slane %v4005_v27, 1  ;;  %v5088_v62 = vrot.slane %v6354_v12, 2 }
0x1e6b   :  { %v4039_v53 = vsel %vm995_vm3, %v4038_v39, %v4037_v1  ;;  %v5089_v47 = vrot.slane %v6354_v12, 3  ;;  %v5090_v41 = vrot.slane %v6354_v12, 4  ;;  %v5091_v50 = vrot.slane %v6354_v12, 5 }
0x1e6c   :  { %v4041_v57 = vsel %vm997_vm4, %v4040_v3, %v4039_v53  ;;  %v5092_v48 = vrot.slane %v6354_v12, 6  ;;  %v5093_v36 = vrot.slane %v6354_v12, 7  ;;  %v5094_v43 = vrot.slane %v6356_v46, 1 }
0x1e6d   :  { %v4043_v21 = vsel %vm999_vm5, %v4042_v42, %v4041_v57  ;;  %v5095_v10 = vrot.slane %v6356_v46, 2  ;;  %v5096_v31 = vrot.slane %v6356_v46, 3  ;;  %v5097_v38 = vrot.slane %v6356_v46, 4 }
0x1e6e   :  { %v4045_v51 = vsel %vm1001_vm6, %v4044_v19, %v4043_v21  ;;  %v5098_v39 = vrot.slane %v6356_v46, 5  ;;  %v5099_v27 = vrot.slane %v6356_v46, 6  ;;  %v5118_v3 = vmul.f32 %v5087_v35, %v8652_v54 }
0x1e6f   :  { %v4047_v17 = vsel %vm1003_vm7, %v4046_v9, %v4045_v51  ;;  %v5119_v42 = vmul.f32 %v5088_v62, %v8655_v33  ;;  %v5100_v57 = vrot.slane %v6356_v46, 7  ;;  %v5117_v19 = vmul.f32 %v6354_v12, %v8649_v7  ;;  %v5860_v9 = vld [vmem:[%s9249_s9 + $0x12] ss:$0 sm:$0xff] }
0x1e70   :  { %v4049_v1 = vsel %vm1005_vm8, %v4048_v45, %v4047_v17  ;;  %v5120_v21 = vmul.f32 %v5089_v47, %v8658_v20  ;;  %v5121_v51 = vmul.f32 %v5090_v41, %v8661_v11  ;;  %v5122_v45 = vmul.f32 %v5091_v50, %v8664_v40 }
0x1e71   :  { %v4055_v53 = vsel %vm795_vm11, %v4049_v1, 0.0  ;;  %v5126_v54 = vmul.f32 %v5094_v43, %v8696_v2  ;;  %v5127_v33 = vmul.f32 %v5095_v10, %v8699_v32  ;;  %v5123_v35 = vmul.f32 %v5092_v48, %v8667_v18  ;;  %v5861_v18 = vld [vmem:[%s9249_s9 + $0x13] ss:$0 sm:$0xff] }
0x1e72   :  { %4056 = vadd.xlane.f32.xlu1 %v4055_v53  ;;  %v5124_v62 = vmul.f32 %v5093_v36, %v8670_v24  ;;  %v5125_v7 = vmul.f32 %v6356_v46, %v8693_v15  ;;  %v5128_v20 = vmul.f32 %v5096_v31, %v8703_v4  ;;  %v5129_v12 = vmul.f32 %v5097_v38, %v8706_v22 }
0x1e73   :  { %v5130_v47 = vmul.f32 %v5098_v39, %v8709_v49  ;;  %v5138_v17 = vmul.f32 %v5860_v9, %v5118_v3  ;;  %v5139_v11 = vmul.f32 %v5860_v9, %v5119_v42  ;;  %v5131_v40 = vmul.f32 %v5099_v27, %v8713_v34 }
0x1e74   :  { %v5132_v2 = vmul.f32 %v5100_v57, %v8716_v61  ;;  %v5137_v41 = vmul.f32 %v5860_v9, %v5117_v19  ;;  %v5140_v32 = vmul.f32 %v5860_v9, %v5120_v21  ;;  %v5141_v24 = vmul.f32 %v5860_v9, %v5121_v51 }
0x1e75   :  { %v5142_v15 = vmul.f32 %v5860_v9, %v5122_v45  ;;  %v5146_v46 = vmul.f32 %v5860_v9, %v5126_v54  ;;  %v5147_v4 = vmul.f32 %v5860_v9, %v5127_v33  ;;  %v5143_v50 = vmul.f32 %v5860_v9, %v5123_v35 }
0x1e76   :  { %v5144_v22 = vmul.f32 %v5860_v9, %v5124_v62  ;;  %v5145_v48 = vmul.f32 %v5860_v9, %v5125_v7  ;;  %v5148_v49 = vmul.f32 %v5860_v9, %v5128_v20  ;;  %v5149_v36 = vmul.f32 %v5860_v9, %v5129_v12 }
0x1e77   :  { %v5150_v43 = vmul.f32 %v5860_v9, %v5130_v47  ;;  %v5158_v10 = vadd.f32 %v5861_v18, %v5138_v17  ;;  %v5159_v34 = vadd.f32 %v5861_v18, %v5139_v11  ;;  %v5151_v31 = vmul.f32 %v5860_v9, %v5131_v40 }
0x1e78   :  { %v5152_v61 = vmul.f32 %v5860_v9, %v5132_v2  ;;  %v5157_v38 = vadd.f32 %v5861_v18, %v5137_v41  ;;  %v5160_v39 = vadd.f32 %v5861_v18, %v5140_v32  ;;  %v5161_v1 = vadd.f32 %v5861_v18, %v5141_v24 }
0x1e79   :  { %v5162_v27 = vadd.f32 %v5861_v18, %v5142_v15  ;;  %v5166_v3 = vadd.f32 %v5861_v18, %v5146_v46  ;;  %v5167_v42 = vadd.f32 %v5861_v18, %v5147_v4  ;;  %v5163_v53 = vadd.f32 %v5861_v18, %v5143_v50 }
0x1e7a   :  { %v5164_v57 = vadd.f32 %v5861_v18, %v5144_v22  ;;  %v5165_v19 = vadd.f32 %v5861_v18, %v5145_v48  ;;  %v5168_v21 = vadd.f32 %v5861_v18, %v5148_v49  ;;  %v5169_v51 = vadd.f32 %v5861_v18, %v5149_v36 }
0x1e7b   :  { %v5170_v45 = vadd.f32 %v5861_v18, %v5150_v43  ;;  %v5174_v54 = vpack.c.bf16 %v5158_v10, %v5158_v10  ;;  %v5175_v33 = vpack.c.bf16 %v5159_v34, %v5159_v34  ;;  %v5171_v35 = vadd.f32 %v5861_v18, %v5151_v31 }
0x1e7c   :  { %v5172_v62 = vadd.f32 %v5861_v18, %v5152_v61  ;;  %v5173_v7 = vpack.c.bf16 %v5157_v38, %v5157_v38  ;;  %v5176_v20 = vpack.c.bf16 %v5160_v39, %v5160_v39  ;;  %v5177_v12 = vpack.c.bf16 %v5161_v1, %v5161_v1 }
0x1e7d   :  { %v5178_v9 = vpack.c.bf16 %v5162_v27, %v5162_v27  ;;  %v5182_v47 = vpack.c.bf16 %v5166_v3, %v5166_v3  ;;  %v5183_v17 = vpack.c.bf16 %v5167_v42, %v5167_v42  ;;  %v5179_v11 = vpack.c.bf16 %v5163_v53, %v5163_v53  ;;  %v6301_v3 = vld [vmem:[%s9252_s8 + $0x40] sm:$0xff]  }
0x1e7e   :  { %v5180_v40 = vpack.c.bf16 %v5164_v57, %v5164_v57  ;;  %v5181_v2 = vpack.c.bf16 %v5165_v19, %v5165_v19  ;;  %v5184_v41 = vpack.c.bf16 %v5168_v21, %v5168_v21  ;;  %v5185_v32 = vpack.c.bf16 %v5169_v51, %v5169_v51  ;;  %6254 = vmatpush3.bf16.msra.mxu1 %v6301_v3 }
0x1e7f   :  { %v5186_v24 = vpack.c.bf16 %v5170_v45, %v5170_v45  ;;  %v5215_v15 = vunpack.c.l.b16 %v5174_v54  ;;  %v5216_v46 = vunpack.c.l.b16 %v5175_v33  ;;  %v5187_v4 = vpack.c.bf16 %v5171_v35, %v5171_v35  ;;  %v6302_v33 = vld [vmem:[%s9252_s8 + $0x48] sm:$0xff]   ;;  %6255 = vmatprep.subr.bf16.mxu1 %v9308_v60 }
0x1e80   :  { %v5188_v50 = vpack.c.bf16 %v5172_v62, %v5172_v62  ;;  %v5214_v22 = vunpack.c.l.b16 %v5173_v7  ;;  %v5217_v48 = vunpack.c.l.b16 %v5176_v20  ;;  %v5218_v49 = vunpack.c.l.b16 %v5177_v12 }
0x1e81   :  { %v5219_v18 = vunpack.c.l.b16 %v5178_v9  ;;  %v5223_v36 = vunpack.c.l.b16 %v5182_v47  ;;  %v5224_v43 = vunpack.c.l.b16 %v5183_v17  ;;  %v5220_v10 = vunpack.c.l.b16 %v5179_v11 }
0x1e82   :  { %v5221_v34 = vunpack.c.l.b16 %v5180_v40  ;;  %v5225_v31 = vunpack.c.l.b16 %v5184_v41  ;;  %v5230_v61 = vrot.slane %v5215_v15, 7  ;;  %v5222_v38 = vunpack.c.l.b16 %v5181_v2  ;;  %6256 = vmatpush3.bf16.msra.mxu1 %v6302_v33 }
0x1e83   :  { %v5226_v39 = vunpack.c.l.b16 %v5185_v32  ;;  %v5227_v1 = vunpack.c.l.b16 %v5186_v24  ;;  %v5232_v27 = vrot.slane %v5216_v46, 6  ;;  %v5228_v42 = vunpack.c.l.b16 %v5187_v4  ;;  %6257 = vmatprep.subr.bf16.mxu1 %v9308_v60 }
0x1e84   :  { %v5231_v53 = vsel %vm993_vm2, %v5230_v61, %v5214_v22  ;;  %v5234_v57 = vrot.slane %v5217_v48, 5  ;;  %v5244_v19 = vrot.slane %v5223_v36, 7  ;;  %v5229_v21 = vunpack.c.l.b16 %v5188_v50  ;;  %v6304_v36 = vld [vmem:[%s9252_s8 + $0x58] sm:$0xff]  }
0x1e85   :  { %v5233_v51 = vsel %vm995_vm3, %v5232_v27, %v5231_v53  ;;  %v5236_v45 = vrot.slane %v5218_v49, 4  ;;  %v5246_v54 = vrot.slane %v5224_v43, 6  ;;  %v5238_v62 = vrot.slane %v5219_v18, 3  ;;  %v6303_v18 = vld [vmem:[%s9252_s8 + $0x50] sm:$0xff]  }
0x1e86   :  { %v5235_v35 = vsel %vm997_vm4, %v5234_v57, %v5233_v51  ;;  %v5245_v7 = vsel %vm993_vm2, %v5244_v19, %v5222_v38  ;;  %v5248_v20 = vrot.slane %v5225_v31, 5  ;;  %v5240_v9 = vrot.slane %v5220_v10, 2  ;;  %6258 = vmatpush3.bf16.msra.mxu1 %v6303_v18  ;;  %v5866_v43 = vld [vmem:[%s9249_s9 + $0x14] ss:$0 sm:$0xff] }
0x1e87   :  { %v5237_v12 = vsel %vm999_vm5, %v5236_v45, %v5235_v35  ;;  %v5247_v47 = vsel %vm995_vm3, %v5246_v54, %v5245_v7  ;;  %v5250_v17 = vrot.slane %v5226_v39, 4  ;;  %v5252_v2 = vrot.slane %v5227_v1, 3  ;;  %6259 = vmatprep.subr.bf16.mxu1 %v9308_v60 }
0x1e88   :  { %v5239_v11 = vsel %vm1001_vm6, %v5238_v62, %v5237_v12  ;;  %v5249_v40 = vsel %vm997_vm4, %v5248_v20, %v5247_v47  ;;  %v5254_v24 = vrot.slane %v5228_v42, 2  ;;  %v5242_v15 = vrot.slane %v5221_v34, 1 }
0x1e89   :  { %v5241_v41 = vsel %vm1003_vm7, %v5240_v9, %v5239_v11  ;;  %v5251_v32 = vsel %vm999_vm5, %v5250_v17, %v5249_v40  ;;  %v5256_v4 = vrot.slane %v5229_v21, 1  ;;  %v5878_v9 = vld [vmem:[%s9249_s9 + $0x15] ss:$0 sm:$0xff]  ;;  %s6365_s9 = smov 32  }
0x1e8a   :  { %v5253_v46 = vsel %vm1001_vm6, %v5252_v2, %v5251_v32  ;;  %v5243_v22 = vsel %vm1005_vm8, %v5242_v15, %v5241_v41  ;;  %6260 = vmatpush3.bf16.msra.mxu1 %v6304_v36 }
0x1e8b   :  { %v5255_v50 = vsel %vm1003_vm7, %v5254_v24, %v5253_v46 }
0x1e8c   :  { %v5257_v48 = vsel %vm1005_vm8, %v5256_v4, %v5255_v50 }
0x1e8d   :  { %v5258_v49 = vpack.c.b16 %v5257_v48, %v5243_v22 }
0x1e8f   :  { %6250 = vmatmul.mubr.msk.bf16.vlgmr.msra.gmra.mrb[84].mxu0 %vm795_vm11, %v5258_v49 }
0x1ef5   :  { %v4054_v60 = vpop.xlane.xlu0 %4053 }
0x1ef6   :  { %v4058_v42 = vmul.f32 0.03125, %v4054_v60  ;;  %v9334_v60 = vld [vmem:[#allocation9_spill] sm:$0xff] }
0x1ef8   :  { %v4060_v19 = vadd.f32 1e-05, %v4058_v42 }
0x1efa   :  { %6357 = vrsqrt.f32 %v4060_v19 }
0x1eff   :  { %v4057_v53 = vpop.xlane.xlu1 %4056 }
0x1f00   :  { %v4059_v57 = vmul.f32 0.03125, %v4057_v53 }
0x1f02   :  { %v4061_v21 = vadd.f32 1e-05, %v4059_v57 }
0x1f04   :  { %6359 = vrsqrt.f32 %v4061_v21  ;;  %v6358_v51 = vpop.eup %6357 }
0x1f05   :  { %v4066_v54 = vrot.slane %v6358_v51, 1  ;;  %v4067_v33 = vrot.slane %v6358_v51, 2  ;;  %v4068_v35 = vrot.slane %v6358_v51, 3  ;;  %v4069_v62 = vrot.slane %v6358_v51, 4 }
0x1f06   :  { %v4070_v7 = vrot.slane %v6358_v51, 5  ;;  %v4071_v20 = vrot.slane %v6358_v51, 6  ;;  %v4072_v12 = vrot.slane %v6358_v51, 7  ;;  %v8922_v47 = vmul.f32 %v6358_v51, %v8767_v8 }
0x1f07   :  { %v8925_v2 = vmul.f32 %v4066_v54, %v8770_v13  ;;  %v8928_v41 = vmul.f32 %v4067_v33, %v8773_v52  ;;  %v8931_v32 = vmul.f32 %v4068_v35, %v8776_v29  ;;  %v8934_v46 = vmul.f32 %v4069_v62, %v8779_v63 }
0x1f08   :  { %v8937_v8 = vmul.f32 %v4070_v7, %v8782_v14  ;;  %v8940_v4 = vmul.f32 %v4071_v20, %v8785_v25  ;;  %v8943_v13 = vmul.f32 %v4072_v12, %v8788_v0 }
0x1f0a   :  { %9327 = vst [vmem:[#allocation2_spill] sm:$0xff] %v8940_v4  ;;  %9328 = vst [vmem:[#allocation3_spill] sm:$0xff] %v8943_v13 }
0x1f0e   :  { %v6360_v45 = vpop.eup %6359 }
0x1f0f   :  { %v4073_v17 = vrot.slane %v6360_v45, 1  ;;  %v4074_v11 = vrot.slane %v6360_v45, 2  ;;  %v4075_v40 = vrot.slane %v6360_v45, 3  ;;  %v4076_v24 = vrot.slane %v6360_v45, 4 }
0x1f10   :  { %v4077_v22 = vrot.slane %v6360_v45, 5  ;;  %v4078_v48 = vrot.slane %v6360_v45, 6  ;;  %v4079_v29 = vrot.slane %v6360_v45, 7  ;;  %v8946_v18 = vmul.f32 %v6360_v45, %v8811_v5 }
0x1f11   :  { %v8949_v63 = vmul.f32 %v4073_v17, %v8814_v56  ;;  %v8952_v14 = vmul.f32 %v4074_v11, %v8818_v58  ;;  %v8955_v25 = vmul.f32 %v4075_v40, %v8821_v30 }
0x1f12   :  { %9329 = vst [vmem:[#allocation4_spill] sm:$0xff] %v8946_v18  ;;  %v8969_v21 = vmul.f32 %v4077_v22, %v8828_v55  ;;  %v9337_v22 = vld [vmem:[#allocation10_spill] sm:$0xff] }
0x1f13   :  { %9330 = vst [vmem:[#allocation5_spill] sm:$0xff] %v8952_v14  ;;  %9331 = vst [vmem:[#allocation6_spill] sm:$0xff] %v8955_v25 }
0x1f62   :  { %v5308_v10 = vpop.f32.mrb[84].mxu0 }
0x1f63   :  { %v5309_v34 = vadd.f32 %v5866_v43, %v5308_v10  ;;  %v6251_v31 = vpop.f32.mrb[85].mxu0 }
0x1f64   :  { %v5311_v61 = vpop.f32.mrb[86].mxu0 }
0x1f65   :  { %v5312_v38 = vadd.f32 %v5866_v43, %v5311_v61  ;;  %v6252_v39 = vpop.f32.mrb[87].mxu0  ;;  %v5315_v1 = vmax.f32 %v5309_v34, 0.0  ;;  %v8958_v34 = vmul.f32 %v4076_v24, %v8824_v26  ;;  %v9335_v26 = vld [vmem:[#allocation11_spill] sm:$0xff] }
0x1f67   :  { %v5316_v27 = vmax.f32 %v5312_v38, 0.0  ;;  %9332 = vst [vmem:[#allocation7_spill] sm:$0xff] %v8958_v34 }
0x1f69   :  { %v5317_v3 = vpack.c.bf16 %v5316_v27, %v5315_v1  ;;  %v9333_v27 = vld [vmem:[#allocation8_spill] sm:$0xff] }
0x1f6b   :  { %6262 = vmatmul.mubr.msk.bf16.vlgmr.msra.gmra.mrb[72].mxu1 %vm9287_vm10, %v5317_v3 }
0x203e   :  { %v5392_v15 = vpop.f32.mrb[72].mxu1 }
0x203f   :  { %v5393_v50 = vadd.f32 %v5878_v9, %v5392_v15  ;;  %v6263_v52 = vpop.f32.mrb[73].mxu1 }
0x2040   :  { %v5395_v49 = vpop.f32.mrb[74].mxu1 }
0x2041   :  { %v6264_v0 = vpop.f32.mrb[75].mxu1  ;;  %v5401_v36 = vrot.slane %v5393_v50, 1  ;;  %v5402_v43 = vrot.slane %v5393_v50, 2  ;;  %v5403_v10 = vrot.slane %v5393_v50, 3  ;;  %v5404_v31 = vrot.slane %v5393_v50, 4 }
0x2042   :  { %v5405_v61 = vrot.slane %v5393_v50, 5  ;;  %v5406_v5 = vrot.slane %v5393_v50, 6  ;;  %v5407_v38 = vrot.slane %v5393_v50, 7  ;;  %v5431_v56 = vadd.f32 %v5393_v50, %v8550_v28  ;;  %v9336_v50 = vld [vmem:[#allocation14_spill] sm:$0xff] }
0x2043   :  { %v5432_v39 = vadd.f32 %v5401_v36, %v8547_v37  ;;  %v5433_v58 = vadd.f32 %v5402_v43, %v8553_v59  ;;  %v5434_v30 = vadd.f32 %v5403_v10, %v8556_v6  ;;  %v5435_v1 = vadd.f32 %v5404_v31, %v8559_v23  ;;  %v9339_v36 = vld [vmem:[#allocation13_spill] sm:$0xff]  ;;  %v9340_v10 = vld [vmem:[#allocation15_spill] sm:$0xff] }
0x2044   :  { %v5436_v3 = vadd.f32 %v5405_v61, %v9333_v27  ;;  %v5437_v42 = vadd.f32 %v5406_v5, %v9334_v60  ;;  %v5438_v53 = vadd.f32 %v5407_v38, %v9335_v26  ;;  %v5396_v57 = vadd.f32 %v5878_v9, %v5395_v49  ;;  %v9338_v49 = vld [vmem:[#allocation12_spill] sm:$0xff] }
0x2045   :  { %v5621_v19 = vrot.slane %v5432_v39, 7  ;;  %v8972_v28 = vmul.f32 %v4078_v48, %v8831_v16  ;;  %v8975_v37 = vsub.f32 %v5431_v56, %v8922_v47  ;;  %v8978_v59 = vsub.f32 %v5433_v58, %v8928_v41  ;;  %v9341_v5 = vld [vmem:[#allocation16_spill] sm:$0xff] }
0x2046   :  { %v8981_v6 = vsub.f32 %v5434_v30, %v8931_v32  ;;  %v8984_v23 = vmul.f32 %v4079_v29, %v8834_v44  ;;  %v8987_v51 = vsub.f32 %v5435_v1, %v8934_v46  ;;  %v5623_v45 = vrot.slane %v5433_v58, 6 }
0x2047   :  { %v5622_v55 = vsel %vm993_vm2, %v5621_v19, %v5431_v56  ;;  %v5625_v16 = vrot.slane %v5434_v30, 5  ;;  %v5627_v54 = vrot.slane %v5435_v1, 4  ;;  %v5629_v33 = vrot.slane %v5436_v3, 3  ;;  %v9342_v56 = vld [vmem:[#allocation17_spill] sm:$0xff]  ;;  %v9343_v30 = vld [vmem:[#allocation18_spill] sm:$0xff] }
0x2048   :  { %v5631_v35 = vrot.slane %v5437_v42, 2  ;;  %v5633_v62 = vrot.slane %v5438_v53, 1  ;;  %v5624_v7 = vsel %vm995_vm3, %v5623_v45, %v5622_v55  ;;  %v5408_v20 = vrot.slane %v5396_v57, 1 }
0x2049   :  { %v5409_v12 = vrot.slane %v5396_v57, 2  ;;  %v5410_v9 = vrot.slane %v5396_v57, 3  ;;  %v5626_v17 = vsel %vm997_vm4, %v5625_v16, %v5624_v7  ;;  %v5411_v44 = vrot.slane %v5396_v57, 4 }
0x204a   :  { %v5412_v11 = vrot.slane %v5396_v57, 5  ;;  %v5413_v40 = vrot.slane %v5396_v57, 6  ;;  %v5628_v24 = vsel %vm999_vm5, %v5627_v54, %v5626_v17  ;;  %v5414_v15 = vrot.slane %v5396_v57, 7 }
0x204b   :  { %v5439_v52 = vadd.f32 %v5396_v57, %v9336_v50  ;;  %v5440_v48 = vadd.f32 %v5408_v20, %v9337_v22  ;;  %v5630_v29 = vsel %vm1001_vm6, %v5629_v33, %v5628_v24  ;;  %v5441_v0 = vadd.f32 %v5409_v12, %v9338_v49 }
0x204c   :  { %v5442_v43 = vadd.f32 %v5410_v9, %v9339_v36  ;;  %v5443_v31 = vadd.f32 %v5411_v44, %v9340_v10  ;;  %v5632_v61 = vsel %vm1003_vm7, %v5631_v35, %v5630_v29  ;;  %v9001_v38 = vadd.f32 %v5412_v11, %v9341_v5 }
0x204d   :  { %v9004_v58 = vadd.f32 %v5413_v40, %v9342_v56  ;;  %v9007_v1 = vadd.f32 %v5414_v15, %v9343_v30  ;;  %v9010_v27 = vsub.f32 %v5436_v3, %v8937_v8  ;;  %v9013_v60 = vsub.f32 %v5437_v42, %v8940_v4 }
0x204e   :  { %v5634_v26 = vsel %vm1005_vm8, %v5633_v62, %v5632_v61  ;;  %v5448_v57 = vsub.f32 %v5432_v39, %v8925_v2  ;;  %v5454_v19 = vsub.f32 %v5438_v53, %v8943_v13  ;;  %v9020_v55 = vsub.f32 %v5439_v52, %v8946_v18 }
0x204f   :  { %5649 = vrot.lane.b32.xlu0 %v5634_v26, %s6365_s9  ;;  %v9023_v45 = vsub.f32 %v5441_v0, %v8952_v14  ;;  %v9026_v3 = vsub.f32 %v5442_v43, %v8955_v25  ;;  %v9029_v42 = vsub.f32 %v5443_v31, %v8958_v34  ;;  %v5635_v16 = vrot.slane %v5440_v48, 7 }
0x2050   :  { %v5637_v54 = vrot.slane %v5441_v0, 6  ;;  %v5639_v39 = vrot.slane %v5442_v43, 5  ;;  %v5641_v33 = vrot.slane %v5443_v31, 4  ;;  %v5643_v53 = vrot.slane %v9001_v38, 3 }
0x2051   :  { %v5645_v35 = vrot.slane %v9004_v58, 2  ;;  %v5647_v62 = vrot.slane %v9007_v1, 1  ;;  %v5636_v7 = vsel %vm993_vm2, %v5635_v16, %v5439_v52  ;;  %v5463_v20 = vand.u32 2147483647, %v8975_v37 }
0x2052   :  { %v5464_v12 = vand.u32 2147483647, %v5448_v57  ;;  %v5465_v9 = vand.u32 2147483647, %v8978_v59  ;;  %v5638_v17 = vsel %vm995_vm3, %v5637_v54, %v5636_v7  ;;  %v5466_v44 = vand.u32 2147483647, %v8981_v6 }
0x2053   :  { %v5467_v11 = vand.u32 2147483647, %v8987_v51  ;;  %v5468_v40 = vand.u32 2147483647, %v9010_v27  ;;  %v5640_v24 = vsel %vm997_vm4, %v5639_v39, %v5638_v17  ;;  %v9043_v15 = vsub.f32 %v5440_v48, %v8949_v63 }
0x2054   :  { %v5469_v50 = vand.u32 2147483647, %v9013_v60  ;;  %v5470_v52 = vand.u32 2147483647, %v5454_v19  ;;  %v5642_v22 = vsel %vm999_vm5, %v5641_v33, %v5640_v24  ;;  %vm9047_vm12 = vcmp.lt.f32.partialorder %v5463_v20, 1.0 }
0x2055   :  { %vm9051_vm13 = vcmp.lt.f32.partialorder %v5464_v12, 1.0  ;;  %vm9055_vm14 = vcmp.lt.f32.partialorder %v5465_v9, 1.0  ;;  %v5644_v48 = vsel %vm1001_vm6, %v5643_v53, %v5642_v22  ;;  %vm9060_vm15 = vcmp.lt.f32.partialorder %v5466_v44, 1.0 }
0x2056   :  { %vm9064_vm0 = vcmp.lt.f32.partialorder %v5467_v11, 1.0  ;;  %vm9068_vm1 = vcmp.lt.f32.partialorder %v5468_v40, 1.0  ;;  %v5646_v31 = vsel %vm1003_vm7, %v5645_v35, %v5644_v48  ;;  %vm9073_vm9 = vcmp.lt.f32.partialorder %v5469_v50, 1.0 }
0x2057   :  { %v5495_v5 = vmul.f32 0.5, %v8975_v37  ;;  %v5496_v56 = vmul.f32 0.5, %v5448_v57  ;;  %v5648_v30 = vsel %vm1005_vm8, %v5647_v62, %v5646_v31  ;;  %v5497_v26 = vmul.f32 0.5, %v8978_v59 }
0x2058   :  { %v5498_v16 = vmul.f32 0.5, %v8981_v6  ;;  %v5499_v54 = vmul.f32 0.5, %v8987_v51  ;;  %5651 = vrot.lane.b32.xlu1 %v5648_v30, %s6365_s9  ;;  %vm9083_vm10 = vcmp.lt.f32.partialorder %v5470_v52, 1.0  ;;  %v5500_v33 = vmul.f32 0.5, %v9010_v27 }
0x2059   :  { %v5501_v53 = vmul.f32 0.5, %v9013_v60  ;;  %v5502_v35 = vmul.f32 0.5, %v5454_v19  ;;  %v5512_v7 = vmul.f32 %v5496_v56, %v5448_v57  ;;  %v5513_v62 = vmul.f32 %v5497_v26, %v8978_v59 }
0x205a   :  { %v5514_v17 = vmul.f32 %v5498_v16, %v8981_v6  ;;  %v5515_v24 = vmul.f32 %v5499_v54, %v8987_v51  ;;  %v5511_v22 = vmul.f32 %v5495_v5, %v8975_v37  ;;  %v5516_v48 = vmul.f32 %v5500_v33, %v9010_v27 }
0x205b   :  { %v5517_v31 = vmul.f32 %v5501_v53, %v9013_v60  ;;  %v5884_v30 = vadd.f32 -0.5, %v5463_v20  ;;  %v5885_v34 = vadd.f32 -0.5, %v5464_v12  ;;  %v5886_v25 = vadd.f32 -0.5, %v5465_v9 }
0x205c   :  { %v5887_v18 = vadd.f32 -0.5, %v5466_v44  ;;  %v5888_v13 = vadd.f32 -0.5, %v5467_v11  ;;  %v5518_v14 = vmul.f32 %v5502_v35, %v5454_v19  ;;  %v5889_v4 = vadd.f32 -0.5, %v5468_v40 }
0x205d   :  { %v5890_v57 = vadd.f32 -0.5, %v5469_v50  ;;  %v5891_v56 = vadd.f32 -0.5, %v5470_v52  ;;  %v5544_v59 = vsel %vm9051_vm13, %v5512_v7, %v5885_v34  ;;  %v5545_v6 = vsel %vm9055_vm14, %v5513_v62, %v5886_v25 }
0x205e   :  { %v5546_v37 = vsel %vm9060_vm15, %v5514_v17, %v5887_v18  ;;  %v5547_v51 = vsel %vm9064_vm0, %v5515_v24, %v5888_v13  ;;  %v5460_v27 = vsub.f32 %v9001_v38, %v8969_v21  ;;  %v5461_v60 = vsub.f32 %v9004_v58, %v8972_v28 }
0x205f   :  { %v9109_v19 = vsub.f32 %v9007_v1, %v8984_v23  ;;  %v5671_v34 = vrot.slane %v5544_v59, 7  ;;  %v5543_v25 = vsel %vm9047_vm12, %v5511_v22, %v5884_v30  ;;  %v5548_v18 = vsel %vm9068_vm1, %v5516_v48, %v5889_v4 }
0x2060   :  { %v5549_v13 = vsel %vm9073_vm9, %v5517_v31, %v5890_v57  ;;  %v5673_v20 = vrot.slane %v5545_v6, 6  ;;  %v5550_v38 = vsel %vm9083_vm10, %v5518_v14, %v5891_v56  ;;  %v5675_v12 = vrot.slane %v5546_v37, 5 }
0x2061   :  { %v5672_v58 = vsel %vm993_vm2, %v5671_v34, %v5543_v25  ;;  %v5677_v9 = vrot.slane %v5547_v51, 4  ;;  %v5471_v44 = vand.u32 2147483647, %v9020_v55  ;;  %v5472_v11 = vand.u32 2147483647, %v9043_v15 }
0x2062   :  { %v5674_v1 = vsel %vm995_vm3, %v5673_v20, %v5672_v58  ;;  %v5473_v40 = vand.u32 2147483647, %v9023_v45  ;;  %v5679_v50 = vrot.slane %v5548_v18, 3  ;;  %v5681_v52 = vrot.slane %v5549_v13, 2 }
0x2063   :  { %v5676_v4 = vsel %vm997_vm4, %v5675_v12, %v5674_v1  ;;  %v5683_v49 = vrot.slane %v5550_v38, 1  ;;  %v5474_v14 = vand.u32 2147483647, %v9026_v3  ;;  %v5475_v0 = vand.u32 2147483647, %v9029_v42 }
0x2064   :  { %v5678_v29 = vsel %vm999_vm5, %v5677_v9, %v5676_v4  ;;  %v5476_v43 = vand.u32 2147483647, %v5460_v27  ;;  %v5477_v10 = vand.u32 2147483647, %v5461_v60  ;;  %v5478_v61 = vand.u32 2147483647, %v9109_v19 }
0x2065   :  { %v5680_v36 = vsel %vm1001_vm6, %v5679_v50, %v5678_v29  ;;  %vm9131_vm10 = vcmp.lt.f32.partialorder %v5471_v44, 1.0  ;;  %vm9135_vm12 = vcmp.lt.f32.partialorder %v5472_v11, 1.0  ;;  %vm9139_vm13 = vcmp.lt.f32.partialorder %v5473_v40, 1.0 }
0x2066   :  { %v5682_v5 = vsel %vm1003_vm7, %v5681_v52, %v5680_v36  ;;  %v5503_v33 = vmul.f32 0.5, %v9020_v55  ;;  %v5504_v53 = vmul.f32 0.5, %v9043_v15  ;;  %v5505_v35 = vmul.f32 0.5, %v9023_v45 }
0x2067   :  { %v5684_v39 = vsel %vm1005_vm8, %v5683_v49, %v5682_v5  ;;  %vm9148_vm14 = vcmp.lt.f32.partialorder %v5474_v14, 1.0  ;;  %v5506_v62 = vmul.f32 0.5, %v9026_v3  ;;  %v5507_v17 = vmul.f32 0.5, %v9029_v42 }
0x2068   :  { %5699 = vrot.lane.b32.xlu1 %v5684_v39, %s6364_s17  ;;  %v5508_v24 = vmul.f32 0.5, %v5460_v27  ;;  %vm9154_vm15 = vcmp.lt.f32.partialorder %v5475_v0, 1.0  ;;  %v5509_v48 = vmul.f32 0.5, %v5461_v60  ;;  %v5520_v31 = vmul.f32 %v5504_v53, %v9043_v15 }
0x2069   :  { %v5521_v30 = vmul.f32 %v5505_v35, %v9023_v45  ;;  %vm9160_vm0 = vcmp.lt.f32.partialorder %v5476_v43, 1.0  ;;  %v5510_v56 = vmul.f32 0.5, %v9109_v19  ;;  %v5519_v59 = vmul.f32 %v5503_v33, %v9020_v55 }
0x206a   :  { %v5522_v6 = vmul.f32 %v5506_v62, %v9026_v3  ;;  %v5523_v37 = vmul.f32 %v5507_v17, %v9029_v42  ;;  %v5524_v51 = vmul.f32 %v5508_v24, %v5460_v27  ;;  %v5893_v34 = vadd.f32 -0.5, %v5472_v11 }
0x206b   :  { %v5894_v25 = vadd.f32 -0.5, %v5473_v40  ;;  %v5892_v18 = vadd.f32 -0.5, %v5471_v44  ;;  %v5895_v13 = vadd.f32 -0.5, %v5474_v14  ;;  %v5896_v15 = vadd.f32 -0.5, %v5475_v0 }
0x206c   :  { %v5897_v20 = vadd.f32 -0.5, %v5476_v43  ;;  %v5525_v45 = vmul.f32 %v5509_v48, %v5461_v60  ;;  %v5898_v38 = vadd.f32 -0.5, %v5477_v10  ;;  %v5552_v58 = vsel %vm9135_vm12, %v5520_v31, %v5893_v34  ;;  %v9377_v31 = vld [vmem:[#allocation5_spill] sm:$0xff] }
0x206d   :  { %v5553_v12 = vsel %vm9139_vm13, %v5521_v30, %v5894_v25  ;;  %vm9172_vm1 = vcmp.lt.f32.partialorder %v5477_v10, 1.0  ;;  %v5526_v3 = vmul.f32 %v5510_v56, %v9109_v19  ;;  %v5899_v42 = vadd.f32 -0.5, %v5478_v61 }
0x206e   :  { %v5554_v27 = vsel %vm9148_vm14, %v5522_v6, %v5895_v13  ;;  %vm9179_vm9 = vcmp.lt.f32.partialorder %v5478_v61, 1.0  ;;  %v5555_v60 = vsel %vm9154_vm15, %v5523_v37, %v5896_v15  ;;  %v5685_v1 = vrot.slane %v5552_v58, 7  ;;  %v9382_v15 = vld [vmem:[#allocation7_spill] sm:$0xff] }
0x206f   :  { %v5687_v44 = vrot.slane %v5553_v12, 6  ;;  %v5551_v11 = vsel %vm9131_vm10, %v5519_v59, %v5892_v18  ;;  %v5556_v40 = vsel %vm9160_vm0, %v5524_v51, %v5897_v20  ;;  %v5557_v19 = vsel %vm9172_vm1, %v5525_v45, %v5898_v38  ;;  %v9379_v59 = vld [vmem:[#allocation4_spill] sm:$0xff]  ;;  %v9380_v51 = vld [vmem:[#allocation6_spill] sm:$0xff] }
0x2070   :  { %v5686_v4 = vsel %vm993_vm2, %v5685_v1, %v5551_v11  ;;  %v5689_v50 = vrot.slane %v5554_v27, 5  ;;  %v5558_v52 = vsel %vm9179_vm9, %v5526_v3, %v5899_v42  ;;  %v5691_v49 = vrot.slane %v5555_v60, 4 }
0x2071   :  { %v5688_v29 = vsel %vm995_vm3, %v5687_v44, %v5686_v4  ;;  %v5693_v0 = vrot.slane %v5556_v40, 3  ;;  %v5695_v43 = vrot.slane %v5557_v19, 2  ;;  %v5697_v61 = vrot.slane %v5558_v52, 1 }
0x2072   :  { %v5690_v14 = vsel %vm997_vm4, %v5689_v50, %v5688_v29  ;;  %v5575_v16 = vrot.slane %v8925_v2, 7  ;;  %v5577_v54 = vrot.slane %v8928_v41, 6  ;;  %v5579_v53 = vrot.slane %v8931_v32, 5  ;;  %v9376_v41 = vld [vmem:[#allocation2_spill] sm:$0xff]  ;;  %v9378_v32 = vld [vmem:[#allocation3_spill] sm:$0xff] }
0x2073   :  { %v5692_v36 = vsel %vm999_vm5, %v5691_v49, %v5690_v14  ;;  %v5581_v7 = vrot.slane %v8934_v46, 4  ;;  %v5583_v17 = vrot.slane %v8937_v8, 3  ;;  %v5589_v2 = vrot.slane %v8949_v63, 7 }
0x2074   :  { %v5694_v10 = vsel %vm1001_vm6, %v5693_v0, %v5692_v36  ;;  %v5576_v39 = vsel %vm993_vm2, %v5575_v16, %v8922_v47  ;;  %v5585_v22 = vrot.slane %v9376_v41, 2  ;;  %v5591_v30 = vrot.slane %v9377_v31, 6 }
0x2075   :  { %v5696_v5 = vsel %vm1003_vm7, %v5695_v43, %v5694_v10  ;;  %v5578_v33 = vsel %vm995_vm3, %v5577_v54, %v5576_v39  ;;  %v5587_v57 = vrot.slane %v9378_v32, 1  ;;  %v5590_v46 = vsel %vm993_vm2, %v5589_v2, %v9379_v59 }
0x2076   :  { %v5698_v26 = vsel %vm1005_vm8, %v5697_v61, %v5696_v5  ;;  %v5580_v35 = vsel %vm997_vm4, %v5579_v53, %v5578_v33  ;;  %vm5709_vm10 = vcmask 785408   ;;  %v5592_v63 = vsel %vm995_vm3, %v5591_v30, %v5590_v46 }
0x2077   :  { %5701 = vrot.lane.b32.xlu1 %v5698_v26, %s6364_s17  ;;  %v5582_v62 = vsel %vm999_vm5, %v5581_v7, %v5580_v35  ;;  %v5593_v34 = vrot.slane %v9380_v51, 5  ;;  %vm9381_vm12 = vcmask 523264   ;;  %v5595_v20 = vrot.slane %v9382_v15, 4 }
0x2078   :  { %v5584_v24 = vsel %vm1001_vm6, %v5583_v17, %v5582_v62  ;;  %v5597_v38 = vrot.slane %v8969_v21, 3  ;;  %v5599_v12 = vrot.slane %v8972_v28, 2  ;;  %v5601_v3 = vrot.slane %v8984_v23, 1  ;;  %vm9383_vm2 = vmmov %vm9381_vm12 }
0x2079   :  { %v5586_v47 = vsel %vm1003_vm7, %v5585_v22, %v5584_v24  ;;  %v5594_v13 = vsel %vm997_vm4, %v5593_v34, %v5592_v63 }
0x207a   :  { %v5588_v6 = vsel %vm1005_vm8, %v5587_v57, %v5586_v47  ;;  %v5596_v45 = vsel %vm999_vm5, %v5595_v20, %v5594_v13 }
0x207b   :  { %v5598_v58 = vsel %vm1001_vm6, %v5597_v38, %v5596_v45 }
0x207c   :  { %v5600_v55 = vsel %vm1003_vm7, %v5599_v12, %v5598_v58 }
0x207d   :  { %v5602_v42 = vsel %vm1005_vm8, %v5601_v3, %v5600_v55 }
0x20c1   :  { %v5650_v56 = vpop.permute.xlu0 %5649 }
0x20c2   :  { %v5705_v8 = vsel %vm795_vm11, %v5588_v6, %v5650_v56 }
0x20ca   :  { %v5652_v48 = vpop.permute.xlu1 %5651 }
0x20cb   :  { %v5706_v27 = vsel %vm795_vm11, %v5602_v42, %v5652_v48 }
0x20da   :  { %v5700_v37 = vpop.permute.xlu1 %5699 }
0x20db   :  { %v5707_v25 = vsel %vm9381_vm12, %v5705_v8, %v5700_v37 }
0x20dc   :  { %v5710_v18 = vsel %vm5709_vm10, %v5707_v25, 0.0 }
0x20dd   :  { %5712 = vst [vmem:[%s9253_s10] sm:$0xff] %v5710_v18 }
0x20e9   :  { %v5702_v9 = vpop.permute.xlu1 %5701 }
0x20ea   :  { %v5708_v60 = vsel %vm9383_vm2, %v5706_v27, %v5702_v9 }
0x20eb   :  { %v5711_v1 = vsel %vm5709_vm10, %v5708_v60, 0.0 }
0x20ec   :  { %5713 = vst [vmem:[%s9253_s10 + $0x8] sm:$0xff] %v5711_v1 }

</bundles_post_ra>
